<compile_context>
chip_gen: v7x
topology: tpu7x:2x2x1
jax: 0.10.0
libtpu: 0.0.40
codegen_flags: <defaults>
</compile_context>

<pallas_src>
import functools
import math

import jax
import jax.numpy as jnp
from jax.experimental import pallas as pl
from jax.experimental.pallas import tpu as pltpu

_MIB = 1024 * 1024


# ----------------------------------------------------------------------------
# small helpers
# ----------------------------------------------------------------------------

def _nbytes(shape, dtype):
    n = 1
    for s in shape:
        n *= int(s)
    return n * jnp.dtype(dtype).itemsize


def _vmem_limit(block_bytes, *, floor=32 * _MIB, cap=64 * _MIB):
    # double-buffered pipeline + headroom for compiler temporaries; capped at
    # v7x physical VMEM so the same limit is valid on every generation.
    return int(max(floor, min(cap, 2 * block_bytes + 8 * _MIB)))


def _row_tile(M, cap=512):
    if M <= cap:
        return M
    for t in (512, 256, 128, 64, 32, 16, 8):
        if M % t == 0:
            return t
    return M


def _ff_tile(FF, cap=1024):
    if FF <= cap:
        return FF
    for t in (1024, 512, 256, 128):
        if FF % t == 0:
            return t
    return FF


def _kv_tile(S, cap=256):
    # key-axis tile for the AST kernel; multiples of 128 keep the mask block
    # lane-aligned when S is actually tiled.
    if S <= cap:
        return S
    for t in (256, 128):
        if S % t == 0:
            return t
    return S


def _split_heads(x2d, n_groups, dh):
    """(R, G*dh) -> (G, R, dh): one lane-split reshape + one major-dim transpose."""
    r = x2d.shape[0]
    return jnp.transpose(x2d.reshape(r, n_groups, dh), (1, 0, 2))


def _merge_heads(x3d):
    """(G, R, dh) -> (R, G*dh)."""
    g, r, dh = x3d.shape
    return jnp.transpose(x3d, (1, 0, 2)).reshape(r, g * dh)


# ----------------------------------------------------------------------------
# K1: father gather + father_proj + sequence self-attention
# ----------------------------------------------------------------------------

def _father_seqattn_kernel(x_ref, idx_ref, wt_ref, wb_ref, bp_ref,
                           wqkv_ref, bqkv_ref, wo_ref, bo_ref, mask_ref,
                           xp_ref, attn_ref, *, num_heads):
    S, D = x_ref.shape
    H = num_heads
    Dh = D // H
    f32, bf16 = jnp.float32, jnp.bfloat16

    x = x_ref[...]                                         # (S, D) f32
    # exact father gather: one-hot has exactly one 1.0 per row -> f32 matmul
    # copies the row exactly (parity with torch.gather).
    idx = idx_ref[...]                                     # (S, 1) i32
    iota = jax.lax.broadcasted_iota(jnp.int32, (S, S), 1)
    oneh = (iota == idx).astype(f32)
    father = jnp.dot(oneh, x, preferred_element_type=f32)  # (S, D) f32
    # TODO(synk): for large S replace the O(S^2 D) one-hot with an
    # SMEM-prefetched-index DMA gather.

    xb = x.astype(bf16)
    xp = (jnp.dot(father.astype(bf16), wt_ref[...], preferred_element_type=f32)
          + jnp.dot(xb, wb_ref[...], preferred_element_type=f32)
          + bp_ref[...])                                   # (S, D) f32
    xp_ref[...] = xp.astype(xp_ref.dtype)

    qkv = (jnp.dot(xp.astype(bf16), wqkv_ref[...], preferred_element_type=f32)
           + bqkv_ref[...])                                # (S, 3D) f32
    qkv_h = _split_heads(qkv.astype(bf16), 3 * H, Dh)      # (3H, S, Dh)
    q, k, v = qkv_h[:H], qkv_h[H:2 * H], qkv_h[2 * H:]

    scale = 1.0 / math.sqrt(Dh)
    s = jax.lax.dot_general(q, k, (((2,), (2,)), ((0,), (0,))),
                            preferred_element_type=f32)    # (H, S, S)
    s = s * scale + mask_ref[...][None]                    # (1,S) -> (1,1,S)
    s = s - jnp.max(s, axis=-1, keepdims=True)
    p = jnp.exp(s)
    p = p * pl.reciprocal(jnp.sum(p, axis=-1, keepdims=True), approx=True)
    ctx = jax.lax.dot_general(p.astype(bf16), v, (((2,), (1,)), ((0,), (0,))),
                              preferred_element_type=f32)  # (H, S, Dh)
    ctx2 = _merge_heads(ctx.astype(bf16))                  # (S, D) bf16
    attn = jnp.dot(ctx2, wo_ref[...], preferred_element_type=f32) + bo_ref[...]
    attn_ref[...] = attn.astype(attn_ref.dtype)


def father_seq_attn(x, idx, wt, wb, bp, wqkv, bqkv, wo, bo, mask, *, num_heads):
    B, S, D = x.shape
    kernel = functools.partial(_father_seqattn_kernel, num_heads=num_heads)
    blk = (_nbytes((S, D), jnp.float32) + _nbytes((S, 1), jnp.int32)
           + 3 * _nbytes((D, D), jnp.bfloat16) + _nbytes((D, 3 * D), jnp.bfloat16)
           + _nbytes((1, 3 * D), jnp.float32) + 2 * _nbytes((1, D), jnp.float32)
           + _nbytes((1, S), jnp.float32) + 2 * _nbytes((S, D), jnp.bfloat16))
    return pl.pallas_call(
        kernel,
        out_shape=(jax.ShapeDtypeStruct((B, S, D), jnp.bfloat16),
                   jax.ShapeDtypeStruct((B, S, D), jnp.bfloat16)),
        grid=(B,),
        in_specs=[
            pl.BlockSpec((None, S, D), lambda b: (b, 0, 0)),
            pl.BlockSpec((None, S, 1), lambda b: (b, 0, 0)),
            pl.BlockSpec((D, D), lambda b: (0, 0)),
            pl.BlockSpec((D, D), lambda b: (0, 0)),
            pl.BlockSpec((1, D), lambda b: (0, 0)),
            pl.BlockSpec((D, 3 * D), lambda b: (0, 0)),
            pl.BlockSpec((1, 3 * D), lambda b: (0, 0)),
            pl.BlockSpec((D, D), lambda b: (0, 0)),
            pl.BlockSpec((1, D), lambda b: (0, 0)),
            pl.BlockSpec((None, 1, S), lambda b: (b, 0, 0)),
        ],
        out_specs=(pl.BlockSpec((None, S, D), lambda b: (b, 0, 0)),
                   pl.BlockSpec((None, S, D), lambda b: (b, 0, 0))),
        compiler_params=pltpu.CompilerParams(
            dimension_semantics=("parallel",),
            vmem_limit_bytes=_vmem_limit(blk)),
    )(x, idx, wt, wb, bp, wqkv, bqkv, wo, bo, mask)


# ----------------------------------------------------------------------------
# K2: AST (relation-aware) self-attention, key-tiled, LN1 fused into epilogue
# ----------------------------------------------------------------------------

def _ast_ln1_kernel(xp_ref, x_ref, e_ref, mask_ref,
                    wq_ref, bq_ref, wkv_ref, bkv_ref, wo_ref, bo_ref,
                    g1_ref, b1_ref, n_ref,
                    q_scr, qi_scr, m_scr, l_scr, acc_scr, *, num_heads, kv_tile):
    S, D = x_ref.shape
    H = num_heads
    Dh = D // H
    Tk = kv_tile
    f32, bf16 = jnp.float32, jnp.bfloat16
    kv = pl.program_id(1)
    scale = 1.0 / math.sqrt(Dh)

    @pl.when(kv == 0)
    def _():
        xb = x_ref[...]                                      # (S, D) bf16
        qf = jnp.dot(xb, wq_ref[...], preferred_element_type=f32) + bq_ref[...]
        qb = qf.astype(bf16)
        q_scr[...] = _split_heads(qb, H, Dh)                 # (H, S, Dh)
        qi_scr[...] = qb.reshape(S, H, Dh)                   # (S, H, Dh)
        m_scr[...] = jnp.full(m_scr.shape, -jnp.inf, f32)
        l_scr[...] = jnp.zeros(l_scr.shape, f32)
        acc_scr[...] = jnp.zeros(acc_scr.shape, f32)

    # K/V for this key tile, projected from the resident self_seq rows.
    start = pl.multiple_of(kv * Tk, Tk)
    x_kv = x_ref[pl.ds(start, Tk), :]                        # (Tk, D) bf16
    kvp = jnp.dot(x_kv, wkv_ref[...], preferred_element_type=f32) + bkv_ref[...]
    kvb = _split_heads(kvp.astype(bf16), 2 * H, Dh)          # (2H, Tk, Dh)
    k_t, v_t = kvb[:H], kvb[H:]

    q = q_scr[...]                                           # (H, S, Dh) bf16
    qi = qi_scr[...]                                         # (S, H, Dh) bf16
    e = e_ref[...]                                           # (S, Tk, Dh) bf16

    s = jax.lax.dot_general(q, k_t, (((2,), (2,)), ((0,), (0,))),
                            preferred_element_type=f32)      # (H, S, Tk)
    # edge score bias: bias[h,i,j] = sum_d q[i,h,d] * e[i,j,d]
    bias_i = jax.lax.dot_general(qi, e, (((2,), (2,)), ((0,), (0,))),
                                 preferred_element_type=f32)  # (S, H, Tk)
    # NOTE: edge bias is scaled together with q.k^T (matches reference ASTAttention).
    s = (s + jnp.transpose(bias_i, (1, 0, 2))) * scale \
        + mask_ref[...].astype(f32)[None]                    # (H, S, Tk)

    # online softmax update
    m_prev = m_scr[...]
    m_new = jnp.maximum(m_prev, jnp.max(s, axis=-1, keepdims=True))
    alpha = jnp.exp(m_prev - m_new)
    p = jnp.exp(s - m_new)                                   # (H, S, Tk) f32
    l_scr[...] = alpha * l_scr[...] + jnp.sum(p, axis=-1, keepdims=True)
    pb = p.astype(bf16)
    ctx_t = jax.lax.dot_general(pb, v_t, (((2,), (1,)), ((0,), (0,))),
                                preferred_element_type=f32)  # (H, S, Dh)
    # edge value term: ev[h,i,d] = sum_j p[h,i,j] * e[i,j,d]
    ev_i = jax.lax.dot_general(jnp.transpose(pb, (1, 0, 2)), e,
                               (((2,), (1,)), ((0,), (0,))),
                               preferred_element_type=f32)   # (S, H, Dh)
    acc_scr[...] = alpha * acc_scr[...] + ctx_t + jnp.transpose(ev_i, (1, 0, 2))
    m_scr[...] = m_new

    @pl.when(kv == pl.num_programs(1) - 1)
    def _():
        ctx = acc_scr[...] * pl.reciprocal(l_scr[...], approx=True)  # (H,S,Dh)
        ctx2 = _merge_heads(ctx.astype(bf16))                        # (S, D)
        ast = jnp.dot(ctx2, wo_ref[...], preferred_element_type=f32) + bo_ref[...]
        # LN1(x_proj + self_seq_h + self_ast_h) fused here.
        vsum = xp_ref[...].astype(f32) + x_ref[...].astype(f32) + ast
        mu = jnp.mean(vsum, axis=-1, keepdims=True)
        var = jnp.mean((vsum - mu) ** 2, axis=-1, keepdims=True)
        n = (vsum - mu) * jax.lax.rsqrt(var + 1e-5) * g1_ref[...] + b1_ref[...]
        n_ref[...] = n.astype(n_ref.dtype)


def ast_ln1(x_proj, self_seq, edge, edge_mask, wq, bq, wkv, bkv, wo, bo,
            ln1_g, ln1_b, *, num_heads):
    B, S, D = self_seq.shape
    H = num_heads
    Dh = D // H
    Tk = _kv_tile(S)
    n_kv = S // Tk
    kernel = functools.partial(_ast_ln1_kernel, num_heads=H, kv_tile=Tk)
    blk = (3 * _nbytes((S, D), jnp.bfloat16)                 # x_proj, self_seq, n
           + _nbytes((S, Tk, Dh), jnp.bfloat16) + _nbytes((S, Tk), jnp.bfloat16)
           + 2 * _nbytes((D, D), jnp.bfloat16) + _nbytes((D, 2 * D), jnp.bfloat16)
           + _nbytes((1, 2 * D), jnp.float32) + 4 * _nbytes((1, D), jnp.float32)
           + 2 * _nbytes((H, S, Dh), jnp.bfloat16)
           + 2 * _nbytes((H, S, 1), jnp.float32)
           + _nbytes((H, S, Dh), jnp.float32))
    return pl.pallas_call(
        kernel,
        out_shape=jax.ShapeDtypeStruct((B, S, D), jnp.bfloat16),
        grid=(B, n_kv),
        in_specs=[
            pl.BlockSpec((None, S, D), lambda b, kv: (b, 0, 0)),        # x_proj
            pl.BlockSpec((None, S, D), lambda b, kv: (b, 0, 0)),        # self_seq
            pl.BlockSpec((None, S, Tk, Dh), lambda b, kv: (b, 0, kv, 0)),
            pl.BlockSpec((None, S, Tk), lambda b, kv: (b, 0, kv)),
            pl.BlockSpec((D, D), lambda b, kv: (0, 0)),
            pl.BlockSpec((1, D), lambda b, kv: (0, 0)),
            pl.BlockSpec((D, 2 * D), lambda b, kv: (0, 0)),
            pl.BlockSpec((1, 2 * D), lambda b, kv: (0, 0)),
            pl.BlockSpec((D, D), lambda b, kv: (0, 0)),
            pl.BlockSpec((1, D), lambda b, kv: (0, 0)),
            pl.BlockSpec((1, D), lambda b, kv: (0, 0)),
            pl.BlockSpec((1, D), lambda b, kv: (0, 0)),
        ],
        out_specs=pl.BlockSpec((None, S, D), lambda b, kv: (b, 0, 0)),
        scratch_shapes=[
            pltpu.VMEM((H, S, Dh), jnp.bfloat16),   # q, head-leading layout
            pltpu.VMEM((S, H, Dh), jnp.bfloat16),   # q, row-leading layout
            pltpu.VMEM((H, S, 1), jnp.float32),     # running max
            pltpu.VMEM((H, S, 1), jnp.float32),     # running denom
            pltpu.VMEM((H, S, Dh), jnp.float32),    # running ctx (+edge value)
        ],
        compiler_params=pltpu.CompilerParams(
            dimension_semantics=("parallel", "arbitrary"),
            vmem_limit_bytes=_vmem_limit(blk)),
    )(x_proj, self_seq, edge, edge_mask, wq, bq, wkv, bkv, wo, bo,
      ln1_g.reshape(1, D).astype(jnp.float32),
      ln1_b.reshape(1, D).astype(jnp.float32))


# ----------------------------------------------------------------------------
# K3: fused encoder-attn + REM-attn (2H head groups, two masks)
# ----------------------------------------------------------------------------

def _cross_attn_kernel(n_ref, enc_ref, wq_ref, bq_ref, wk_ref, bk_ref,
                       wv_ref, bv_ref, wo_ref, bo_ref, menc_ref, mrem_ref,
                       o_ref, *, num_heads):
    Sq, D = n_ref.shape
    Skv = enc_ref.shape[0]
    H = num_heads
    G = 2 * H
    Dh = D // H
    f32, bf16 = jnp.float32, jnp.bfloat16

    nb = n_ref[...]                                          # (Sq, D) bf16
    eb = enc_ref[...].astype(bf16)                           # (Skv, D) bf16
    qf = jnp.dot(nb, wq_ref[...], preferred_element_type=f32) + bq_ref[...]
    kf = jnp.dot(eb, wk_ref[...], preferred_element_type=f32) + bk_ref[...]
    vf = jnp.dot(eb, wv_ref[...], preferred_element_type=f32) + bv_ref[...]
    q = _split_heads(qf.astype(bf16), G, Dh)                 # (G, Sq, Dh)
    k = _split_heads(kf.astype(bf16), G, Dh)                 # (G, Skv, Dh)
    v = _split_heads(vf.astype(bf16), G, Dh)

    # groups 0..H-1 -> encoder mask, groups H..2H-1 -> REM mask
    g_iota = jax.lax.broadcasted_iota(jnp.int32, (G, 1, Skv), 0)
    mask = jnp.where(g_iota < H, menc_ref[...][None], mrem_ref[...][None])

    scale = 1.0 / math.sqrt(Dh)
    s = jax.lax.dot_general(q, k, (((2,), (2,)), ((0,), (0,))),
                            preferred_element_type=f32)      # (G, Sq, Skv)
    s = s * scale + mask
    s = s - jnp.max(s, axis=-1, keepdims=True)
    p = jnp.exp(s)
    p = p * pl.reciprocal(jnp.sum(p, axis=-1, keepdims=True), approx=True)
    ctx = jax.lax.dot_general(p.astype(bf16), v, (((2,), (1,)), ((0,), (0,))),
                              preferred_element_type=f32)    # (G, Sq, Dh)
    ctx2 = _merge_heads(ctx.astype(bf16))                    # (Sq, 2D)
    out = jnp.dot(ctx2, wo_ref[...], preferred_element_type=f32) + bo_ref[...]
    o_ref[...] = out.astype(o_ref.dtype)


def cross_attn(n, enc, wq, bq, wk, bk, wv, bv, wo, bo, m_enc, m_rem, *, num_heads):
    B, Sq, D = n.shape
    Skv = enc.shape[1]
    kernel = functools.partial(_cross_attn_kernel, num_heads=num_heads)
    blk = (_nbytes((Sq, D), jnp.bfloat16) + _nbytes((Skv, D), jnp.float32)
           + 3 * _nbytes((D, 2 * D), jnp.bfloat16) + _nbytes((2 * D, D), jnp.bfloat16)
           + 3 * _nbytes((1, 2 * D), jnp.float32) + _nbytes((1, D), jnp.float32)
           + 2 * _nbytes((1, Skv), jnp.float32) + _nbytes((Sq, D), jnp.bfloat16))
    return pl.pallas_call(
        kernel,
        out_shape=jax.ShapeDtypeStruct((B, Sq, D), jnp.bfloat16),
        grid=(B,),
        in_specs=[
            pl.BlockSpec((None, Sq, D), lambda b: (b, 0, 0)),
            pl.BlockSpec((None, Skv, D), lambda b: (b, 0, 0)),
            pl.BlockSpec((D, 2 * D), lambda b: (0, 0)),
            pl.BlockSpec((1, 2 * D), lambda b: (0, 0)),
            pl.BlockSpec((D, 2 * D), lambda b: (0, 0)),
            pl.BlockSpec((1, 2 * D), lambda b: (0, 0)),
            pl.BlockSpec((D, 2 * D), lambda b: (0, 0)),
            pl.BlockSpec((1, 2 * D), lambda b: (0, 0)),
            pl.BlockSpec((2 * D, D), lambda b: (0, 0)),
            pl.BlockSpec((1, D), lambda b: (0, 0)),
            pl.BlockSpec((None, 1, Skv), lambda b: (b, 0, 0)),
            pl.BlockSpec((None, 1, Skv), lambda b: (b, 0, 0)),
        ],
        out_specs=pl.BlockSpec((None, Sq, D), lambda b: (b, 0, 0)),
        compiler_params=pltpu.CompilerParams(
            dimension_semantics=("parallel",),
            vmem_limit_bytes=_vmem_limit(blk)),
    )(n, enc, wq, bq, wk, bk, wv, bv, wo, bo, m_enc, m_rem)


# ----------------------------------------------------------------------------
# K4: LN2 + MLP (FF-tiled, f32 accumulator, cached bf16 LN2) + LN3
# ----------------------------------------------------------------------------

def _ln_mlp_ln_kernel(n_ref, c_ref, g2_ref, b2_ref, w1_ref, b1_ref,
                      w2_ref, bm2_ref, g3_ref, b3_ref, o_ref,
                      n2_scr, n2b_scr, acc_scr):
    f = pl.program_id(1)
    f32 = jnp.float32

    @pl.when(f == 0)
    def _():
        v = n_ref[...].astype(f32) + c_ref[...].astype(f32)
        mu = jnp.mean(v, axis=-1, keepdims=True)
        var = jnp.mean((v - mu) ** 2, axis=-1, keepdims=True)
        n2 = (v - mu) * jax.lax.rsqrt(var + 1e-5) * g2_ref[...] + b2_ref[...]
        n2_scr[...] = n2
        n2b_scr[...] = n2.astype(n2b_scr.dtype)   # cached bf16 copy, cast once
        acc_scr[...] = jnp.zeros(acc_scr.shape, f32)

    h = (jnp.dot(n2b_scr[...], w1_ref[...], preferred_element_type=f32)
         + b1_ref[...])
    h = jax.nn.gelu(h, approximate=True)
    acc_scr[...] += jnp.dot(h.astype(jnp.bfloat16), w2_ref[...],
                            preferred_element_type=f32)

    @pl.when(f == pl.num_programs(1) - 1)
    def _():
        v = n2_scr[...] + acc_scr[...] + bm2_ref[...]
        mu = jnp.mean(v, axis=-1, keepdims=True)
        var = jnp.mean((v - mu) ** 2, axis=-1, keepdims=True)
        o_ref[...] = ((v - mu) * jax.lax.rsqrt(var + 1e-5)
                      * g3_ref[...] + b3_ref[...])


def ln_mlp_ln(n, c, g2, b2, w1, b1, w2, bm2, g3, b3):
    B, S, D = n.shape
    FF = w1.shape[1]
    M = B * S
    mt = _row_tile(M, cap=512)
    fft = _ff_tile(FF)
    blk = (2 * _nbytes((mt, D), jnp.bfloat16) + 6 * _nbytes((1, D), jnp.float32)
           + _nbytes((D, fft), jnp.bfloat16) + _nbytes((1, fft), jnp.float32)
           + _nbytes((fft, D), jnp.bfloat16) + _nbytes((mt, D), jnp.float32)
           + 2 * _nbytes((mt, D), jnp.float32) + _nbytes((mt, D), jnp.bfloat16))
    out = pl.pallas_call(
        _ln_mlp_ln_kernel,
        out_shape=jax.ShapeDtypeStruct((M, D), jnp.float32),
        grid=(M // mt, FF // fft),
        in_specs=[
            pl.BlockSpec((mt, D), lambda m, f: (m, 0)),
            pl.BlockSpec((mt, D), lambda m, f: (m, 0)),
            pl.BlockSpec((1, D), lambda m, f: (0, 0)),
            pl.BlockSpec((1, D), lambda m, f: (0, 0)),
            pl.BlockSpec((D, fft), lambda m, f: (0, f)),
            pl.BlockSpec((1, fft), lambda m, f: (0, f)),
            pl.BlockSpec((fft, D), lambda m, f: (f, 0)),
            pl.BlockSpec((1, D), lambda m, f: (0, 0)),
            pl.BlockSpec((1, D), lambda m, f: (0, 0)),
            pl.BlockSpec((1, D), lambda m, f: (0, 0)),
        ],
        out_specs=pl.BlockSpec((mt, D), lambda m, f: (m, 0)),
        scratch_shapes=[pltpu.VMEM((mt, D), jnp.float32),
                        pltpu.VMEM((mt, D), jnp.bfloat16),
                        pltpu.VMEM((mt, D), jnp.float32)],
        compiler_params=pltpu.CompilerParams(
            dimension_semantics=("parallel", "arbitrary"),
            vmem_limit_bytes=_vmem_limit(blk)),
    )(n.reshape(M, D), c.reshape(M, D),
      g2.reshape(1, D), b2.reshape(1, D),
      w1, b1.reshape(1, FF), w2, bm2.reshape(1, D),
      g3.reshape(1, D), b3.reshape(1, D))
    return out.reshape(B, S, D)


# ----------------------------------------------------------------------------
# EdgeDecoderBlock forward
# ----------------------------------------------------------------------------

def edge_decoder_block(params, encoder_out, rem_tags, nodes_h,
                       next_father_indices, edge_embedding,
                       node_mask, edge_mask, encoder_mask, num_heads):
    B, S, D = nodes_h.shape
    S_enc = encoder_out.shape[1]
    H = num_heads
    bf16, f32 = jnp.bfloat16, jnp.float32
    p = params

    # --- fuse / cast parameters (bf16 matmul operands, f32 biases) ---
    w_father = p["father_w"].astype(bf16)                    # (2D, D)
    wt, wb = w_father[:D], w_father[D:]
    b_father = p["father_b"].reshape(1, D).astype(f32)

    def qkv_cat(ap):
        w = jnp.concatenate([ap["wq"], ap["wk"], ap["wv"]], axis=1).astype(bf16)
        b = jnp.concatenate([ap["bq"], ap["bk"], ap["bv"]]).reshape(1, 3 * D)
        return w, b.astype(f32)

    wqkv_seq, bqkv_seq = qkv_cat(p["self_seq"])
    wo_seq = p["self_seq"]["wo"].astype(bf16)
    bo_seq = p["self_seq"]["bo"].reshape(1, D).astype(f32)

    wq_ast = p["self_ast"]["wq"].astype(bf16)
    bq_ast = p["self_ast"]["bq"].reshape(1, D).astype(f32)
    wkv_ast = jnp.concatenate([p["self_ast"]["wk"], p["self_ast"]["wv"]],
                              axis=1).astype(bf16)
    bkv_ast = jnp.concatenate([p["self_ast"]["bk"], p["self_ast"]["bv"]]
                              ).reshape(1, 2 * D).astype(f32)
    wo_ast = p["self_ast"]["wo"].astype(bf16)
    bo_ast = p["self_ast"]["bo"].reshape(1, D).astype(f32)

    # encoder + REM cross attention fused into one 2H-head attention
    wq_x = jnp.concatenate([p["enc"]["wq"], p["rem"]["wq"]], axis=1).astype(bf16)
    bq_x = jnp.concatenate([p["enc"]["bq"], p["rem"]["bq"]]).reshape(1, 2 * D).astype(f32)
    wk_x = jnp.concatenate([p["enc"]["wk"], p["rem"]["wk"]], axis=1).astype(bf16)
    bk_x = jnp.concatenate([p["enc"]["bk"], p["rem"]["bk"]]).reshape(1, 2 * D).astype(f32)
    wv_x = jnp.concatenate([p["enc"]["wv"], p["rem"]["wv"]], axis=1).astype(bf16)
    bv_x = jnp.concatenate([p["enc"]["bv"], p["rem"]["bv"]]).reshape(1, 2 * D).astype(f32)
    wo_x = jnp.concatenate([p["enc"]["wo"], p["rem"]["wo"]], axis=0).astype(bf16)
    bo_x = (p["enc"]["bo"] + p["rem"]["bo"]).reshape(1, D).astype(f32)

    # --- masks: no H / query replication; edge mask shipped compactly as bf16 ---
    nm = node_mask.reshape(B, 1, S).astype(f32)
    em = encoder_mask.reshape(B, 1, S_enc).astype(f32)
    rm = (1.0 - (rem_tags[:, None, :] == 2).astype(f32)) * -1e16     # (B,1,S_enc)
    edm = edge_mask.reshape(B, S, S).astype(bf16)

    idx = next_father_indices.astype(jnp.int32).reshape(B, S, 1)
    edge_bf = edge_embedding.astype(bf16)

    # 1) father gather + father_proj + sequence self-attention (bf16 hand-offs)
    x_proj, self_seq_h = father_seq_attn(
        nodes_h, idx, wt, wb, b_father,
        wqkv_seq, bqkv_seq, wo_seq, bo_seq, nm, num_heads=H)

    # 2) AST attention + LN1(x + self_seq + self_ast) fused, key-axis tiled
    n = ast_ln1(x_proj, self_seq_h, edge_bf, edm,
                wq_ast, bq_ast, wkv_ast, bkv_ast, wo_ast, bo_ast,
                p["ln1_g"], p["ln1_b"], num_heads=H)

    # 3) enc-attn + REM-attn fused (output = encoder_attn_h + rem_attn_h)
    cross_h = cross_attn(n, encoder_out, wq_x, bq_x, wk_x, bk_x, wv_x, bv_x,
                         wo_x, bo_x, em, rm, num_heads=H)

    # 4) h = LN3(n2 + MLP(n2)) with n2 = LN2(n + cross_h), all in one kernel
    return ln_mlp_ln(n, cross_h,
                     p["ln2_g"], p["ln2_b"],
                     p["mlp_w1"].astype(bf16), p["mlp_b1"],
                     p["mlp_w2"].astype(bf16), p["mlp_b2"],
                     p["ln3_g"], p["ln3_b"])


# ----------------------------------------------------------------------------
# Deterministic parameter init
# ----------------------------------------------------------------------------

def init_attn_params(key, D):
    ks = jax.random.split(key, 4)
    z = jnp.zeros((D,), jnp.float32)
    w = lambda k: 0.02 * jax.random.normal(k, (D, D), jnp.float32)
    return {"wq": w(ks[0]), "bq": z, "wk": w(ks[1]), "bk": z,
            "wv": w(ks[2]), "bv": z, "wo": w(ks[3]), "bo": z}


def init_params(key, D, FF):
    ks = jax.random.split(key, 8)
    return {
        "father_w": 0.02 * jax.random.normal(ks[0], (2 * D, D), jnp.float32),
        "father_b": jnp.zeros((D,), jnp.float32),
        "self_seq": init_attn_params(ks[1], D),
        "self_ast": init_attn_params(ks[2], D),
        "enc": init_attn_params(ks[3], D),
        "rem": init_attn_params(ks[4], D),
        "ln1_g": jnp.ones((D,), jnp.float32), "ln1_b": jnp.zeros((D,), jnp.float32),
        "ln2_g": jnp.ones((D,), jnp.float32), "ln2_b": jnp.zeros((D,), jnp.float32),
        "ln3_g": jnp.ones((D,), jnp.float32), "ln3_b": jnp.zeros((D,), jnp.float32),
        "mlp_w1": 0.02 * jax.random.normal(ks[5], (D, FF), jnp.float32),
        "mlp_b1": jnp.zeros((FF,), jnp.float32),
        "mlp_w2": 0.02 * jax.random.normal(ks[6], (FF, D), jnp.float32),
        "mlp_b2": jnp.zeros((D,), jnp.float32),
    }


# ----------------------------------------------------------------------------
# Main
# ----------------------------------------------------------------------------

if __name__ == "__main__":
    B, S, S_ENC, D, H = 2, 8, 8, 32, 4
    DH, FF = D // H, 4 * D

    root = jax.random.PRNGKey(0)
    k_par, k_enc, k_nod, k_edg, k_rem, k_adj, k_fat = jax.random.split(root, 7)

    params = init_params(k_par, D, FF)

    encoder_out = jax.random.normal(k_enc, (B, S_ENC, D), jnp.float32)
    nodes_h = jax.random.normal(k_nod, (B, S, D), jnp.float32)
    edge_embedding = 0.1 * jax.random.normal(k_edg, (B, S, S, DH), jnp.float32)
    next_father_indices = jax.random.randint(k_fat, (B, S), 0, S).astype(jnp.int32)

    rem_tags = jax.random.randint(k_rem, (B, S_ENC), 0, 3).astype(jnp.int32)
    rem_tags = rem_tags.at[:, 0].set(2)   # ensure at least one REM position

    # Additive masks (0 = attend, -1e16 = masked), PyTorch convention.
    node_lens = jnp.array([S, S - 2])
    node_valid = (jnp.arange(S)[None, :] < node_lens[:, None]).astype(jnp.float32)
    node_mask = (1.0 - node_valid)[:, None, None, :] * -1e16          # [B,1,1,S]

    enc_lens = jnp.array([S_ENC - 1, S_ENC])
    enc_valid = (jnp.arange(S_ENC)[None, :] < enc_lens[:, None]).astype(jnp.float32)
    encoder_mask = (1.0 - enc_valid)[:, None, None, :] * -1e16        # [B,1,1,S_enc]

    adj = (jax.random.uniform(k_adj, (B, S, S)) > 0.5).astype(jnp.float32)
    adj = jnp.maximum(adj, jnp.eye(S, dtype=jnp.float32)[None])       # self-edges
    edge_mask = (1.0 - adj)[:, None, :, :] * -1e16                    # [B,1,S,S]

    fwd = jax.jit(edge_decoder_block, static_argnums=(9,))
    out = fwd(params, encoder_out, rem_tags, nodes_h, next_father_indices,
              edge_embedding, node_mask, edge_mask, encoder_mask, H)
    out = jax.block_until_ready(out)

    assert out.shape == (B, S, D) and out.dtype == jnp.float32
    assert bool(jnp.all(jnp.isfinite(out)))
    print("KERNEL_OK")
</pallas_src>

<mosaic_0001>
module attributes {stable_mosaic.version = 11 : i64} {
  func.func @_father_seqattn_kernel(%arg0: i32, %arg1: memref<1x8x32xf32, #tpu.memory_space<vmem>>, %arg2: memref<1x8x1xi32, #tpu.memory_space<vmem>>, %arg3: memref<32x32xbf16, #tpu.memory_space<vmem>>, %arg4: memref<32x32xbf16, #tpu.memory_space<vmem>>, %arg5: memref<1x32xf32, #tpu.memory_space<vmem>>, %arg6: memref<32x96xbf16, #tpu.memory_space<vmem>>, %arg7: memref<1x96xf32, #tpu.memory_space<vmem>>, %arg8: memref<32x32xbf16, #tpu.memory_space<vmem>>, %arg9: memref<1x32xf32, #tpu.memory_space<vmem>>, %arg10: memref<1x1x8xf32, #tpu.memory_space<vmem>>, %arg11: memref<1x8x32xbf16, #tpu.memory_space<vmem>>, %arg12: memref<1x8x32xbf16, #tpu.memory_space<vmem>>) attributes {dimension_semantics = [#tpu.dimension_semantics<parallel>], iteration_bounds = array<i64: 2>, scalar_prefetch = 0 : i64, scratch_operands = 0 : i64, tpu.core_type = #tpu.core_type<tc>, window_params = [{transform_indices = @transform_0, window_bounds = array<i64: 1, 8, 32>}, {transform_indices = @transform_1, window_bounds = array<i64: 1, 8, 1>}, {pipeline_mode = #tpu.pipeline_mode<synchronous>, transform_indices = @transform_2, window_bounds = array<i64: 32, 32>}, {pipeline_mode = #tpu.pipeline_mode<synchronous>, transform_indices = @transform_3, window_bounds = array<i64: 32, 32>}, {pipeline_mode = #tpu.pipeline_mode<synchronous>, transform_indices = @transform_4, window_bounds = array<i64: 1, 32>}, {pipeline_mode = #tpu.pipeline_mode<synchronous>, transform_indices = @transform_5, window_bounds = array<i64: 32, 96>}, {pipeline_mode = #tpu.pipeline_mode<synchronous>, transform_indices = @transform_6, window_bounds = array<i64: 1, 96>}, {pipeline_mode = #tpu.pipeline_mode<synchronous>, transform_indices = @transform_7, window_bounds = array<i64: 32, 32>}, {pipeline_mode = #tpu.pipeline_mode<synchronous>, transform_indices = @transform_8, window_bounds = array<i64: 1, 32>}, {transform_indices = @transform_9, window_bounds = array<i64: 1, 1, 8>}, {transform_indices = @transform_10, window_bounds = array<i64: 1, 8, 32>}, {transform_indices = @transform_11, window_bounds = array<i64: 1, 8, 32>}]} {
    %c0 = arith.constant 0 : index
    %c0_0 = arith.constant 0 : index
    %c0_1 = arith.constant 0 : index
    %0 = vector.load %arg1[%c0, %c0_0, %c0_1] : memref<1x8x32xf32, #tpu.memory_space<vmem>>, vector<1x8x32xf32>
    %1 = vector.shape_cast %0 : vector<1x8x32xf32> to vector<8x32xf32>
    %c0_2 = arith.constant 0 : index
    %c0_3 = arith.constant 0 : index
    %c0_4 = arith.constant 0 : index
    %2 = vector.load %arg2[%c0_2, %c0_3, %c0_4] : memref<1x8x1xi32, #tpu.memory_space<vmem>>, vector<1x8x1xi32>
    %3 = vector.shape_cast %2 : vector<1x8x1xi32> to vector<8x1xi32>
    %4 = tpu.iota {dimensions = array<i32: 1>} : vector<8x8xi32>
    %5 = vector.broadcast %3 : vector<8x1xi32> to vector<8x8xi32>
    %6 = arith.cmpi eq, %4, %5 : vector<8x8xi32>
    %7 = arith.extui %6 : vector<8x8xi1> to vector<8x8xi32>
    %8 = arith.sitofp %7 : vector<8x8xi32> to vector<8x8xf32>
    %cst = arith.constant dense<0.000000e+00> : vector<8x32xf32>
    %9 = tpu.matmul %8, %1, %cst {dimension_numbers = #tpu.dot_dimension_numbers<[1], [0], [0], [1], [0, 0, 1, 1], [], []>} : vector<8x8xf32>, vector<8x32xf32>, vector<8x32xf32> -> vector<8x32xf32>
    %10 = arith.truncf %1 : vector<8x32xf32> to vector<8x32xbf16>
    %11 = arith.truncf %9 : vector<8x32xf32> to vector<8x32xbf16>
    %c0_5 = arith.constant 0 : index
    %c0_6 = arith.constant 0 : index
    %12 = vector.load %arg3[%c0_5, %c0_6] : memref<32x32xbf16, #tpu.memory_space<vmem>>, vector<32x32xbf16>
    %cst_7 = arith.constant dense<0.000000e+00> : vector<8x32xf32>
    %13 = tpu.matmul %11, %12, %cst_7 {dimension_numbers = #tpu.dot_dimension_numbers<[1], [0], [0], [1], [0, 0, 1, 1], [], []>} : vector<8x32xbf16>, vector<32x32xbf16>, vector<8x32xf32> -> vector<8x32xf32>
    %c0_8 = arith.constant 0 : index
    %c0_9 = arith.constant 0 : index
    %14 = vector.load %arg4[%c0_8, %c0_9] : memref<32x32xbf16, #tpu.memory_space<vmem>>, vector<32x32xbf16>
    %cst_10 = arith.constant dense<0.000000e+00> : vector<8x32xf32>
    %15 = tpu.matmul %10, %14, %cst_10 {dimension_numbers = #tpu.dot_dimension_numbers<[1], [0], [0], [1], [0, 0, 1, 1], [], []>} : vector<8x32xbf16>, vector<32x32xbf16>, vector<8x32xf32> -> vector<8x32xf32>
    %16 = arith.addf %13, %15 : vector<8x32xf32>
    %c0_11 = arith.constant 0 : index
    %c0_12 = arith.constant 0 : index
    %17 = vector.load %arg5[%c0_11, %c0_12] : memref<1x32xf32, #tpu.memory_space<vmem>>, vector<1x32xf32>
    %18 = vector.broadcast %17 : vector<1x32xf32> to vector<8x32xf32>
    %19 = arith.addf %16, %18 : vector<8x32xf32>
    %20 = arith.truncf %19 : vector<8x32xf32> to vector<8x32xbf16>
    %c0_13 = arith.constant 0 : index
    %c0_14 = arith.constant 0 : index
    %c0_15 = arith.constant 0 : index
    %21 = vector.load %arg11[%c0_13, %c0_14, %c0_15] : memref<1x8x32xbf16, #tpu.memory_space<vmem>>, vector<1x8x32xbf16>
    %22 = vector.shape_cast %21 : vector<1x8x32xbf16> to vector<8x32xbf16>
    %23 = vector.shape_cast %20 : vector<8x32xbf16> to vector<1x8x32xbf16>
    tpu.vector_store %arg11[%c0_13, %c0_14, %c0_15], %23 {strides = array<i32>} : memref<1x8x32xbf16, #tpu.memory_space<vmem>>, vector<1x8x32xbf16>,
    %24 = arith.truncf %19 : vector<8x32xf32> to vector<8x32xbf16>
    %c0_16 = arith.constant 0 : index
    %c0_17 = arith.constant 0 : index
    %25 = vector.load %arg6[%c0_16, %c0_17] : memref<32x96xbf16, #tpu.memory_space<vmem>>, vector<32x96xbf16>
    %cst_18 = arith.constant dense<0.000000e+00> : vector<8x96xf32>
    %26 = tpu.matmul %24, %25, %cst_18 {dimension_numbers = #tpu.dot_dimension_numbers<[1], [0], [0], [1], [0, 0, 1, 1], [], []>} : vector<8x32xbf16>, vector<32x96xbf16>, vector<8x96xf32> -> vector<8x96xf32>
    %c0_19 = arith.constant 0 : index
    %c0_20 = arith.constant 0 : index
    %27 = vector.load %arg7[%c0_19, %c0_20] : memref<1x96xf32, #tpu.memory_space<vmem>>, vector<1x96xf32>
    %28 = vector.broadcast %27 : vector<1x96xf32> to vector<8x96xf32>
    %29 = arith.addf %26, %28 : vector<8x96xf32>
    %30 = arith.truncf %29 : vector<8x96xf32> to vector<8x96xbf16>
    %31 = vector.shape_cast %30 : vector<8x96xbf16> to vector<8x12x8xbf16>
    %32 = tpu.transpose %31, [1, 0, 2] : vector<8x12x8xbf16> -> vector<12x8x8xbf16>
    %33 = vector.extract_strided_slice %32 {offsets = [0, 0, 0], sizes = [4, 8, 8], strides = [1, 1, 1]} : vector<12x8x8xbf16> to vector<4x8x8xbf16>
    %34 = vector.extract_strided_slice %32 {offsets = [4, 0, 0], sizes = [4, 8, 8], strides = [1, 1, 1]} : vector<12x8x8xbf16> to vector<4x8x8xbf16>
    %35 = vector.extract_strided_slice %32 {offsets = [8, 0, 0], sizes = [4, 8, 8], strides = [1, 1, 1]} : vector<12x8x8xbf16> to vector<4x8x8xbf16>
    %cst_21 = arith.constant dense<0.000000e+00> : vector<4x8x8xf32>
    %36 = tpu.matmul %33, %34, %cst_21 {dimension_numbers = #tpu.dot_dimension_numbers<[2], [2], [1], [1], [0, 0, 0, 1, 1, 1], [0], [0]>} : vector<4x8x8xbf16>, vector<4x8x8xbf16>, vector<4x8x8xf32> -> vector<4x8x8xf32>
    %cst_22 = arith.constant 0.353553385 : f32
    %37 = vector.broadcast %cst_22 : f32 to vector<4x8x8xf32>
    %38 = arith.mulf %36, %37 : vector<4x8x8xf32>
    %c0_23 = arith.constant 0 : index
    %c0_24 = arith.constant 0 : index
    %c0_25 = arith.constant 0 : index
    %39 = vector.load %arg10[%c0_23, %c0_24, %c0_25] : memref<1x1x8xf32, #tpu.memory_space<vmem>>, vector<1x1x8xf32>
    %40 = vector.shape_cast %39 : vector<1x1x8xf32> to vector<1x8xf32>
    %41 = vector.shape_cast %40 : vector<1x8xf32> to vector<1x1x8xf32>
    %42 = vector.broadcast %41 : vector<1x1x8xf32> to vector<4x8x8xf32>
    %43 = arith.addf %38, %42 : vector<4x8x8xf32>
    %cst_26 = arith.constant dense<0xFF800000> : vector<4x8xf32>
    %44 = vector.multi_reduction <maximumf>, %43, %cst_26 [2] : vector<4x8x8xf32> to vector<4x8xf32>
    %45 = vector.shape_cast %44 : vector<4x8xf32> to vector<4x8x1xf32>
    %46 = vector.broadcast %45 : vector<4x8x1xf32> to vector<4x8x8xf32>
    %47 = arith.subf %43, %46 : vector<4x8x8xf32>
    %48 = math.exp %47 : vector<4x8x8xf32>
    %cst_27 = arith.constant dense<0.000000e+00> : vector<4x8xf32>
    %49 = vector.multi_reduction <add>, %48, %cst_27 [2] : vector<4x8x8xf32> to vector<4x8xf32>
    %50 = vector.shape_cast %49 : vector<4x8xf32> to vector<4x8x1xf32>
    %51 = tpu.reciprocal %50 {approx = true} : vector<4x8x1xf32> -> vector<4x8x1xf32>
    %52 = vector.broadcast %51 : vector<4x8x1xf32> to vector<4x8x8xf32>
    %53 = arith.mulf %48, %52 : vector<4x8x8xf32>
    %54 = arith.truncf %53 : vector<4x8x8xf32> to vector<4x8x8xbf16>
    %cst_28 = arith.constant dense<0.000000e+00> : vector<4x8x8xf32>
    %55 = tpu.matmul %54, %35, %cst_28 {dimension_numbers = #tpu.dot_dimension_numbers<[2], [1], [1], [2], [0, 0, 0, 1, 1, 2], [0], [0]>} : vector<4x8x8xbf16>, vector<4x8x8xbf16>, vector<4x8x8xf32> -> vector<4x8x8xf32>
    %56 = arith.truncf %55 : vector<4x8x8xf32> to vector<4x8x8xbf16>
    %57 = tpu.transpose %56, [1, 0, 2] : vector<4x8x8xbf16> -> vector<8x4x8xbf16>
    %58 = vector.shape_cast %57 : vector<8x4x8xbf16> to vector<8x32xbf16>
    %c0_29 = arith.constant 0 : index
    %c0_30 = arith.constant 0 : index
    %59 = vector.load %arg8[%c0_29, %c0_30] : memref<32x32xbf16, #tpu.memory_space<vmem>>, vector<32x32xbf16>
    %cst_31 = arith.constant dense<0.000000e+00> : vector<8x32xf32>
    %60 = tpu.matmul %58, %59, %cst_31 {dimension_numbers = #tpu.dot_dimension_numbers<[1], [0], [0], [1], [0, 0, 1, 1], [], []>} : vector<8x32xbf16>, vector<32x32xbf16>, vector<8x32xf32> -> vector<8x32xf32>
    %c0_32 = arith.constant 0 : index
    %c0_33 = arith.constant 0 : index
    %61 = vector.load %arg9[%c0_32, %c0_33] : memref<1x32xf32, #tpu.memory_space<vmem>>, vector<1x32xf32>
    %62 = vector.broadcast %61 : vector<1x32xf32> to vector<8x32xf32>
    %63 = arith.addf %60, %62 : vector<8x32xf32>
    %64 = arith.truncf %63 : vector<8x32xf32> to vector<8x32xbf16>
    %c0_34 = arith.constant 0 : index
    %c0_35 = arith.constant 0 : index
    %c0_36 = arith.constant 0 : index
    %65 = vector.load %arg12[%c0_34, %c0_35, %c0_36] : memref<1x8x32xbf16, #tpu.memory_space<vmem>>, vector<1x8x32xbf16>
    %66 = vector.shape_cast %65 : vector<1x8x32xbf16> to vector<8x32xbf16>
    %67 = vector.shape_cast %64 : vector<8x32xbf16> to vector<1x8x32xbf16>
    tpu.vector_store %arg12[%c0_34, %c0_35, %c0_36], %67 {strides = array<i32>} : memref<1x8x32xbf16, #tpu.memory_space<vmem>>, vector<1x8x32xbf16>,
    return
  }
  func.func @transform_0(%arg0: i32) -> (i32, i32, i32) {
    %c0_i32 = arith.constant 0 : i32
    %c0_i32_0 = arith.constant 0 : i32
    %c0_i32_1 = arith.constant 0 : i32
    return %arg0, %c0_i32, %c0_i32_0 : i32, i32, i32
  }
  func.func @transform_1(%arg0: i32) -> (i32, i32, i32) {
    %c0_i32 = arith.constant 0 : i32
    %c0_i32_0 = arith.constant 0 : i32
    %c0_i32_1 = arith.constant 0 : i32
    return %arg0, %c0_i32, %c0_i32_0 : i32, i32, i32
  }
  func.func @transform_2(%arg0: i32) -> (i32, i32) {
    %c0_i32 = arith.constant 0 : i32
    %c0_i32_0 = arith.constant 0 : i32
    %c0_i32_1 = arith.constant 0 : i32
    return %c0_i32, %c0_i32_0 : i32, i32
  }
  func.func @transform_3(%arg0: i32) -> (i32, i32) {
    %c0_i32 = arith.constant 0 : i32
    %c0_i32_0 = arith.constant 0 : i32
    %c0_i32_1 = arith.constant 0 : i32
    return %c0_i32, %c0_i32_0 : i32, i32
  }
  func.func @transform_4(%arg0: i32) -> (i32, i32) {
    %c0_i32 = arith.constant 0 : i32
    %c0_i32_0 = arith.constant 0 : i32
    %c0_i32_1 = arith.constant 0 : i32
    return %c0_i32, %c0_i32_0 : i32, i32
  }
  func.func @transform_5(%arg0: i32) -> (i32, i32) {
    %c0_i32 = arith.constant 0 : i32
    %c0_i32_0 = arith.constant 0 : i32
    %c0_i32_1 = arith.constant 0 : i32
    return %c0_i32, %c0_i32_0 : i32, i32
  }
  func.func @transform_6(%arg0: i32) -> (i32, i32) {
    %c0_i32 = arith.constant 0 : i32
    %c0_i32_0 = arith.constant 0 : i32
    %c0_i32_1 = arith.constant 0 : i32
    return %c0_i32, %c0_i32_0 : i32, i32
  }
  func.func @transform_7(%arg0: i32) -> (i32, i32) {
    %c0_i32 = arith.constant 0 : i32
    %c0_i32_0 = arith.constant 0 : i32
    %c0_i32_1 = arith.constant 0 : i32
    return %c0_i32, %c0_i32_0 : i32, i32
  }
  func.func @transform_8(%arg0: i32) -> (i32, i32) {
    %c0_i32 = arith.constant 0 : i32
    %c0_i32_0 = arith.constant 0 : i32
    %c0_i32_1 = arith.constant 0 : i32
    return %c0_i32, %c0_i32_0 : i32, i32
  }
  func.func @transform_9(%arg0: i32) -> (i32, i32, i32) {
    %c0_i32 = arith.constant 0 : i32
    %c0_i32_0 = arith.constant 0 : i32
    %c0_i32_1 = arith.constant 0 : i32
    return %arg0, %c0_i32, %c0_i32_0 : i32, i32, i32
  }
  func.func @transform_10(%arg0: i32) -> (i32, i32, i32) {
    %c0_i32 = arith.constant 0 : i32
    %c0_i32_0 = arith.constant 0 : i32
    %c0_i32_1 = arith.constant 0 : i32
    return %arg0, %c0_i32, %c0_i32_0 : i32, i32, i32
  }
  func.func @transform_11(%arg0: i32) -> (i32, i32, i32) {
    %c0_i32 = arith.constant 0 : i32
    %c0_i32_0 = arith.constant 0 : i32
    %c0_i32_1 = arith.constant 0 : i32
    return %arg0, %c0_i32, %c0_i32_0 : i32, i32, i32
  }
}

module attributes {stable_mosaic.version = 11 : i64} {
  func.func @_ast_ln1_kernel(%arg0: i32, %arg1: i32, %arg2: memref<1x8x32xbf16, #tpu.memory_space<vmem>>, %arg3: memref<1x8x32xbf16, #tpu.memory_space<vmem>>, %arg4: memref<1x8x8x8xbf16, #tpu.memory_space<vmem>>, %arg5: memref<1x8x8xbf16, #tpu.memory_space<vmem>>, %arg6: memref<32x32xbf16, #tpu.memory_space<vmem>>, %arg7: memref<1x32xf32, #tpu.memory_space<vmem>>, %arg8: memref<32x64xbf16, #tpu.memory_space<vmem>>, %arg9: memref<1x64xf32, #tpu.memory_space<vmem>>, %arg10: memref<32x32xbf16, #tpu.memory_space<vmem>>, %arg11: memref<1x32xf32, #tpu.memory_space<vmem>>, %arg12: memref<1x32xf32, #tpu.memory_space<vmem>>, %arg13: memref<1x32xf32, #tpu.memory_space<vmem>>, %arg14: memref<1x8x32xbf16, #tpu.memory_space<vmem>>, %arg15: memref<4x8x8xbf16, #tpu.memory_space<vmem>>, %arg16: memref<8x4x8xbf16, #tpu.memory_space<vmem>>, %arg17: memref<4x8x1xf32, #tpu.memory_space<vmem>>, %arg18: memref<4x8x1xf32, #tpu.memory_space<vmem>>, %arg19: memref<4x8x8xf32, #tpu.memory_space<vmem>>) attributes {dimension_semantics = [#tpu.dimension_semantics<parallel>, #tpu.dimension_semantics<arbitrary>], iteration_bounds = array<i64: 2, 1>, scalar_prefetch = 0 : i64, scratch_operands = 5 : i64, tpu.core_type = #tpu.core_type<tc>, window_params = [{transform_indices = @transform_0, window_bounds = array<i64: 1, 8, 32>}, {transform_indices = @transform_1, window_bounds = array<i64: 1, 8, 32>}, {transform_indices = @transform_2, window_bounds = array<i64: 1, 8, 8, 8>}, {transform_indices = @transform_3, window_bounds = array<i64: 1, 8, 8>}, {pipeline_mode = #tpu.pipeline_mode<synchronous>, transform_indices = @transform_4, window_bounds = array<i64: 32, 32>}, {pipeline_mode = #tpu.pipeline_mode<synchronous>, transform_indices = @transform_5, window_bounds = array<i64: 1, 32>}, {pipeline_mode = #tpu.pipeline_mode<synchronous>, transform_indices = @transform_6, window_bounds = array<i64: 32, 64>}, {pipeline_mode = #tpu.pipeline_mode<synchronous>, transform_indices = @transform_7, window_bounds = array<i64: 1, 64>}, {pipeline_mode = #tpu.pipeline_mode<synchronous>, transform_indices = @transform_8, window_bounds = array<i64: 32, 32>}, {pipeline_mode = #tpu.pipeline_mode<synchronous>, transform_indices = @transform_9, window_bounds = array<i64: 1, 32>}, {pipeline_mode = #tpu.pipeline_mode<synchronous>, transform_indices = @transform_10, window_bounds = array<i64: 1, 32>}, {pipeline_mode = #tpu.pipeline_mode<synchronous>, transform_indices = @transform_11, window_bounds = array<i64: 1, 32>}, {transform_indices = @transform_12, window_bounds = array<i64: 1, 8, 32>}]} {
    %c0_i32 = arith.constant 0 : i32
    %0 = arith.cmpi eq, %arg1, %c0_i32 : i32
    %1 = arith.extui %0 : i1 to i32
    %c0_i32_0 = arith.constant 0 : i32
    %2 = arith.cmpi ne, %1, %c0_i32_0 : i32
    scf.if %2 {
      %c0_46 = arith.constant 0 : index
      %c0_47 = arith.constant 0 : index
      %c0_48 = arith.constant 0 : index
      %64 = vector.load %arg3[%c0_46, %c0_47, %c0_48] : memref<1x8x32xbf16, #tpu.memory_space<vmem>>, vector<1x8x32xbf16>
      %65 = vector.shape_cast %64 : vector<1x8x32xbf16> to vector<8x32xbf16>
      %c0_49 = arith.constant 0 : index
      %c0_50 = arith.constant 0 : index
      %66 = vector.load %arg6[%c0_49, %c0_50] : memref<32x32xbf16, #tpu.memory_space<vmem>>, vector<32x32xbf16>
      %cst_51 = arith.constant dense<0.000000e+00> : vector<8x32xf32>
      %67 = tpu.matmul %65, %66, %cst_51 {dimension_numbers = #tpu.dot_dimension_numbers<[1], [0], [0], [1], [0, 0, 1, 1], [], []>} : vector<8x32xbf16>, vector<32x32xbf16>, vector<8x32xf32> -> vector<8x32xf32>
      %c0_52 = arith.constant 0 : index
      %c0_53 = arith.constant 0 : index
      %68 = vector.load %arg7[%c0_52, %c0_53] : memref<1x32xf32, #tpu.memory_space<vmem>>, vector<1x32xf32>
      %69 = vector.broadcast %68 : vector<1x32xf32> to vector<8x32xf32>
      %70 = arith.addf %67, %69 : vector<8x32xf32>
      %71 = arith.truncf %70 : vector<8x32xf32> to vector<8x32xbf16>
      %72 = vector.shape_cast %71 : vector<8x32xbf16> to vector<8x4x8xbf16>
      %73 = tpu.transpose %72, [1, 0, 2] : vector<8x4x8xbf16> -> vector<4x8x8xbf16>
      %c0_54 = arith.constant 0 : index
      %c0_55 = arith.constant 0 : index
      %c0_56 = arith.constant 0 : index
      %74 = vector.load %arg15[%c0_54, %c0_55, %c0_56] : memref<4x8x8xbf16, #tpu.memory_space<vmem>>, vector<4x8x8xbf16>
      tpu.vector_store %arg15[%c0_54, %c0_55, %c0_56], %73 {strides = array<i32>} : memref<4x8x8xbf16, #tpu.memory_space<vmem>>, vector<4x8x8xbf16>,
      %75 = vector.shape_cast %71 : vector<8x32xbf16> to vector<8x4x8xbf16>
      %c0_57 = arith.constant 0 : index
      %c0_58 = arith.constant 0 : index
      %c0_59 = arith.constant 0 : index
      %76 = vector.load %arg16[%c0_57, %c0_58, %c0_59] : memref<8x4x8xbf16, #tpu.memory_space<vmem>>, vector<8x4x8xbf16>
      tpu.vector_store %arg16[%c0_57, %c0_58, %c0_59], %75 {strides = array<i32>} : memref<8x4x8xbf16, #tpu.memory_space<vmem>>, vector<8x4x8xbf16>,
      %cst_60 = arith.constant 0xFF800000 : f32
      %77 = vector.broadcast %cst_60 : f32 to vector<4x8x1xf32>
      %c0_61 = arith.constant 0 : index
      %c0_62 = arith.constant 0 : index
      %c0_63 = arith.constant 0 : index
      %78 = vector.load %arg17[%c0_61, %c0_62, %c0_63] : memref<4x8x1xf32, #tpu.memory_space<vmem>>, vector<4x8x1xf32>
      tpu.vector_store %arg17[%c0_61, %c0_62, %c0_63], %77 {strides = array<i32>} : memref<4x8x1xf32, #tpu.memory_space<vmem>>, vector<4x8x1xf32>,
      %cst_64 = arith.constant 0.000000e+00 : f32
      %79 = vector.broadcast %cst_64 : f32 to vector<4x8x1xf32>
      %c0_65 = arith.constant 0 : index
      %c0_66 = arith.constant 0 : index
      %c0_67 = arith.constant 0 : index
      %80 = vector.load %arg18[%c0_65, %c0_66, %c0_67] : memref<4x8x1xf32, #tpu.memory_space<vmem>>, vector<4x8x1xf32>
      tpu.vector_store %arg18[%c0_65, %c0_66, %c0_67], %79 {strides = array<i32>} : memref<4x8x1xf32, #tpu.memory_space<vmem>>, vector<4x8x1xf32>,
      %cst_68 = arith.constant 0.000000e+00 : f32
      %81 = vector.broadcast %cst_68 : f32 to vector<4x8x8xf32>
      %c0_69 = arith.constant 0 : index
      %c0_70 = arith.constant 0 : index
      %c0_71 = arith.constant 0 : index
      %82 = vector.load %arg19[%c0_69, %c0_70, %c0_71] : memref<4x8x8xf32, #tpu.memory_space<vmem>>, vector<4x8x8xf32>
      tpu.vector_store %arg19[%c0_69, %c0_70, %c0_71], %81 {strides = array<i32>} : memref<4x8x8xf32, #tpu.memory_space<vmem>>, vector<4x8x8xf32>,
    } else {
    }
    %c8_i32 = arith.constant 8 : i32
    %3 = arith.muli %arg1, %c8_i32 : i32
    %4 = tpu.assume_multiple %3, 8 : i32
    %c0 = arith.constant 0 : index
    %5 = arith.index_cast %4 : i32 to index
    %c0_1 = arith.constant 0 : index
    %6 = vector.load %arg3[%c0, %5, %c0_1] : memref<1x8x32xbf16, #tpu.memory_space<vmem>>, vector<1x8x32xbf16>
    %7 = vector.shape_cast %6 : vector<1x8x32xbf16> to vector<8x32xbf16>
    %c0_2 = arith.constant 0 : index
    %c0_3 = arith.constant 0 : index
    %8 = vector.load %arg8[%c0_2, %c0_3] : memref<32x64xbf16, #tpu.memory_space<vmem>>, vector<32x64xbf16>
    %cst = arith.constant dense<0.000000e+00> : vector<8x64xf32>
    %9 = tpu.matmul %7, %8, %cst {dimension_numbers = #tpu.dot_dimension_numbers<[1], [0], [0], [1], [0, 0, 1, 1], [], []>} : vector<8x32xbf16>, vector<32x64xbf16>, vector<8x64xf32> -> vector<8x64xf32>
    %c0_4 = arith.constant 0 : index
    %c0_5 = arith.constant 0 : index
    %10 = vector.load %arg9[%c0_4, %c0_5] : memref<1x64xf32, #tpu.memory_space<vmem>>, vector<1x64xf32>
    %11 = vector.broadcast %10 : vector<1x64xf32> to vector<8x64xf32>
    %12 = arith.addf %9, %11 : vector<8x64xf32>
    %13 = arith.truncf %12 : vector<8x64xf32> to vector<8x64xbf16>
    %14 = vector.shape_cast %13 : vector<8x64xbf16> to vector<8x8x8xbf16>
    %15 = tpu.transpose %14, [1, 0, 2] : vector<8x8x8xbf16> -> vector<8x8x8xbf16>
    %16 = vector.extract_strided_slice %15 {offsets = [0, 0, 0], sizes = [4, 8, 8], strides = [1, 1, 1]} : vector<8x8x8xbf16> to vector<4x8x8xbf16>
    %17 = vector.extract_strided_slice %15 {offsets = [4, 0, 0], sizes = [4, 8, 8], strides = [1, 1, 1]} : vector<8x8x8xbf16> to vector<4x8x8xbf16>
    %c0_6 = arith.constant 0 : index
    %c0_7 = arith.constant 0 : index
    %c0_8 = arith.constant 0 : index
    %18 = vector.load %arg15[%c0_6, %c0_7, %c0_8] : memref<4x8x8xbf16, #tpu.memory_space<vmem>>, vector<4x8x8xbf16>
    %c0_9 = arith.constant 0 : index
    %c0_10 = arith.constant 0 : index
    %c0_11 = arith.constant 0 : index
    %19 = vector.load %arg16[%c0_9, %c0_10, %c0_11] : memref<8x4x8xbf16, #tpu.memory_space<vmem>>, vector<8x4x8xbf16>
    %c0_12 = arith.constant 0 : index
    %c0_13 = arith.constant 0 : index
    %c0_14 = arith.constant 0 : index
    %c0_15 = arith.constant 0 : index
    %20 = vector.load %arg4[%c0_12, %c0_13, %c0_14, %c0_15] : memref<1x8x8x8xbf16, #tpu.memory_space<vmem>>, vector<1x8x8x8xbf16>
    %21 = vector.shape_cast %20 : vector<1x8x8x8xbf16> to vector<8x8x8xbf16>
    %cst_16 = arith.constant dense<0.000000e+00> : vector<4x8x8xf32>
    %22 = tpu.matmul %18, %16, %cst_16 {dimension_numbers = #tpu.dot_dimension_numbers<[2], [2], [1], [1], [0, 0, 0, 1, 1, 1], [0], [0]>} : vector<4x8x8xbf16>, vector<4x8x8xbf16>, vector<4x8x8xf32> -> vector<4x8x8xf32>
    %cst_17 = arith.constant dense<0.000000e+00> : vector<8x4x8xf32>
    %23 = tpu.matmul %19, %21, %cst_17 {dimension_numbers = #tpu.dot_dimension_numbers<[2], [2], [1], [1], [0, 0, 0, 1, 1, 1], [0], [0]>} : vector<8x4x8xbf16>, vector<8x8x8xbf16>, vector<8x4x8xf32> -> vector<8x4x8xf32>
    %24 = tpu.transpose %23, [1, 0, 2] : vector<8x4x8xf32> -> vector<4x8x8xf32>
    %25 = arith.addf %22, %24 : vector<4x8x8xf32>
    %cst_18 = arith.constant 0.353553385 : f32
    %26 = vector.broadcast %cst_18 : f32 to vector<4x8x8xf32>
    %27 = arith.mulf %25, %26 : vector<4x8x8xf32>
    %c0_19 = arith.constant 0 : index
    %c0_20 = arith.constant 0 : index
    %c0_21 = arith.constant 0 : index
    %28 = vector.load %arg5[%c0_19, %c0_20, %c0_21] : memref<1x8x8xbf16, #tpu.memory_space<vmem>>, vector<1x8x8xbf16>
    %29 = vector.shape_cast %28 : vector<1x8x8xbf16> to vector<8x8xbf16>
    %30 = arith.extf %29 : vector<8x8xbf16> to vector<8x8xf32>
    %31 = vector.shape_cast %30 : vector<8x8xf32> to vector<1x8x8xf32>
    %32 = vector.broadcast %31 : vector<1x8x8xf32> to vector<4x8x8xf32>
    %33 = arith.addf %27, %32 : vector<4x8x8xf32>
    %c0_22 = arith.constant 0 : index
    %c0_23 = arith.constant 0 : index
    %c0_24 = arith.constant 0 : index
    %34 = vector.load %arg17[%c0_22, %c0_23, %c0_24] : memref<4x8x1xf32, #tpu.memory_space<vmem>>, vector<4x8x1xf32>
    %cst_25 = arith.constant dense<0xFF800000> : vector<4x8xf32>
    %35 = vector.multi_reduction <maximumf>, %33, %cst_25 [2] : vector<4x8x8xf32> to vector<4x8xf32>
    %36 = vector.shape_cast %35 : vector<4x8xf32> to vector<4x8x1xf32>
    %37 = arith.maximumf %34, %36 : vector<4x8x1xf32>
    %38 = arith.subf %34, %37 : vector<4x8x1xf32>
    %39 = math.exp %38 : vector<4x8x1xf32>
    %40 = vector.broadcast %37 : vector<4x8x1xf32> to vector<4x8x8xf32>
    %41 = arith.subf %33, %40 : vector<4x8x8xf32>
    %42 = math.exp %41 : vector<4x8x8xf32>
    %c0_26 = arith.constant 0 : index
    %c0_27 = arith.constant 0 : index
    %c0_28 = arith.constant 0 : index
    %43 = vector.load %arg18[%c0_26, %c0_27, %c0_28] : memref<4x8x1xf32, #tpu.memory_space<vmem>>, vector<4x8x1xf32>
    %44 = arith.mulf %39, %43 : vector<4x8x1xf32>
    %cst_29 = arith.constant dense<0.000000e+00> : vector<4x8xf32>
    %45 = vector.multi_reduction <add>, %42, %cst_29 [2] : vector<4x8x8xf32> to vector<4x8xf32>
    %46 = vector.shape_cast %45 : vector<4x8xf32> to vector<4x8x1xf32>
    %47 = arith.addf %44, %46 : vector<4x8x1xf32>
    %c0_30 = arith.constant 0 : index
    %c0_31 = arith.constant 0 : index
    %c0_32 = arith.constant 0 : index
    %48 = vector.load %arg18[%c0_30, %c0_31, %c0_32] : memref<4x8x1xf32, #tpu.memory_space<vmem>>, vector<4x8x1xf32>
    tpu.vector_store %arg18[%c0_30, %c0_31, %c0_32], %47 {strides = array<i32>} : memref<4x8x1xf32, #tpu.memory_space<vmem>>, vector<4x8x1xf32>,
    %49 = arith.truncf %42 : vector<4x8x8xf32> to vector<4x8x8xbf16>
    %cst_33 = arith.constant dense<0.000000e+00> : vector<4x8x8xf32>
    %50 = tpu.matmul %49, %17, %cst_33 {dimension_numbers = #tpu.dot_dimension_numbers<[2], [1], [1], [2], [0, 0, 0, 1, 1, 2], [0], [0]>} : vector<4x8x8xbf16>, vector<4x8x8xbf16>, vector<4x8x8xf32> -> vector<4x8x8xf32>
    %51 = tpu.transpose %49, [1, 0, 2] : vector<4x8x8xbf16> -> vector<8x4x8xbf16>
    %cst_34 = arith.constant dense<0.000000e+00> : vector<8x4x8xf32>
    %52 = tpu.matmul %51, %21, %cst_34 {dimension_numbers = #tpu.dot_dimension_numbers<[2], [1], [1], [2], [0, 0, 0, 1, 1, 2], [0], [0]>} : vector<8x4x8xbf16>, vector<8x8x8xbf16>, vector<8x4x8xf32> -> vector<8x4x8xf32>
    %c0_35 = arith.constant 0 : index
    %c0_36 = arith.constant 0 : index
    %c0_37 = arith.constant 0 : index
    %53 = vector.load %arg19[%c0_35, %c0_36, %c0_37] : memref<4x8x8xf32, #tpu.memory_space<vmem>>, vector<4x8x8xf32>
    %54 = vector.broadcast %39 : vector<4x8x1xf32> to vector<4x8x8xf32>
    %55 = arith.mulf %54, %53 : vector<4x8x8xf32>
    %56 = arith.addf %55, %50 : vector<4x8x8xf32>
    %57 = tpu.transpose %52, [1, 0, 2] : vector<8x4x8xf32> -> vector<4x8x8xf32>
    %58 = arith.addf %56, %57 : vector<4x8x8xf32>
    %c0_38 = arith.constant 0 : index
    %c0_39 = arith.constant 0 : index
    %c0_40 = arith.constant 0 : index
    %59 = vector.load %arg19[%c0_38, %c0_39, %c0_40] : memref<4x8x8xf32, #tpu.memory_space<vmem>>, vector<4x8x8xf32>
    tpu.vector_store %arg19[%c0_38, %c0_39, %c0_40], %58 {strides = array<i32>} : memref<4x8x8xf32, #tpu.memory_space<vmem>>, vector<4x8x8xf32>,
    %c0_41 = arith.constant 0 : index
    %c0_42 = arith.constant 0 : index
    %c0_43 = arith.constant 0 : index
    %60 = vector.load %arg17[%c0_41, %c0_42, %c0_43] : memref<4x8x1xf32, #tpu.memory_space<vmem>>, vector<4x8x1xf32>
    tpu.vector_store %arg17[%c0_41, %c0_42, %c0_43], %37 {strides = array<i32>} : memref<4x8x1xf32, #tpu.memory_space<vmem>>, vector<4x8x1xf32>,
    %c0_i32_44 = arith.constant 0 : i32
    %61 = arith.cmpi eq, %arg1, %c0_i32_44 : i32
    %62 = arith.extui %61 : i1 to i32
    %c0_i32_45 = arith.constant 0 : i32
    %63 = arith.cmpi ne, %62, %c0_i32_45 : i32
    scf.if %63 {
      %c0_46 = arith.constant 0 : index
      %c0_47 = arith.constant 0 : index
      %c0_48 = arith.constant 0 : index
      %64 = vector.load %arg19[%c0_46, %c0_47, %c0_48] : memref<4x8x8xf32, #tpu.memory_space<vmem>>, vector<4x8x8xf32>
      %c0_49 = arith.constant 0 : index
      %c0_50 = arith.constant 0 : index
      %c0_51 = arith.constant 0 : index
      %65 = vector.load %arg18[%c0_49, %c0_50, %c0_51] : memref<4x8x1xf32, #tpu.memory_space<vmem>>, vector<4x8x1xf32>
      %66 = tpu.reciprocal %65 {approx = true} : vector<4x8x1xf32> -> vector<4x8x1xf32>
      %67 = vector.broadcast %66 : vector<4x8x1xf32> to vector<4x8x8xf32>
      %68 = arith.mulf %64, %67 : vector<4x8x8xf32>
      %69 = arith.truncf %68 : vector<4x8x8xf32> to vector<4x8x8xbf16>
      %70 = tpu.transpose %69, [1, 0, 2] : vector<4x8x8xbf16> -> vector<8x4x8xbf16>
      %71 = vector.shape_cast %70 : vector<8x4x8xbf16> to vector<8x32xbf16>
      %c0_52 = arith.constant 0 : index
      %c0_53 = arith.constant 0 : index
      %72 = vector.load %arg10[%c0_52, %c0_53] : memref<32x32xbf16, #tpu.memory_space<vmem>>, vector<32x32xbf16>
      %cst_54 = arith.constant dense<0.000000e+00> : vector<8x32xf32>
      %73 = tpu.matmul %71, %72, %cst_54 {dimension_numbers = #tpu.dot_dimension_numbers<[1], [0], [0], [1], [0, 0, 1, 1], [], []>} : vector<8x32xbf16>, vector<32x32xbf16>, vector<8x32xf32> -> vector<8x32xf32>
      %c0_55 = arith.constant 0 : index
      %c0_56 = arith.constant 0 : index
      %74 = vector.load %arg11[%c0_55, %c0_56] : memref<1x32xf32, #tpu.memory_space<vmem>>, vector<1x32xf32>
      %75 = vector.broadcast %74 : vector<1x32xf32> to vector<8x32xf32>
      %76 = arith.addf %73, %75 : vector<8x32xf32>
      %c0_57 = arith.constant 0 : index
      %c0_58 = arith.constant 0 : index
      %c0_59 = arith.constant 0 : index
      %77 = vector.load %arg2[%c0_57, %c0_58, %c0_59] : memref<1x8x32xbf16, #tpu.memory_space<vmem>>, vector<1x8x32xbf16>
      %78 = vector.shape_cast %77 : vector<1x8x32xbf16> to vector<8x32xbf16>
      %79 = arith.extf %78 : vector<8x32xbf16> to vector<8x32xf32>
      %c0_60 = arith.constant 0 : index
      %c0_61 = arith.constant 0 : index
      %c0_62 = arith.constant 0 : index
      %80 = vector.load %arg3[%c0_60, %c0_61, %c0_62] : memref<1x8x32xbf16, #tpu.memory_space<vmem>>, vector<1x8x32xbf16>
      %81 = vector.shape_cast %80 : vector<1x8x32xbf16> to vector<8x32xbf16>
      %82 = arith.extf %81 : vector<8x32xbf16> to vector<8x32xf32>
      %83 = arith.addf %79, %82 : vector<8x32xf32>
      %84 = arith.addf %83, %76 : vector<8x32xf32>
      %cst_63 = arith.constant dense<0.000000e+00> : vector<8xf32>
      %85 = vector.multi_reduction <add>, %84, %cst_63 [1] : vector<8x32xf32> to vector<8xf32>
      %86 = vector.shape_cast %85 : vector<8xf32> to vector<8x1xf32>
      %cst_64 = arith.constant 3.200000e+01 : f32
      %87 = vector.broadcast %cst_64 : f32 to vector<8x1xf32>
      %88 = arith.divf %86, %87 : vector<8x1xf32>
      %89 = vector.broadcast %88 : vector<8x1xf32> to vector<8x32xf32>
      %90 = arith.subf %84, %89 : vector<8x32xf32>
      %91 = arith.mulf %90, %90 : vector<8x32xf32>
      %cst_65 = arith.constant dense<0.000000e+00> : vector<8xf32>
      %92 = vector.multi_reduction <add>, %91, %cst_65 [1] : vector<8x32xf32> to vector<8xf32>
      %93 = vector.shape_cast %92 : vector<8xf32> to vector<8x1xf32>
      %cst_66 = arith.constant 3.200000e+01 : f32
      %94 = vector.broadcast %cst_66 : f32 to vector<8x1xf32>
      %95 = arith.divf %93, %94 : vector<8x1xf32>
      %96 = vector.broadcast %88 : vector<8x1xf32> to vector<8x32xf32>
      %97 = arith.subf %84, %96 : vector<8x32xf32>
      %cst_67 = arith.constant 9.99999974E-6 : f32
      %98 = vector.broadcast %cst_67 : f32 to vector<8x1xf32>
      %99 = arith.addf %95, %98 : vector<8x1xf32>
      %100 = math.rsqrt %99 : vector<8x1xf32>
      %101 = vector.broadcast %100 : vector<8x1xf32> to vector<8x32xf32>
      %102 = arith.mulf %97, %101 : vector<8x32xf32>
      %c0_68 = arith.constant 0 : index
      %c0_69 = arith.constant 0 : index
      %103 = vector.load %arg12[%c0_68, %c0_69] : memref<1x32xf32, #tpu.memory_space<vmem>>, vector<1x32xf32>
      %104 = vector.broadcast %103 : vector<1x32xf32> to vector<8x32xf32>
      %105 = arith.mulf %102, %104 : vector<8x32xf32>
      %c0_70 = arith.constant 0 : index
      %c0_71 = arith.constant 0 : index
      %106 = vector.load %arg13[%c0_70, %c0_71] : memref<1x32xf32, #tpu.memory_space<vmem>>, vector<1x32xf32>
      %107 = vector.broadcast %106 : vector<1x32xf32> to vector<8x32xf32>
      %108 = arith.addf %105, %107 : vector<8x32xf32>
      %109 = arith.truncf %108 : vector<8x32xf32> to vector<8x32xbf16>
      %c0_72 = arith.constant 0 : index
      %c0_73 = arith.constant 0 : index
      %c0_74 = arith.constant 0 : index
      %110 = vector.load %arg14[%c0_72, %c0_73, %c0_74] : memref<1x8x32xbf16, #tpu.memory_space<vmem>>, vector<1x8x32xbf16>
      %111 = vector.shape_cast %110 : vector<1x8x32xbf16> to vector<8x32xbf16>
      %112 = vector.shape_cast %109 : vector<8x32xbf16> to vector<1x8x32xbf16>
      tpu.vector_store %arg14[%c0_72, %c0_73, %c0_74], %112 {strides = array<i32>} : memref<1x8x32xbf16, #tpu.memory_space<vmem>>, vector<1x8x32xbf16>,
    } else {
    }
    return
  }
  func.func @transform_0(%arg0: i32, %arg1: i32) -> (i32, i32, i32) {
    %c0_i32 = arith.constant 0 : i32
    %c0_i32_0 = arith.constant 0 : i32
    %c0_i32_1 = arith.constant 0 : i32
    return %arg0, %c0_i32, %c0_i32_0 : i32, i32, i32
  }
  func.func @transform_1(%arg0: i32, %arg1: i32) -> (i32, i32, i32) {
    %c0_i32 = arith.constant 0 : i32
    %c0_i32_0 = arith.constant 0 : i32
    %c0_i32_1 = arith.constant 0 : i32
    return %arg0, %c0_i32, %c0_i32_0 : i32, i32, i32
  }
  func.func @transform_2(%arg0: i32, %arg1: i32) -> (i32, i32, i32, i32) {
    %c0_i32 = arith.constant 0 : i32
    %c0_i32_0 = arith.constant 0 : i32
    %c0_i32_1 = arith.constant 0 : i32
    return %arg0, %c0_i32, %arg1, %c0_i32_0 : i32, i32, i32, i32
  }
  func.func @transform_3(%arg0: i32, %arg1: i32) -> (i32, i32, i32) {
    %c0_i32 = arith.constant 0 : i32
    %c0_i32_0 = arith.constant 0 : i32
    return %arg0, %c0_i32, %arg1 : i32, i32, i32
  }
  func.func @transform_4(%arg0: i32, %arg1: i32) -> (i32, i32) {
    %c0_i32 = arith.constant 0 : i32
    %c0_i32_0 = arith.constant 0 : i32
    %c0_i32_1 = arith.constant 0 : i32
    return %c0_i32, %c0_i32_0 : i32, i32
  }
  func.func @transform_5(%arg0: i32, %arg1: i32) -> (i32, i32) {
    %c0_i32 = arith.constant 0 : i32
    %c0_i32_0 = arith.constant 0 : i32
    %c0_i32_1 = arith.constant 0 : i32
    return %c0_i32, %c0_i32_0 : i32, i32
  }
  func.func @transform_6(%arg0: i32, %arg1: i32) -> (i32, i32) {
    %c0_i32 = arith.constant 0 : i32
    %c0_i32_0 = arith.constant 0 : i32
    %c0_i32_1 = arith.constant 0 : i32
    return %c0_i32, %c0_i32_0 : i32, i32
  }
  func.func @transform_7(%arg0: i32, %arg1: i32) -> (i32, i32) {
    %c0_i32 = arith.constant 0 : i32
    %c0_i32_0 = arith.constant 0 : i32
    %c0_i32_1 = arith.constant 0 : i32
    return %c0_i32, %c0_i32_0 : i32, i32
  }
  func.func @transform_8(%arg0: i32, %arg1: i32) -> (i32, i32) {
    %c0_i32 = arith.constant 0 : i32
    %c0_i32_0 = arith.constant 0 : i32
    %c0_i32_1 = arith.constant 0 : i32
    return %c0_i32, %c0_i32_0 : i32, i32
  }
  func.func @transform_9(%arg0: i32, %arg1: i32) -> (i32, i32) {
    %c0_i32 = arith.constant 0 : i32
    %c0_i32_0 = arith.constant 0 : i32
    %c0_i32_1 = arith.constant 0 : i32
    return %c0_i32, %c0_i32_0 : i32, i32
  }
  func.func @transform_10(%arg0: i32, %arg1: i32) -> (i32, i32) {
    %c0_i32 = arith.constant 0 : i32
    %c0_i32_0 = arith.constant 0 : i32
    %c0_i32_1 = arith.constant 0 : i32
    return %c0_i32, %c0_i32_0 : i32, i32
  }
  func.func @transform_11(%arg0: i32, %arg1: i32) -> (i32, i32) {
    %c0_i32 = arith.constant 0 : i32
    %c0_i32_0 = arith.constant 0 : i32
    %c0_i32_1 = arith.constant 0 : i32
    return %c0_i32, %c0_i32_0 : i32, i32
  }
  func.func @transform_12(%arg0: i32, %arg1: i32) -> (i32, i32, i32) {
    %c0_i32 = arith.constant 0 : i32
    %c0_i32_0 = arith.constant 0 : i32
    %c0_i32_1 = arith.constant 0 : i32
    return %arg0, %c0_i32, %c0_i32_0 : i32, i32, i32
  }
}

module attributes {stable_mosaic.version = 11 : i64} {
  func.func @_cross_attn_kernel(%arg0: i32, %arg1: memref<1x8x32xbf16, #tpu.memory_space<vmem>>, %arg2: memref<1x8x32xf32, #tpu.memory_space<vmem>>, %arg3: memref<32x64xbf16, #tpu.memory_space<vmem>>, %arg4: memref<1x64xf32, #tpu.memory_space<vmem>>, %arg5: memref<32x64xbf16, #tpu.memory_space<vmem>>, %arg6: memref<1x64xf32, #tpu.memory_space<vmem>>, %arg7: memref<32x64xbf16, #tpu.memory_space<vmem>>, %arg8: memref<1x64xf32, #tpu.memory_space<vmem>>, %arg9: memref<64x32xbf16, #tpu.memory_space<vmem>>, %arg10: memref<1x32xf32, #tpu.memory_space<vmem>>, %arg11: memref<1x1x8xf32, #tpu.memory_space<vmem>>, %arg12: memref<1x1x8xf32, #tpu.memory_space<vmem>>, %arg13: memref<1x8x32xbf16, #tpu.memory_space<vmem>>) attributes {dimension_semantics = [#tpu.dimension_semantics<parallel>], iteration_bounds = array<i64: 2>, scalar_prefetch = 0 : i64, scratch_operands = 0 : i64, tpu.core_type = #tpu.core_type<tc>, window_params = [{transform_indices = @transform_0, window_bounds = array<i64: 1, 8, 32>}, {transform_indices = @transform_1, window_bounds = array<i64: 1, 8, 32>}, {pipeline_mode = #tpu.pipeline_mode<synchronous>, transform_indices = @transform_2, window_bounds = array<i64: 32, 64>}, {pipeline_mode = #tpu.pipeline_mode<synchronous>, transform_indices = @transform_3, window_bounds = array<i64: 1, 64>}, {pipeline_mode = #tpu.pipeline_mode<synchronous>, transform_indices = @transform_4, window_bounds = array<i64: 32, 64>}, {pipeline_mode = #tpu.pipeline_mode<synchronous>, transform_indices = @transform_5, window_bounds = array<i64: 1, 64>}, {pipeline_mode = #tpu.pipeline_mode<synchronous>, transform_indices = @transform_6, window_bounds = array<i64: 32, 64>}, {pipeline_mode = #tpu.pipeline_mode<synchronous>, transform_indices = @transform_7, window_bounds = array<i64: 1, 64>}, {pipeline_mode = #tpu.pipeline_mode<synchronous>, transform_indices = @transform_8, window_bounds = array<i64: 64, 32>}, {pipeline_mode = #tpu.pipeline_mode<synchronous>, transform_indices = @transform_9, window_bounds = array<i64: 1, 32>}, {transform_indices = @transform_10, window_bounds = array<i64: 1, 1, 8>}, {transform_indices = @transform_11, window_bounds = array<i64: 1, 1, 8>}, {transform_indices = @transform_12, window_bounds = array<i64: 1, 8, 32>}]} {
    %c0 = arith.constant 0 : index
    %c0_0 = arith.constant 0 : index
    %c0_1 = arith.constant 0 : index
    %0 = vector.load %arg1[%c0, %c0_0, %c0_1] : memref<1x8x32xbf16, #tpu.memory_space<vmem>>, vector<1x8x32xbf16>
    %1 = vector.shape_cast %0 : vector<1x8x32xbf16> to vector<8x32xbf16>
    %c0_2 = arith.constant 0 : index
    %c0_3 = arith.constant 0 : index
    %c0_4 = arith.constant 0 : index
    %2 = vector.load %arg2[%c0_2, %c0_3, %c0_4] : memref<1x8x32xf32, #tpu.memory_space<vmem>>, vector<1x8x32xf32>
    %3 = vector.shape_cast %2 : vector<1x8x32xf32> to vector<8x32xf32>
    %4 = arith.truncf %3 : vector<8x32xf32> to vector<8x32xbf16>
    %c0_5 = arith.constant 0 : index
    %c0_6 = arith.constant 0 : index
    %5 = vector.load %arg3[%c0_5, %c0_6] : memref<32x64xbf16, #tpu.memory_space<vmem>>, vector<32x64xbf16>
    %cst = arith.constant dense<0.000000e+00> : vector<8x64xf32>
    %6 = tpu.matmul %1, %5, %cst {dimension_numbers = #tpu.dot_dimension_numbers<[1], [0], [0], [1], [0, 0, 1, 1], [], []>} : vector<8x32xbf16>, vector<32x64xbf16>, vector<8x64xf32> -> vector<8x64xf32>
    %c0_7 = arith.constant 0 : index
    %c0_8 = arith.constant 0 : index
    %7 = vector.load %arg4[%c0_7, %c0_8] : memref<1x64xf32, #tpu.memory_space<vmem>>, vector<1x64xf32>
    %8 = vector.broadcast %7 : vector<1x64xf32> to vector<8x64xf32>
    %9 = arith.addf %6, %8 : vector<8x64xf32>
    %c0_9 = arith.constant 0 : index
    %c0_10 = arith.constant 0 : index
    %10 = vector.load %arg5[%c0_9, %c0_10] : memref<32x64xbf16, #tpu.memory_space<vmem>>, vector<32x64xbf16>
    %cst_11 = arith.constant dense<0.000000e+00> : vector<8x64xf32>
    %11 = tpu.matmul %4, %10, %cst_11 {dimension_numbers = #tpu.dot_dimension_numbers<[1], [0], [0], [1], [0, 0, 1, 1], [], []>} : vector<8x32xbf16>, vector<32x64xbf16>, vector<8x64xf32> -> vector<8x64xf32>
    %c0_12 = arith.constant 0 : index
    %c0_13 = arith.constant 0 : index
    %12 = vector.load %arg6[%c0_12, %c0_13] : memref<1x64xf32, #tpu.memory_space<vmem>>, vector<1x64xf32>
    %13 = vector.broadcast %12 : vector<1x64xf32> to vector<8x64xf32>
    %14 = arith.addf %11, %13 : vector<8x64xf32>
    %c0_14 = arith.constant 0 : index
    %c0_15 = arith.constant 0 : index
    %15 = vector.load %arg7[%c0_14, %c0_15] : memref<32x64xbf16, #tpu.memory_space<vmem>>, vector<32x64xbf16>
    %cst_16 = arith.constant dense<0.000000e+00> : vector<8x64xf32>
    %16 = tpu.matmul %4, %15, %cst_16 {dimension_numbers = #tpu.dot_dimension_numbers<[1], [0], [0], [1], [0, 0, 1, 1], [], []>} : vector<8x32xbf16>, vector<32x64xbf16>, vector<8x64xf32> -> vector<8x64xf32>
    %c0_17 = arith.constant 0 : index
    %c0_18 = arith.constant 0 : index
    %17 = vector.load %arg8[%c0_17, %c0_18] : memref<1x64xf32, #tpu.memory_space<vmem>>, vector<1x64xf32>
    %18 = vector.broadcast %17 : vector<1x64xf32> to vector<8x64xf32>
    %19 = arith.addf %16, %18 : vector<8x64xf32>
    %20 = arith.truncf %9 : vector<8x64xf32> to vector<8x64xbf16>
    %21 = vector.shape_cast %20 : vector<8x64xbf16> to vector<8x8x8xbf16>
    %22 = tpu.transpose %21, [1, 0, 2] : vector<8x8x8xbf16> -> vector<8x8x8xbf16>
    %23 = arith.truncf %14 : vector<8x64xf32> to vector<8x64xbf16>
    %24 = vector.shape_cast %23 : vector<8x64xbf16> to vector<8x8x8xbf16>
    %25 = tpu.transpose %24, [1, 0, 2] : vector<8x8x8xbf16> -> vector<8x8x8xbf16>
    %26 = arith.truncf %19 : vector<8x64xf32> to vector<8x64xbf16>
    %27 = vector.shape_cast %26 : vector<8x64xbf16> to vector<8x8x8xbf16>
    %28 = tpu.transpose %27, [1, 0, 2] : vector<8x8x8xbf16> -> vector<8x8x8xbf16>
    %29 = tpu.iota {dimensions = array<i32: 0>} : vector<8x1x8xi32>
    %c4_i32 = arith.constant 4 : i32
    %30 = vector.broadcast %c4_i32 : i32 to vector<8x1x8xi32>
    %31 = arith.cmpi slt, %29, %30 : vector<8x1x8xi32>
    %c0_19 = arith.constant 0 : index
    %c0_20 = arith.constant 0 : index
    %c0_21 = arith.constant 0 : index
    %32 = vector.load %arg11[%c0_19, %c0_20, %c0_21] : memref<1x1x8xf32, #tpu.memory_space<vmem>>, vector<1x1x8xf32>
    %33 = vector.shape_cast %32 : vector<1x1x8xf32> to vector<1x8xf32>
    %34 = vector.shape_cast %33 : vector<1x8xf32> to vector<1x1x8xf32>
    %c0_22 = arith.constant 0 : index
    %c0_23 = arith.constant 0 : index
    %c0_24 = arith.constant 0 : index
    %35 = vector.load %arg12[%c0_22, %c0_23, %c0_24] : memref<1x1x8xf32, #tpu.memory_space<vmem>>, vector<1x1x8xf32>
    %36 = vector.shape_cast %35 : vector<1x1x8xf32> to vector<1x8xf32>
    %37 = vector.shape_cast %36 : vector<1x8xf32> to vector<1x1x8xf32>
    %38 = vector.shape_cast %34 : vector<1x1x8xf32> to vector<1x1x8xf32>
    %39 = vector.broadcast %38 : vector<1x1x8xf32> to vector<8x1x8xf32>
    %40 = vector.shape_cast %37 : vector<1x1x8xf32> to vector<1x1x8xf32>
    %41 = vector.broadcast %40 : vector<1x1x8xf32> to vector<8x1x8xf32>
    %42 = arith.select %31, %39, %41 : vector<8x1x8xi1>, vector<8x1x8xf32>
    %cst_25 = arith.constant dense<0.000000e+00> : vector<8x8x8xf32>
    %43 = tpu.matmul %22, %25, %cst_25 {dimension_numbers = #tpu.dot_dimension_numbers<[2], [2], [1], [1], [0, 0, 0, 1, 1, 1], [0], [0]>} : vector<8x8x8xbf16>, vector<8x8x8xbf16>, vector<8x8x8xf32> -> vector<8x8x8xf32>
    %cst_26 = arith.constant 0.353553385 : f32
    %44 = vector.broadcast %cst_26 : f32 to vector<8x8x8xf32>
    %45 = arith.mulf %43, %44 : vector<8x8x8xf32>
    %46 = vector.broadcast %42 : vector<8x1x8xf32> to vector<8x8x8xf32>
    %47 = arith.addf %45, %46 : vector<8x8x8xf32>
    %cst_27 = arith.constant dense<0xFF800000> : vector<8x8xf32>
    %48 = vector.multi_reduction <maximumf>, %47, %cst_27 [2] : vector<8x8x8xf32> to vector<8x8xf32>
    %49 = vector.shape_cast %48 : vector<8x8xf32> to vector<8x8x1xf32>
    %50 = vector.broadcast %49 : vector<8x8x1xf32> to vector<8x8x8xf32>
    %51 = arith.subf %47, %50 : vector<8x8x8xf32>
    %52 = math.exp %51 : vector<8x8x8xf32>
    %cst_28 = arith.constant dense<0.000000e+00> : vector<8x8xf32>
    %53 = vector.multi_reduction <add>, %52, %cst_28 [2] : vector<8x8x8xf32> to vector<8x8xf32>
    %54 = vector.shape_cast %53 : vector<8x8xf32> to vector<8x8x1xf32>
    %55 = tpu.reciprocal %54 {approx = true} : vector<8x8x1xf32> -> vector<8x8x1xf32>
    %56 = vector.broadcast %55 : vector<8x8x1xf32> to vector<8x8x8xf32>
    %57 = arith.mulf %52, %56 : vector<8x8x8xf32>
    %58 = arith.truncf %57 : vector<8x8x8xf32> to vector<8x8x8xbf16>
    %cst_29 = arith.constant dense<0.000000e+00> : vector<8x8x8xf32>
    %59 = tpu.matmul %58, %28, %cst_29 {dimension_numbers = #tpu.dot_dimension_numbers<[2], [1], [1], [2], [0, 0, 0, 1, 1, 2], [0], [0]>} : vector<8x8x8xbf16>, vector<8x8x8xbf16>, vector<8x8x8xf32> -> vector<8x8x8xf32>
    %60 = arith.truncf %59 : vector<8x8x8xf32> to vector<8x8x8xbf16>
    %61 = tpu.transpose %60, [1, 0, 2] : vector<8x8x8xbf16> -> vector<8x8x8xbf16>
    %62 = vector.shape_cast %61 : vector<8x8x8xbf16> to vector<8x64xbf16>
    %c0_30 = arith.constant 0 : index
    %c0_31 = arith.constant 0 : index
    %63 = vector.load %arg9[%c0_30, %c0_31] : memref<64x32xbf16, #tpu.memory_space<vmem>>, vector<64x32xbf16>
    %cst_32 = arith.constant dense<0.000000e+00> : vector<8x32xf32>
    %64 = tpu.matmul %62, %63, %cst_32 {dimension_numbers = #tpu.dot_dimension_numbers<[1], [0], [0], [1], [0, 0, 1, 1], [], []>} : vector<8x64xbf16>, vector<64x32xbf16>, vector<8x32xf32> -> vector<8x32xf32>
    %c0_33 = arith.constant 0 : index
    %c0_34 = arith.constant 0 : index
    %65 = vector.load %arg10[%c0_33, %c0_34] : memref<1x32xf32, #tpu.memory_space<vmem>>, vector<1x32xf32>
    %66 = vector.broadcast %65 : vector<1x32xf32> to vector<8x32xf32>
    %67 = arith.addf %64, %66 : vector<8x32xf32>
    %68 = arith.truncf %67 : vector<8x32xf32> to vector<8x32xbf16>
    %c0_35 = arith.constant 0 : index
    %c0_36 = arith.constant 0 : index
    %c0_37 = arith.constant 0 : index
    %69 = vector.load %arg13[%c0_35, %c0_36, %c0_37] : memref<1x8x32xbf16, #tpu.memory_space<vmem>>, vector<1x8x32xbf16>
    %70 = vector.shape_cast %69 : vector<1x8x32xbf16> to vector<8x32xbf16>
    %71 = vector.shape_cast %68 : vector<8x32xbf16> to vector<1x8x32xbf16>
    tpu.vector_store %arg13[%c0_35, %c0_36, %c0_37], %71 {strides = array<i32>} : memref<1x8x32xbf16, #tpu.memory_space<vmem>>, vector<1x8x32xbf16>,
    return
  }
  func.func @transform_0(%arg0: i32) -> (i32, i32, i32) {
    %c0_i32 = arith.constant 0 : i32
    %c0_i32_0 = arith.constant 0 : i32
    %c0_i32_1 = arith.constant 0 : i32
    return %arg0, %c0_i32, %c0_i32_0 : i32, i32, i32
  }
  func.func @transform_1(%arg0: i32) -> (i32, i32, i32) {
    %c0_i32 = arith.constant 0 : i32
    %c0_i32_0 = arith.constant 0 : i32
    %c0_i32_1 = arith.constant 0 : i32
    return %arg0, %c0_i32, %c0_i32_0 : i32, i32, i32
  }
  func.func @transform_2(%arg0: i32) -> (i32, i32) {
    %c0_i32 = arith.constant 0 : i32
    %c0_i32_0 = arith.constant 0 : i32
    %c0_i32_1 = arith.constant 0 : i32
    return %c0_i32, %c0_i32_0 : i32, i32
  }
  func.func @transform_3(%arg0: i32) -> (i32, i32) {
    %c0_i32 = arith.constant 0 : i32
    %c0_i32_0 = arith.constant 0 : i32
    %c0_i32_1 = arith.constant 0 : i32
    return %c0_i32, %c0_i32_0 : i32, i32
  }
  func.func @transform_4(%arg0: i32) -> (i32, i32) {
    %c0_i32 = arith.constant 0 : i32
    %c0_i32_0 = arith.constant 0 : i32
    %c0_i32_1 = arith.constant 0 : i32
    return %c0_i32, %c0_i32_0 : i32, i32
  }
  func.func @transform_5(%arg0: i32) -> (i32, i32) {
    %c0_i32 = arith.constant 0 : i32
    %c0_i32_0 = arith.constant 0 : i32
    %c0_i32_1 = arith.constant 0 : i32
    return %c0_i32, %c0_i32_0 : i32, i32
  }
  func.func @transform_6(%arg0: i32) -> (i32, i32) {
    %c0_i32 = arith.constant 0 : i32
    %c0_i32_0 = arith.constant 0 : i32
    %c0_i32_1 = arith.constant 0 : i32
    return %c0_i32, %c0_i32_0 : i32, i32
  }
  func.func @transform_7(%arg0: i32) -> (i32, i32) {
    %c0_i32 = arith.constant 0 : i32
    %c0_i32_0 = arith.constant 0 : i32
    %c0_i32_1 = arith.constant 0 : i32
    return %c0_i32, %c0_i32_0 : i32, i32
  }
  func.func @transform_8(%arg0: i32) -> (i32, i32) {
    %c0_i32 = arith.constant 0 : i32
    %c0_i32_0 = arith.constant 0 : i32
    %c0_i32_1 = arith.constant 0 : i32
    return %c0_i32, %c0_i32_0 : i32, i32
  }
  func.func @transform_9(%arg0: i32) -> (i32, i32) {
    %c0_i32 = arith.constant 0 : i32
    %c0_i32_0 = arith.constant 0 : i32
    %c0_i32_1 = arith.constant 0 : i32
    return %c0_i32, %c0_i32_0 : i32, i32
  }
  func.func @transform_10(%arg0: i32) -> (i32, i32, i32) {
    %c0_i32 = arith.constant 0 : i32
    %c0_i32_0 = arith.constant 0 : i32
    %c0_i32_1 = arith.constant 0 : i32
    return %arg0, %c0_i32, %c0_i32_0 : i32, i32, i32
  }
  func.func @transform_11(%arg0: i32) -> (i32, i32, i32) {
    %c0_i32 = arith.constant 0 : i32
    %c0_i32_0 = arith.constant 0 : i32
    %c0_i32_1 = arith.constant 0 : i32
    return %arg0, %c0_i32, %c0_i32_0 : i32, i32, i32
  }
  func.func @transform_12(%arg0: i32) -> (i32, i32, i32) {
    %c0_i32 = arith.constant 0 : i32
    %c0_i32_0 = arith.constant 0 : i32
    %c0_i32_1 = arith.constant 0 : i32
    return %arg0, %c0_i32, %c0_i32_0 : i32, i32, i32
  }
}

module attributes {stable_mosaic.version = 11 : i64} {
  func.func @_ln_mlp_ln_kernel(%arg0: i32, %arg1: i32, %arg2: memref<16x32xbf16, #tpu.memory_space<vmem>>, %arg3: memref<16x32xbf16, #tpu.memory_space<vmem>>, %arg4: memref<1x32xf32, #tpu.memory_space<vmem>>, %arg5: memref<1x32xf32, #tpu.memory_space<vmem>>, %arg6: memref<32x128xbf16, #tpu.memory_space<vmem>>, %arg7: memref<1x128xf32, #tpu.memory_space<vmem>>, %arg8: memref<128x32xbf16, #tpu.memory_space<vmem>>, %arg9: memref<1x32xf32, #tpu.memory_space<vmem>>, %arg10: memref<1x32xf32, #tpu.memory_space<vmem>>, %arg11: memref<1x32xf32, #tpu.memory_space<vmem>>, %arg12: memref<16x32xf32, #tpu.memory_space<vmem>>, %arg13: memref<16x32xf32, #tpu.memory_space<vmem>>, %arg14: memref<16x32xbf16, #tpu.memory_space<vmem>>, %arg15: memref<16x32xf32, #tpu.memory_space<vmem>>) attributes {dimension_semantics = [#tpu.dimension_semantics<parallel>, #tpu.dimension_semantics<arbitrary>], iteration_bounds = array<i64: 1, 1>, scalar_prefetch = 0 : i64, scratch_operands = 3 : i64, tpu.core_type = #tpu.core_type<tc>, window_params = [{transform_indices = @transform_0, window_bounds = array<i64: 16, 32>}, {transform_indices = @transform_1, window_bounds = array<i64: 16, 32>}, {pipeline_mode = #tpu.pipeline_mode<synchronous>, transform_indices = @transform_2, window_bounds = array<i64: 1, 32>}, {pipeline_mode = #tpu.pipeline_mode<synchronous>, transform_indices = @transform_3, window_bounds = array<i64: 1, 32>}, {transform_indices = @transform_4, window_bounds = array<i64: 32, 128>}, {transform_indices = @transform_5, window_bounds = array<i64: 1, 128>}, {transform_indices = @transform_6, window_bounds = array<i64: 128, 32>}, {pipeline_mode = #tpu.pipeline_mode<synchronous>, transform_indices = @transform_7, window_bounds = array<i64: 1, 32>}, {pipeline_mode = #tpu.pipeline_mode<synchronous>, transform_indices = @transform_8, window_bounds = array<i64: 1, 32>}, {pipeline_mode = #tpu.pipeline_mode<synchronous>, transform_indices = @transform_9, window_bounds = array<i64: 1, 32>}, {transform_indices = @transform_10, window_bounds = array<i64: 16, 32>}]} {
    %c0_i32 = arith.constant 0 : i32
    %0 = arith.cmpi eq, %arg1, %c0_i32 : i32
    %1 = arith.extui %0 : i1 to i32
    %c0_i32_0 = arith.constant 0 : i32
    %2 = arith.cmpi ne, %1, %c0_i32_0 : i32
    scf.if %2 {
      %c0_19 = arith.constant 0 : index
      %c0_20 = arith.constant 0 : index
      %31 = vector.load %arg2[%c0_19, %c0_20] : memref<16x32xbf16, #tpu.memory_space<vmem>>, vector<16x32xbf16>
      %32 = arith.extf %31 : vector<16x32xbf16> to vector<16x32xf32>
      %c0_21 = arith.constant 0 : index
      %c0_22 = arith.constant 0 : index
      %33 = vector.load %arg3[%c0_21, %c0_22] : memref<16x32xbf16, #tpu.memory_space<vmem>>, vector<16x32xbf16>
      %34 = arith.extf %33 : vector<16x32xbf16> to vector<16x32xf32>
      %35 = arith.addf %32, %34 : vector<16x32xf32>
      %cst_23 = arith.constant dense<0.000000e+00> : vector<16xf32>
      %36 = vector.multi_reduction <add>, %35, %cst_23 [1] : vector<16x32xf32> to vector<16xf32>
      %37 = vector.shape_cast %36 : vector<16xf32> to vector<16x1xf32>
      %cst_24 = arith.constant 3.200000e+01 : f32
      %38 = vector.broadcast %cst_24 : f32 to vector<16x1xf32>
      %39 = arith.divf %37, %38 : vector<16x1xf32>
      %40 = vector.broadcast %39 : vector<16x1xf32> to vector<16x32xf32>
      %41 = arith.subf %35, %40 : vector<16x32xf32>
      %42 = arith.mulf %41, %41 : vector<16x32xf32>
      %cst_25 = arith.constant dense<0.000000e+00> : vector<16xf32>
      %43 = vector.multi_reduction <add>, %42, %cst_25 [1] : vector<16x32xf32> to vector<16xf32>
      %44 = vector.shape_cast %43 : vector<16xf32> to vector<16x1xf32>
      %cst_26 = arith.constant 3.200000e+01 : f32
      %45 = vector.broadcast %cst_26 : f32 to vector<16x1xf32>
      %46 = arith.divf %44, %45 : vector<16x1xf32>
      %47 = vector.broadcast %39 : vector<16x1xf32> to vector<16x32xf32>
      %48 = arith.subf %35, %47 : vector<16x32xf32>
      %cst_27 = arith.constant 9.99999974E-6 : f32
      %49 = vector.broadcast %cst_27 : f32 to vector<16x1xf32>
      %50 = arith.addf %46, %49 : vector<16x1xf32>
      %51 = math.rsqrt %50 : vector<16x1xf32>
      %52 = vector.broadcast %51 : vector<16x1xf32> to vector<16x32xf32>
      %53 = arith.mulf %48, %52 : vector<16x32xf32>
      %c0_28 = arith.constant 0 : index
      %c0_29 = arith.constant 0 : index
      %54 = vector.load %arg4[%c0_28, %c0_29] : memref<1x32xf32, #tpu.memory_space<vmem>>, vector<1x32xf32>
      %55 = vector.broadcast %54 : vector<1x32xf32> to vector<16x32xf32>
      %56 = arith.mulf %53, %55 : vector<16x32xf32>
      %c0_30 = arith.constant 0 : index
      %c0_31 = arith.constant 0 : index
      %57 = vector.load %arg5[%c0_30, %c0_31] : memref<1x32xf32, #tpu.memory_space<vmem>>, vector<1x32xf32>
      %58 = vector.broadcast %57 : vector<1x32xf32> to vector<16x32xf32>
      %59 = arith.addf %56, %58 : vector<16x32xf32>
      %c0_32 = arith.constant 0 : index
      %c0_33 = arith.constant 0 : index
      %60 = vector.load %arg13[%c0_32, %c0_33] : memref<16x32xf32, #tpu.memory_space<vmem>>, vector<16x32xf32>
      tpu.vector_store %arg13[%c0_32, %c0_33], %59 {strides = array<i32>} : memref<16x32xf32, #tpu.memory_space<vmem>>, vector<16x32xf32>,
      %61 = arith.truncf %59 : vector<16x32xf32> to vector<16x32xbf16>
      %c0_34 = arith.constant 0 : index
      %c0_35 = arith.constant 0 : index
      %62 = vector.load %arg14[%c0_34, %c0_35] : memref<16x32xbf16, #tpu.memory_space<vmem>>, vector<16x32xbf16>
      tpu.vector_store %arg14[%c0_34, %c0_35], %61 {strides = array<i32>} : memref<16x32xbf16, #tpu.memory_space<vmem>>, vector<16x32xbf16>,
      %cst_36 = arith.constant 0.000000e+00 : f32
      %63 = vector.broadcast %cst_36 : f32 to vector<16x32xf32>
      %c0_37 = arith.constant 0 : index
      %c0_38 = arith.constant 0 : index
      %64 = vector.load %arg15[%c0_37, %c0_38] : memref<16x32xf32, #tpu.memory_space<vmem>>, vector<16x32xf32>
      tpu.vector_store %arg15[%c0_37, %c0_38], %63 {strides = array<i32>} : memref<16x32xf32, #tpu.memory_space<vmem>>, vector<16x32xf32>,
    } else {
    }
    %c0 = arith.constant 0 : index
    %c0_1 = arith.constant 0 : index
    %3 = vector.load %arg14[%c0, %c0_1] : memref<16x32xbf16, #tpu.memory_space<vmem>>, vector<16x32xbf16>
    %c0_2 = arith.constant 0 : index
    %c0_3 = arith.constant 0 : index
    %4 = vector.load %arg6[%c0_2, %c0_3] : memref<32x128xbf16, #tpu.memory_space<vmem>>, vector<32x128xbf16>
    %cst = arith.constant dense<0.000000e+00> : vector<16x128xf32>
    %5 = tpu.matmul %3, %4, %cst {dimension_numbers = #tpu.dot_dimension_numbers<[1], [0], [0], [1], [0, 0, 1, 1], [], []>} : vector<16x32xbf16>, vector<32x128xbf16>, vector<16x128xf32> -> vector<16x128xf32>
    %c0_4 = arith.constant 0 : index
    %c0_5 = arith.constant 0 : index
    %6 = vector.load %arg7[%c0_4, %c0_5] : memref<1x128xf32, #tpu.memory_space<vmem>>, vector<1x128xf32>
    %7 = vector.broadcast %6 : vector<1x128xf32> to vector<16x128xf32>
    %8 = arith.addf %5, %7 : vector<16x128xf32>
    %9 = arith.mulf %8, %8 : vector<16x128xf32>
    %10 = arith.mulf %8, %9 : vector<16x128xf32>
    %cst_6 = arith.constant 4.471500e-02 : f32
    %11 = vector.broadcast %cst_6 : f32 to vector<16x128xf32>
    %12 = arith.mulf %11, %10 : vector<16x128xf32>
    %13 = arith.addf %8, %12 : vector<16x128xf32>
    %cst_7 = arith.constant 0.797884583 : f32
    %14 = vector.broadcast %cst_7 : f32 to vector<16x128xf32>
    %15 = arith.mulf %14, %13 : vector<16x128xf32>
    %16 = math.tanh %15 : vector<16x128xf32>
    %cst_8 = arith.constant 1.000000e+00 : f32
    %17 = vector.broadcast %cst_8 : f32 to vector<16x128xf32>
    %18 = arith.addf %17, %16 : vector<16x128xf32>
    %cst_9 = arith.constant 5.000000e-01 : f32
    %19 = vector.broadcast %cst_9 : f32 to vector<16x128xf32>
    %20 = arith.mulf %19, %18 : vector<16x128xf32>
    %21 = arith.mulf %8, %20 : vector<16x128xf32>
    %c0_10 = arith.constant 0 : index
    %c0_11 = arith.constant 0 : index
    %22 = vector.load %arg15[%c0_10, %c0_11] : memref<16x32xf32, #tpu.memory_space<vmem>>, vector<16x32xf32>
    %23 = arith.truncf %21 : vector<16x128xf32> to vector<16x128xbf16>
    %c0_12 = arith.constant 0 : index
    %c0_13 = arith.constant 0 : index
    %24 = vector.load %arg8[%c0_12, %c0_13] : memref<128x32xbf16, #tpu.memory_space<vmem>>, vector<128x32xbf16>
    %cst_14 = arith.constant dense<0.000000e+00> : vector<16x32xf32>
    %25 = tpu.matmul %23, %24, %cst_14 {dimension_numbers = #tpu.dot_dimension_numbers<[1], [0], [0], [1], [0, 0, 1, 1], [], []>} : vector<16x128xbf16>, vector<128x32xbf16>, vector<16x32xf32> -> vector<16x32xf32>
    %26 = arith.addf %22, %25 : vector<16x32xf32>
    %c0_15 = arith.constant 0 : index
    %c0_16 = arith.constant 0 : index
    %27 = vector.load %arg15[%c0_15, %c0_16] : memref<16x32xf32, #tpu.memory_space<vmem>>, vector<16x32xf32>
    tpu.vector_store %arg15[%c0_15, %c0_16], %26 {strides = array<i32>} : memref<16x32xf32, #tpu.memory_space<vmem>>, vector<16x32xf32>,
    %c0_i32_17 = arith.constant 0 : i32
    %28 = arith.cmpi eq, %arg1, %c0_i32_17 : i32
    %29 = arith.extui %28 : i1 to i32
    %c0_i32_18 = arith.constant 0 : i32
    %30 = arith.cmpi ne, %29, %c0_i32_18 : i32
    scf.if %30 {
      %c0_19 = arith.constant 0 : index
      %c0_20 = arith.constant 0 : index
      %31 = vector.load %arg13[%c0_19, %c0_20] : memref<16x32xf32, #tpu.memory_space<vmem>>, vector<16x32xf32>
      %c0_21 = arith.constant 0 : index
      %c0_22 = arith.constant 0 : index
      %32 = vector.load %arg15[%c0_21, %c0_22] : memref<16x32xf32, #tpu.memory_space<vmem>>, vector<16x32xf32>
      %33 = arith.addf %31, %32 : vector<16x32xf32>
      %c0_23 = arith.constant 0 : index
      %c0_24 = arith.constant 0 : index
      %34 = vector.load %arg9[%c0_23, %c0_24] : memref<1x32xf32, #tpu.memory_space<vmem>>, vector<1x32xf32>
      %35 = vector.broadcast %34 : vector<1x32xf32> to vector<16x32xf32>
      %36 = arith.addf %33, %35 : vector<16x32xf32>
      %cst_25 = arith.constant dense<0.000000e+00> : vector<16xf32>
      %37 = vector.multi_reduction <add>, %36, %cst_25 [1] : vector<16x32xf32> to vector<16xf32>
      %38 = vector.shape_cast %37 : vector<16xf32> to vector<16x1xf32>
      %cst_26 = arith.constant 3.200000e+01 : f32
      %39 = vector.broadcast %cst_26 : f32 to vector<16x1xf32>
      %40 = arith.divf %38, %39 : vector<16x1xf32>
      %41 = vector.broadcast %40 : vector<16x1xf32> to vector<16x32xf32>
      %42 = arith.subf %36, %41 : vector<16x32xf32>
      %43 = arith.mulf %42, %42 : vector<16x32xf32>
      %cst_27 = arith.constant dense<0.000000e+00> : vector<16xf32>
      %44 = vector.multi_reduction <add>, %43, %cst_27 [1] : vector<16x32xf32> to vector<16xf32>
      %45 = vector.shape_cast %44 : vector<16xf32> to vector<16x1xf32>
      %cst_28 = arith.constant 3.200000e+01 : f32
      %46 = vector.broadcast %cst_28 : f32 to vector<16x1xf32>
      %47 = arith.divf %45, %46 : vector<16x1xf32>
      %48 = vector.broadcast %40 : vector<16x1xf32> to vector<16x32xf32>
      %49 = arith.subf %36, %48 : vector<16x32xf32>
      %cst_29 = arith.constant 9.99999974E-6 : f32
      %50 = vector.broadcast %cst_29 : f32 to vector<16x1xf32>
      %51 = arith.addf %47, %50 : vector<16x1xf32>
      %52 = math.rsqrt %51 : vector<16x1xf32>
      %53 = vector.broadcast %52 : vector<16x1xf32> to vector<16x32xf32>
      %54 = arith.mulf %49, %53 : vector<16x32xf32>
      %c0_30 = arith.constant 0 : index
      %c0_31 = arith.constant 0 : index
      %55 = vector.load %arg10[%c0_30, %c0_31] : memref<1x32xf32, #tpu.memory_space<vmem>>, vector<1x32xf32>
      %56 = vector.broadcast %55 : vector<1x32xf32> to vector<16x32xf32>
      %57 = arith.mulf %54, %56 : vector<16x32xf32>
      %c0_32 = arith.constant 0 : index
      %c0_33 = arith.constant 0 : index
      %58 = vector.load %arg11[%c0_32, %c0_33] : memref<1x32xf32, #tpu.memory_space<vmem>>, vector<1x32xf32>
      %59 = vector.broadcast %58 : vector<1x32xf32> to vector<16x32xf32>
      %60 = arith.addf %57, %59 : vector<16x32xf32>
      %c0_34 = arith.constant 0 : index
      %c0_35 = arith.constant 0 : index
      %61 = vector.load %arg12[%c0_34, %c0_35] : memref<16x32xf32, #tpu.memory_space<vmem>>, vector<16x32xf32>
      tpu.vector_store %arg12[%c0_34, %c0_35], %60 {strides = array<i32>} : memref<16x32xf32, #tpu.memory_space<vmem>>, vector<16x32xf32>,
    } else {
    }
    return
  }
  func.func @transform_0(%arg0: i32, %arg1: i32) -> (i32, i32) {
    %c0_i32 = arith.constant 0 : i32
    %c0_i32_0 = arith.constant 0 : i32
    return %arg0, %c0_i32 : i32, i32
  }
  func.func @transform_1(%arg0: i32, %arg1: i32) -> (i32, i32) {
    %c0_i32 = arith.constant 0 : i32
    %c0_i32_0 = arith.constant 0 : i32
    return %arg0, %c0_i32 : i32, i32
  }
  func.func @transform_2(%arg0: i32, %arg1: i32) -> (i32, i32) {
    %c0_i32 = arith.constant 0 : i32
    %c0_i32_0 = arith.constant 0 : i32
    %c0_i32_1 = arith.constant 0 : i32
    return %c0_i32, %c0_i32_0 : i32, i32
  }
  func.func @transform_3(%arg0: i32, %arg1: i32) -> (i32, i32) {
    %c0_i32 = arith.constant 0 : i32
    %c0_i32_0 = arith.constant 0 : i32
    %c0_i32_1 = arith.constant 0 : i32
    return %c0_i32, %c0_i32_0 : i32, i32
  }
  func.func @transform_4(%arg0: i32, %arg1: i32) -> (i32, i32) {
    %c0_i32 = arith.constant 0 : i32
    %c0_i32_0 = arith.constant 0 : i32
    return %c0_i32, %arg1 : i32, i32
  }
  func.func @transform_5(%arg0: i32, %arg1: i32) -> (i32, i32) {
    %c0_i32 = arith.constant 0 : i32
    %c0_i32_0 = arith.constant 0 : i32
    return %c0_i32, %arg1 : i32, i32
  }
  func.func @transform_6(%arg0: i32, %arg1: i32) -> (i32, i32) {
    %c0_i32 = arith.constant 0 : i32
    %c0_i32_0 = arith.constant 0 : i32
    return %arg1, %c0_i32 : i32, i32
  }
  func.func @transform_7(%arg0: i32, %arg1: i32) -> (i32, i32) {
    %c0_i32 = arith.constant 0 : i32
    %c0_i32_0 = arith.constant 0 : i32
    %c0_i32_1 = arith.constant 0 : i32
    return %c0_i32, %c0_i32_0 : i32, i32
  }
  func.func @transform_8(%arg0: i32, %arg1: i32) -> (i32, i32) {
    %c0_i32 = arith.constant 0 : i32
    %c0_i32_0 = arith.constant 0 : i32
    %c0_i32_1 = arith.constant 0 : i32
    return %c0_i32, %c0_i32_0 : i32, i32
  }
  func.func @transform_9(%arg0: i32, %arg1: i32) -> (i32, i32) {
    %c0_i32 = arith.constant 0 : i32
    %c0_i32_0 = arith.constant 0 : i32
    %c0_i32_1 = arith.constant 0 : i32
    return %c0_i32, %c0_i32_0 : i32, i32
  }
  func.func @transform_10(%arg0: i32, %arg1: i32) -> (i32, i32) {
    %c0_i32 = arith.constant 0 : i32
    %c0_i32_0 = arith.constant 0 : i32
    return %arg0, %c0_i32 : i32, i32
  }
}

</mosaic_0001>

<bundles_post_ra>
// kernel: edge_decoder_block.7
= control target key start
LH: loop header
LB: loop body
LE: loop exit
PB: predicated region body
PF: predicated region fallthrough
CT: control target
= control target key end

     0   :  { %vm51_vm0 = vcmask 261120   ;;  %s643_s0 = inlined_call_operand.vmem [shape: bf16[16,32], index: 0, kind: input, shape index: {}]   ;;  %s644_s1 = inlined_call_operand.vmem [shape: bf16[16,32], index: 1, kind: input, shape index: {}]   ;;  %s645_s2 = inlined_call_operand.vmem [shape: f32[1,32], index: 2, kind: input, shape index: {}]   ;;  %s646_s3 = inlined_call_operand.vmem [shape: f32[1,32], index: 3, kind: input, shape index: {}]   ;;  %s647_s4 = inlined_call_operand.vmem [shape: bf16[32,128], index: 4, kind: input, shape index: {}]   ;;  %s648_s5 = inlined_call_operand.vmem [shape: f32[1,128], index: 5, kind: input, shape index: {}]   ;;  %s649_s6 = inlined_call_operand.vmem [shape: bf16[128,32], index: 6, kind: input, shape index: {}]   ;;  %s650_s7 = inlined_call_operand.vmem [shape: f32[1,32], index: 7, kind: input, shape index: {}]   ;;  %s651_s8 = inlined_call_operand.vmem [shape: f32[1,32], index: 8, kind: input, shape index: {}]   ;;  %s652_s9 = inlined_call_operand.vmem [shape: f32[1,32], index: 9, kind: input, shape index: {}]   ;;  %s653_s10 = inlined_call_operand.hbm [shape: f32[16,32], index: 10, kind: output, shape index: {}]  }
   0x1   :  { %v401_v0 = vld [vmem:[%s643_s0] sm:$0xff]  }
   0x2   :  { %v405_v1 = vld [vmem:[%s644_s1] sm:$0xff]   ;;  %v402_v2 = vunpack.c.l.bf16 %v401_v0  ;;  %v403_v4 = vunpack.c.h.bf16 %v401_v0 }
   0x3   :  { %v406_v3 = vunpack.c.l.bf16 %v405_v1  ;;  %v407_v5 = vunpack.c.h.bf16 %v405_v1 }
   0x5   :  { %v49_v6 = vadd.f32 %v406_v3, %v402_v2  ;;  %v50_v7 = vadd.f32 %v407_v5, %v403_v4 }
   0x7   :  { %v52_v8 = vsel %vm51_vm0, %v49_v6, 0.0  ;;  %v55_v9 = vsel %vm51_vm0, %v50_v7, 0.0 }
   0x8   :  { %53 = vadd.xlane.f32.xlu0 %v52_v8 }
   0x9   :  { %15 = vsyncpa [#allocation6], 0  ;;  %v453_v20 = vld [vmem:[%s647_s4] sm:$0xff]   ;;  %v499_v21 = vmov 0.0   ;;  %v454_v22 = vld [vmem:[%s647_s4 + $0x8] sm:$0xff]   ;;  %vm500_vm1 = vmmov 0  }
   0xa   :  { %420 = vmatprep.subr.bf16.mxu0 %v499_v21  ;;  %101 = vst.msk [vmem:[#allocation4] sm:$0xff] %vm51_vm0, %v499_v21  ;;  %102 = vst.msk [vmem:[#allocation4 + $0x8] sm:$0xff] %vm51_vm0, %v499_v21  ;;  %428 = vmatprep.subr.bf16.mxu1 %v499_v21  ;;  %v383_v30 = vld [vmem:[%s645_s2] ss:$0 sm:$0xff]  ;;  %v456_v42 = vld [vmem:[%s649_s6 + $0x8] sm:$0xff]   ;;  %s501_s19 = smov [#allocation5]  }
   0xb   :  { %421 = vmatpush3.bf16.msra.mxu0 %v453_v20  ;;  %424 = vmatprep.mubr.msk.bf16.mxu0 %vm500_vm1, %v499_v21  ;;  %v384_v32 = vld [vmem:[%s646_s3] ss:$0 sm:$0xff]  ;;  %v457_v43 = vld [vmem:[%s649_s6 + $0x10] sm:$0xff]   ;;  %v458_v44 = vld [vmem:[%s649_s6 + $0x18] sm:$0xff]   ;;  %s372_s20 = sshll.u32 %s501_s19, 4  ;;  %s373_s20 = int_to_ptr.vmem [resolvable:$true] %s372_s20 }
   0xc   :  { %56 = vadd.xlane.f32.xlu0 %v55_v9  ;;  %422 = vmatprep.subr.bf16.mxu0 %v499_v21  ;;  %v455_v41 = vld [vmem:[%s649_s6] sm:$0xff]   ;;  %v460_v46 = vld [vmem:[%s649_s6 + $0x28] sm:$0xff]   ;;  %v461_v47 = vld [vmem:[%s649_s6 + $0x30] sm:$0xff]   ;;  %s475_s4 = scalar_lea.vmem %s373_s20, 256  ;;  %p480_p1 = scmp.lt.s32.totalorder %s373_s20, %s373_s20 }
   0xd   :  { %444 = vmatprep.mubr.msk.bf16.mxu1 %vm500_vm1, %v499_v21  ;;  %429 = vmatpush3.bf16.msra.mxu1 %v455_v41  ;;  %v459_v45 = vld [vmem:[%s649_s6 + $0x20] sm:$0xff]   ;;  %v462_v48 = vld [vmem:[%s649_s6 + $0x38] sm:$0xff]   ;;  %p476_p0 = scmp.ne.s32.totalorder %s373_s20, %s475_s4  ;;  %p481_p2 = scmp.lt.s32.totalorder %s475_s4, %s475_s4 }
   0xe   :  { %430 = vmatprep.subr.bf16.mxu1 %v499_v21  ;;  %v385_v49 = vld [vmem:[%s648_s5] ss:$0 sm:$0xff] }
   0xf   :  { %423 = vmatpush3.bf16.msra.mxu0 %v454_v22  ;;  %p482_p3 = por %p481_p2, %p480_p1 }
  0x11   :  { %431 = vmatpush3.bf16.msra.mxu1 %v456_v42  ;;  %p483_p4 = pnand %p482_p3, %p476_p0 }
  0x12   :  { %432 = vmatprep.subr.bf16.mxu1 %v499_v21 }
  0x15   :  { %433 = vmatpush3.bf16.msra.mxu1 %v457_v43 }
  0x16   :  { %434 = vmatprep.subr.bf16.mxu1 %v499_v21 }
  0x19   :  { %435 = vmatpush3.bf16.msra.mxu1 %v458_v44 }
  0x1a   :  { %436 = vmatprep.subr.bf16.mxu1 %v499_v21 }
  0x1d   :  { %437 = vmatpush3.bf16.msra.mxu1 %v459_v45 }
  0x1e   :  { %438 = vmatprep.subr.bf16.mxu1 %v499_v21 }
  0x21   :  { %439 = vmatpush3.bf16.msra.mxu1 %v460_v46 }
  0x22   :  { %440 = vmatprep.subr.bf16.mxu1 %v499_v21 }
  0x25   :  { %441 = vmatpush3.bf16.msra.mxu1 %v461_v47  ;;  %v398_v47 = vld [vmem:[%s651_s8] ss:$0 sm:$0xff] }
  0x26   :  { %442 = vmatprep.subr.bf16.mxu1 %v499_v21  ;;  %v397_v21 = vld [vmem:[%s650_s7] ss:$0 sm:$0xff] }
  0x29   :  { %443 = vmatpush3.bf16.msra.mxu1 %v462_v48 }
  0x95   :  { %v54_v10 = vpop.xlane.xlu0 %53 }
  0x96   :  { %v59_v11 = vmul.f32 0.03125, %v54_v10 }
  0x98   :  { %v61_v12 = vsub.f32 %v49_v6, %v59_v11  ;;  %v190_v11 = vld [vmem:[#allocation4] sm:$0xff] }
  0x99   :  { %v57_v13 = vpop.xlane.xlu0 %56 }
  0x9a   :  { %v60_v14 = vmul.f32 0.03125, %v57_v13  ;;  %v63_v15 = vmul.f32 %v61_v12, %v61_v12  ;;  %v191_v13 = vld [vmem:[#allocation4 + $0x8] sm:$0xff] }
  0x9c   :  { %v62_v16 = vsub.f32 %v50_v7, %v60_v14  ;;  %v65_v17 = vsel %vm51_vm0, %v63_v15, 0.0 }
  0x9d   :  { %66 = vadd.xlane.f32.xlu1 %v65_v17 }
  0x9e   :  { %v64_v18 = vmul.f32 %v62_v16, %v62_v16 }
  0xa0   :  { %v68_v19 = vsel %vm51_vm0, %v64_v18, 0.0 }
  0xa1   :  { %69 = vadd.xlane.f32.xlu1 %v68_v19 }
 0x12a   :  { %v67_v23 = vpop.xlane.xlu1 %66 }
 0x12b   :  { %v71_v24 = vmul.f32 0.03125, %v67_v23 }
 0x12d   :  { %v73_v25 = vadd.f32 1e-05, %v71_v24 }
 0x12e   :  { %v70_v26 = vpop.xlane.xlu1 %69 }
 0x12f   :  { %463 = vrsqrt.f32 %v73_v25  ;;  %v72_v27 = vmul.f32 0.03125, %v70_v26 }
 0x131   :  { %v74_v28 = vadd.f32 1e-05, %v72_v27 }
 0x133   :  { %465 = vrsqrt.f32 %v74_v28 }
 0x139   :  { %v464_v29 = vpop.eup %463 }
 0x13a   :  { %v77_v31 = vmul.f32 %v464_v29, %v61_v12 }
 0x13c   :  { %v86_v33 = vmul.f32 %v383_v30, %v77_v31 }
 0x13d   :  { %v466_v34 = vpop.eup %465 }
 0x13e   :  { %v95_v35 = vadd.f32 %v384_v32, %v86_v33  ;;  %v78_v36 = vmul.f32 %v466_v34, %v62_v16 }
 0x140   :  { %97 = vst.msk [vmem:[#allocation2] sm:$0xff] %vm51_vm0, %v95_v35  ;;  %v87_v37 = vmul.f32 %v383_v30, %v78_v36 }
 0x142   :  { %v96_v38 = vadd.f32 %v384_v32, %v87_v37 }
 0x144   :  { %98 = vst.msk [vmem:[#allocation2 + $0x8] sm:$0xff] %vm51_vm0, %v96_v38  ;;  %v99_v39 = vpack.c.bf16 %v96_v38, %v95_v35 }
 0x146   :  { %100 = vst.msk [vmem:[#allocation3] sm:$0xff] %vm51_vm0, %v99_v39 }
 0x147   :  { %v305_v19 = vld [vmem:[#allocation2] sm:$0xff] }
 0x14b   :  { %v306_v23 = vld [vmem:[#allocation2 + $0x8] sm:$0xff] }
 0x14d   :  { %v103_v40 = vld [vmem:[#allocation3] sm:$0xff] }
 0x14e   :  { %425 = vmatmul.mubr.msk.bf16.vlgmr.msra.gmra.mrb[0].mxu0 %vm51_vm0, %v103_v40 }
 0x221   :  { %v165_v50 = vpop.f32.mrb[0].mxu0 }
 0x222   :  { %v166_v51 = vadd.f32 %v385_v49, %v165_v50  ;;  %v426_v52 = vpop.f32.mrb[1].mxu0  ;;  %v399_v50 = vld [vmem:[%s652_s9] ss:$0 sm:$0xff] }
 0x223   :  { %v168_v53 = vpop.f32.mrb[2].mxu0 }
 0x224   :  { %v172_v54 = vmul.f32 %v166_v51, %v166_v51  ;;  %v169_v55 = vadd.f32 %v385_v49, %v168_v53  ;;  %v427_v56 = vpop.f32.mrb[3].mxu0 }
 0x226   :  { %v174_v57 = vmul.f32 %v172_v54, %v166_v51  ;;  %v173_v58 = vmul.f32 %v169_v55, %v169_v55 }
 0x228   :  { %v176_v59 = vmul.f32 0.044715, %v174_v57  ;;  %v175_v60 = vmul.f32 %v173_v58, %v169_v55 }
 0x22a   :  { %v178_v61 = vadd.f32 %v176_v59, %v166_v51  ;;  %v177_v62 = vmul.f32 0.044715, %v175_v60 }
 0x22c   :  { %v180_v63 = vmul.f32 0.7978846, %v178_v61  ;;  %v179_v0 = vadd.f32 %v177_v62, %v169_v55 }
 0x22e   :  { %467 = vtanh.f32 %v180_v63  ;;  %v181_v1 = vmul.f32 0.7978846, %v179_v0 }
 0x230   :  { %469 = vtanh.f32 %v181_v1 }
 0x238   :  { %v468_v2 = vpop.eup %467 }
 0x239   :  { %v184_v3 = vadd.f32 1.0, %v468_v2 }
 0x23a   :  { %v470_v4 = vpop.eup %469 }
 0x23b   :  { %v185_v5 = vadd.f32 1.0, %v470_v4  ;;  %v186_v6 = vmul.f32 0.5, %v184_v3 }
 0x23d   :  { %v187_v7 = vmul.f32 0.5, %v185_v5  ;;  %v188_v8 = vmul.f32 %v186_v6, %v166_v51 }
 0x23f   :  { %v189_v9 = vmul.f32 %v187_v7, %v169_v55 }
 0x241   :  { %v192_v10 = vpack.c.bf16 %v189_v9, %v188_v8 }
 0x243   :  { %445 = vmatmul.mubr.bf16.vlgmr.msra.gmra.mrb[0].mxu1 %v192_v10 }
 0x316   :  { %v291_v12 = vpop.f32.mrb[0].mxu1 }
 0x317   :  { %v298_v14 = vadd.f32 %v291_v12, %v190_v11  ;;  %v446_v15 = vpop.f32.mrb[1].mxu1 }
 0x318   :  { %v294_v16 = vpop.f32.mrb[2].mxu1 }
 0x319   :  { %300 = vst.msk [vmem:[#allocation4] sm:$0xff] %vm51_vm0, %v298_v14  ;;  %v299_v17 = vadd.f32 %v294_v16, %v191_v13  ;;  %v447_v18 = vpop.f32.mrb[3].mxu1 }
 0x31b   :  { %301 = vst.msk [vmem:[#allocation4 + $0x8] sm:$0xff] %vm51_vm0, %v299_v17 }
 0x320   :  { %v307_v20 = vld [vmem:[#allocation4] sm:$0xff] }
 0x321   :  { %v309_v22 = vadd.f32 %v307_v20, %v305_v19 }
 0x322   :  { %v308_v24 = vld [vmem:[#allocation4 + $0x8] sm:$0xff] }
 0x323   :  { %v318_v25 = vadd.f32 %v397_v21, %v309_v22  ;;  %v310_v26 = vadd.f32 %v308_v24, %v306_v23 }
 0x325   :  { %v320_v27 = vsel %vm51_vm0, %v318_v25, 0.0  ;;  %v319_v28 = vadd.f32 %v397_v21, %v310_v26 }
 0x326   :  { %321 = vadd.xlane.f32.xlu0 %v320_v27 }
 0x327   :  { %v323_v29 = vsel %vm51_vm0, %v319_v28, 0.0 }
 0x328   :  { %324 = vadd.xlane.f32.xlu1 %v323_v29 }
 0x3b3   :  { %v322_v30 = vpop.xlane.xlu0 %321 }
 0x3b4   :  { %v327_v31 = vmul.f32 0.03125, %v322_v30 }
 0x3b5   :  { %v325_v32 = vpop.xlane.xlu1 %324 }
 0x3b6   :  { %v329_v33 = vsub.f32 %v318_v25, %v327_v31  ;;  %v328_v34 = vmul.f32 0.03125, %v325_v32 }
 0x3b8   :  { %v330_v35 = vsub.f32 %v319_v28, %v328_v34  ;;  %v331_v36 = vmul.f32 %v329_v33, %v329_v33 }
 0x3ba   :  { %v333_v37 = vsel %vm51_vm0, %v331_v36, 0.0  ;;  %v332_v38 = vmul.f32 %v330_v35, %v330_v35 }
 0x3bb   :  { %334 = vadd.xlane.f32.xlu0 %v333_v37 }
 0x3bc   :  { %v336_v39 = vsel %vm51_vm0, %v332_v38, 0.0 }
 0x3bd   :  { %337 = vadd.xlane.f32.xlu1 %v336_v39 }
 0x448   :  { %v335_v40 = vpop.xlane.xlu0 %334 }
 0x449   :  { %v339_v41 = vmul.f32 0.03125, %v335_v40 }
 0x44a   :  { %v338_v42 = vpop.xlane.xlu1 %337 }
 0x44b   :  { %v341_v43 = vadd.f32 1e-05, %v339_v41  ;;  %v340_v44 = vmul.f32 0.03125, %v338_v42 }
 0x44d   :  { %471 = vrsqrt.f32 %v341_v43  ;;  %v342_v45 = vadd.f32 1e-05, %v340_v44 }
 0x44f   :  { %473 = vrsqrt.f32 %v342_v45 }
 0x457   :  { %v472_v46 = vpop.eup %471 }
 0x458   :  { %v345_v48 = vmul.f32 %v472_v46, %v329_v33 }
 0x459   :  { %v474_v49 = vpop.eup %473 }
 0x45a   :  { %v346_v51 = vmul.f32 %v474_v49, %v330_v35  ;;  %v354_v52 = vmul.f32 %v398_v47, %v345_v48 }
 0x45c   :  { %v355_v53 = vmul.f32 %v398_v47, %v346_v51  ;;  %v363_v54 = vadd.f32 %v399_v50, %v354_v52 }
 0x45e   :  { %v364_v55 = vadd.f32 %v399_v50, %v355_v53  ;;  %365 = vst.msk [vmem:[#allocation5] sm:$0xff] %vm51_vm0, %v363_v54 }
 0x460   :  { %366 = vst.msk [vmem:[#allocation5 + $0x8] sm:$0xff] %vm51_vm0, %v364_v55 }
 0x461   :  { %486 = shalt.err (!%p483_p4)
}
 0x462   :  { %s487_s21 = scalar_lea.hbm %s653_s10, 256 }
 0x463   :  { %p488_p5 = scmp.ne.s32.totalorder %s653_s10, %s487_s21  ;;  %p491_p6 = scmp.lt.u32.totalorder %s487_s21, %s653_s10 }
 0x465   :  { %p493_p7 = pnand %p491_p6, %p488_p5 }
 0x467   :  { %496 = shalt.err (!%p493_p7)
}
 0x468   :  { %s502_s24 = smov 128   ;;  %s503_s25 = smov 8  }
 0x469   :  { %378 = dma.vmem_to_hbm [thread:$0]  %s373_s20, 256, %s653_s10, [#allocation6], %s502_s24, %s502_s24, %s503_s25  }
 0x46a   :  { %497 = dma.done.wait [#allocation6], 256  }
 0x46b   :  { %498 = vsyncadd [#allocation6], 4294967040 }
 0x46c   :  { %382 = vsyncpa [#allocation6], 1 }

// kernel: edge_decoder_block.4
= control target key start
LH: loop header
LB: loop body
LE: loop exit
PB: predicated region body
PF: predicated region fallthrough
CT: control target
= control target key end

     0   :  { %s2132_s17 = smov 0   ;;  %s2345_s0 = inlined_call_operand.vmem [shape: f32[2,8,32], index: 0, kind: input, shape index: {}]   ;;  %s2346_s1 = inlined_call_operand.vmem [shape: s32[2,8,1], index: 1, kind: input, shape index: {}]   ;;  %s2347_s2 = inlined_call_operand.vmem [shape: bf16[32,32], index: 2, kind: input, shape index: {}]   ;;  %s2348_s3 = inlined_call_operand.vmem [shape: bf16[32,32], index: 3, kind: input, shape index: {}]   ;;  %s2349_s4 = inlined_call_operand.vmem [shape: f32[1,32], index: 4, kind: input, shape index: {}]   ;;  %s2350_s5 = inlined_call_operand.vmem [shape: bf16[32,96], index: 5, kind: input, shape index: {}]   ;;  %s2351_s6 = inlined_call_operand.vmem [shape: f32[1,96], index: 6, kind: input, shape index: {}]   ;;  %s2352_s7 = inlined_call_operand.vmem [shape: bf16[32,32], index: 7, kind: input, shape index: {}]   ;;  %s2353_s8 = inlined_call_operand.vmem [shape: f32[1,32], index: 8, kind: input, shape index: {}]   ;;  %s2354_s9 = inlined_call_operand.vmem [shape: f32[2,1,8], index: 9, kind: input, shape index: {}]   ;;  %s2355_s10 = inlined_call_operand.vmem [shape: bf16[2,8,32], index: 10, kind: output, shape index: {0}]   ;;  %s2356_s11 = inlined_call_operand.vmem [shape: bf16[2,8,32], index: 11, kind: output, shape index: {1}]  }
   0x1 LB: > { %s1841_s18 = sadd.s32 4294967295, %s2051_s17   ;;  %p1845_p0 = scmp.ge.s32.totalorder %s2051_s17, 1  ;;  %s2051_s17 = sphi %s2132_s17, %s22_s17  }
   0x2   : > { %p356_p1 = scmp.lt.s32.totalorder %s2051_s17, 3 }
   0x4   : > { %p357_p2 = pnand %p1845_p0, %p356_p1 }
   0x5   : > { %p405_p3 = scmp.lt.s32.totalorder (!%p357_p2), %s1841_s18, 1  ;;  %v2053_v0 = vmov (!%p357_p2), 0   ;;  %v2054_v1 = vmov (!%p357_p2), 0.0   ;;  %vm2055_vm0 = vmmov (!%p357_p2), 0   ;;  %v2021_v4 = vld [vmem:[%s2348_s3] sm:$0xff] (!%p357_p2)   ;;  %v2023_v5 = vld [vmem:[%s2348_s3 + $0x8] sm:$0xff] (!%p357_p2)   ;;  %v427_v6 = vlaneseq (!%p357_p2) }
   0x6   : > { %360 = sbr.rel (%p357_p2) target bundleno = 2081 (0x821), region = 60  ;;  %2020 = vset.pattern.permute.xlu0 (!%p357_p2), %v2053_v0  ;;  %1908 = vmatprep.subr.mxu0 (!%p357_p2), %v2054_v1  ;;  %vm435_vm1 = vcmask (!%p357_p2), 64512   ;;  %v2022_v9 = vld [vmem:[%s2347_s2] sm:$0xff] (!%p357_p2)   ;;  %v2024_v12 = vld [vmem:[%s2347_s2 + $0x8] sm:$0xff] (!%p357_p2)   ;;  %vm531_vm3 = vcmask (!%p357_p2), 261120   ;;  %vm639_vm4 = vcmask (!%p357_p2), 257024  }
   0x7   : > { %1913 = vmatprep.subr.bf16.mxu1 (!%p357_p2), %v2054_v1  ;;  %1910 = vmatprep.mubr.msk.f32.mxu0 (!%p357_p2), %vm2055_vm0, %v2054_v1  ;;  %v428_v7 = vand.u32 (!%p357_p2), 127, %v427_v6  ;;  %v2025_v18 = vld [vmem:[%s2350_s5] sm:$0xff] (!%p357_p2)   ;;  %v2026_v21 = vld [vmem:[%s2350_s5 + $0x8] sm:$0xff] (!%p357_p2)   ;;  %s2056_s29 = smov (!%p357_p2), 112   ;;  %s2057_s30 = smov (!%p357_p2), 120   ;;  %v743_v46 = vshrl.u32 (!%p357_p2), %v427_v6, 7 }
   0x8   : > { %1917 = vmatprep.mubr.msk.bf16.mxu1 (!%p357_p2), %vm2055_vm0, %v2054_v1  ;;  %1914 = vmatpush3.bf16.msra.mxu1 (!%p357_p2), %v2021_v4  ;;  %v1858_v23 = vld [vmem:[%s2349_s4] ss:$0 sm:$0xff] (!%p357_p2)  ;;  %s2058_s12 = smov (!%p357_p2), 104   ;;  %s2059_s13 = smov (!%p357_p2), 96   ;;  %v2067_v41 = vmov (!%p357_p2), 1983009808  }
   0x9   : > { %1915 = vmatprep.subr.bf16.mxu1 (!%p357_p2), %v2054_v1  ;;  %v1859_v30 = vld [vmem:[%s2351_s6] ss:$0 sm:$0xff] (!%p357_p2)  ;;  %s2060_s14 = smov (!%p357_p2), 88   ;;  %s2061_s15 = smov (!%p357_p2), 80   ;;  %v740_v42 = vunpack.c.l.s4 (!%p357_p2), %v2067_v41  ;;  %v2068_v47 = vmov (!%p357_p2), 1934713408  }
   0xa   : > { %s2062_s16 = smov (!%p357_p2), 72   ;;  %s2064_s20 = smov (!%p357_p2), 56   ;;  %v773_v48 = vunpack.c.l.s4 (!%p357_p2), %v2068_v47  ;;  %vm1310_vm5 = vcmask (!%p357_p2), 1043456   ;;  %vm1663_vm6 = vcmask (!%p357_p2), 130048   ;;  %vm1666_vm7 = vcmask (!%p357_p2), 195584  }
   0xb   : > { %s2065_s21 = smov (!%p357_p2), 48   ;;  %v741_v45 = vunpack.c.0.s8 (!%p357_p2), %v740_v42 }
   0xc   : > { %1916 = vmatpush3.bf16.msra.mxu1 (!%p357_p2), %v2023_v5  ;;  %v774_v54 = vunpack.c.0.s8 (!%p357_p2), %v773_v48 }
   0xd   : > { %s2358_s18 = smov (!%p405_p3, %s1841_s18), 1  ;;  %1929 = vmatprep.subr.bf16.mxu1 %v2054_v1  ;;  %v2209_v52 = vsub.s32 %v741_v45, %v743_v46 }
   0xe   : > { %s1846_s19 = sshll.u32 %s2358_s18, 3  ;;  %s1848_s23 = sshll.u32 %s2358_s18, 2  ;;  %v2215_v63 = vsub.s32 %v774_v54, %v743_v46 }
   0xf   : > { %s412_s22 = scalar_lea.vmem %s2346_s1, %s1846_s19  ;;  %s408_s25 = scalar_lea.vmem %s2345_s0, %s1846_s19 }
  0x10   : > { %v426_v2 = vld [vmem:[%s412_s22] sm:$0xff]  ;;  %s419_s26 = scalar_lea.vmem %s2355_s10, %s1848_s23  ;;  %s2063_s19 = smov 64  }
  0x11   : > { %430 = vperm.xlu0 %2020, %v426_v2   ;;  %v425_v3 = vld [vmem:[%s408_s25] sm:$0xff]  ;;  %s2066_s22 = smov 40  }
  0x12   : > { %1909 = vmatpush3.msra.mxu0 %v425_v3  ;;  %v509_v11 = vpack.c.bf16 %v425_v3, %v425_v3 }
  0x13   : > { %1921 = vmatprep.subr.bf16.mxu0 %v2054_v1 }
  0x14   : > { %1918 = vmatmul.mubr.msk.bf16.vlgmr.msra.gmra.mrb[0].mxu1 %vm531_vm3, %v509_v11 }
  0x15   : > { %1933 = vmatprep.mubr.msk.bf16.mxu1 %vm2055_vm0, %v2054_v1  ;;  %1930 = vmatpush3.bf16.msra.mxu1 %v2025_v18 }
  0x16   : > { %1931 = vmatprep.subr.bf16.mxu1 %v2054_v1 }
  0x19   : > { %1932 = vmatpush3.bf16.msra.mxu1 %v2026_v21 }
  0x1a   : > { %1943 = vmatprep.subr.bf16.mxu1 %v2054_v1 }
  0x90   : > { %v431_v8 = vpop.permute.xlu0 %430 }
  0x91   : > { %vm432_vm2 = vcmp.eq.s32.totalorder %v428_v7, %v431_v8 }
  0x92   : > { %v1850_v10 = vsel %vm432_vm2, 1.0, %v2054_v1 }
  0x93   : > { %1911 = vmatmul.mubr.msk.f32.vlgmr.msra.gmra.mrb[0].mxu0 %vm435_vm1, %v1850_v10 }
  0x94   : > { %1922 = vmatpush3.bf16.msra.mxu0 %v2022_v9  ;;  %1925 = vmatprep.mubr.msk.bf16.mxu0 %vm2055_vm0, %v2054_v1 }
  0x95   : > { %1923 = vmatprep.subr.bf16.mxu0 %v2054_v1 }
  0x98   : > { %1924 = vmatpush3.bf16.msra.mxu0 %v2024_v12 }
  0x99   : > { %1937 = vmatprep.subr.bf16.mxu0 %v2054_v1 }
  0xe7   : > { %v569_v16 = vpop.f32.mrb[0].mxu1 }
  0xe8   : > { %v1919_v17 = vpop.f32.mrb[1].mxu1 }
  0xe9   : > { %v572_v19 = vpop.f32.mrb[2].mxu1 }
  0xea   : > { %v1920_v20 = vpop.f32.mrb[3].mxu1 }
 0x166   : > { %v505_v13 = vpop.f32.mrb[0].mxu0 }
 0x167   : > { %v510_v14 = vpack.c.bf16 %v505_v13, %v505_v13  ;;  %v1912_v15 = vpop.f32.mrb[1].mxu0 }
 0x169   : > { %1926 = vmatmul.mubr.msk.bf16.vlgmr.msra.gmra.mrb[4].mxu0 %vm531_vm3, %v510_v14 }
 0x16a   : > { %1939 = vmatprep.mubr.msk.bf16.mxu0 %vm2055_vm0, %v2054_v1 }
 0x23c   : > { %v624_v22 = vpop.f32.mrb[4].mxu0 }
 0x23d   : > { %v625_v24 = vadd.f32 %v624_v22, %v569_v16  ;;  %v1927_v25 = vpop.f32.mrb[5].mxu0 }
 0x23e   : > { %v627_v26 = vpop.f32.mrb[6].mxu0 }
 0x23f   : > { %v637_v27 = vadd.f32 %v1858_v23, %v625_v24  ;;  %v1928_v28 = vpop.f32.mrb[7].mxu0 }
 0x241   : > { %v638_v29 = vpack.c.bf16 %v637_v27, %v637_v27 }
 0x243   : > { %640 = vst.msk [vmem:[%s419_s26] sm:$0xf] %vm639_vm4, %v638_v29  ;;  %1934 = vmatmul.mubr.msk.bf16.vlgmr.msra.gmra.mrb[4].mxu1 %vm531_vm3, %v638_v29  ;;  %s415_s26 = scalar_lea.vmem %s2354_s9, %s2358_s18 }
 0x244   : > { %1945 = vmatprep.mubr.msk.bf16.mxu1 %vm2055_vm0, %v2054_v1 }
 0x316   : > { %v701_v31 = vpop.f32.mrb[4].mxu1 }
 0x317   : > { %v702_v32 = vadd.f32 %v1859_v30, %v701_v31  ;;  %v1935_v33 = vpop.f32.mrb[5].mxu1 }
 0x318   : > { %v704_v34 = vpop.f32.mrb[6].mxu1 }
 0x319   : > { %v707_v35 = vpack.c.bf16 %v702_v32, %v702_v32  ;;  %v1936_v36 = vpop.f32.mrb[7].mxu1 }
 0x31b   : > { %712 = vrot.lane.b32.xlu1 %v707_v35, %s2056_s29  ;;  %709 = vrot.lane.b32.xlu0 %v707_v35, %s2057_s30 }
 0x31f   : > { %715 = vrot.lane.b32.xlu1 %v707_v35, %s2058_s12  ;;  %718 = vrot.lane.b32.xlu0 %v707_v35, %s2059_s13  ;;  %s2069_s12 = smov 8   ;;  %s2070_s13 = smov 16  }
 0x323   : > { %721 = vrot.lane.b32.xlu1 %v707_v35, %s2060_s14  ;;  %724 = vrot.lane.b32.xlu0 %v707_v35, %s2061_s15  ;;  %s2071_s14 = smov 24  }
 0x327   : > { %727 = vrot.lane.b32.xlu1 %v707_v35, %s2062_s16  ;;  %730 = vrot.lane.b32.xlu0 %v707_v35, %s2063_s19 }
 0x32b   : > { %732 = vrot.lane.b32.xlu1 %v707_v35, %s2064_s20  ;;  %734 = vrot.lane.b32.xlu0 %v707_v35, %s2065_s21  ;;  %s423_s21 = scalar_lea.vmem %s2356_s11, %s1848_s23 }
 0x32f   : > { %736 = vrot.lane.b32.xlu1 %v707_v35, %s2066_s22 }
 0x38d   : > { %v713_v37 = vpop.permute.xlu1 %712  ;;  %v710_v38 = vpop.permute.xlu0 %709 }
 0x391   : > { %v716_v39 = vpop.permute.xlu1 %715  ;;  %v719_v40 = vpop.permute.xlu0 %718 }
 0x392   : > { %v738_v53 = vcombine.low %v707_v35, %v719_v40 }
 0x394   : > { %v745_v60 = vrot.slane %v738_v53, %v2209_v52 }
 0x395   : > { %v722_v43 = vpop.permute.xlu1 %721  ;;  %v725_v44 = vpop.permute.xlu0 %724 }
 0x396   : > { %v746_v49 = vcombine.low %v713_v37, %v725_v44  ;;  %v806_v57 = vcombine.low %v710_v38, %v722_v43 }
 0x398   : > { %v753_v56 = vrot.slane %v746_v49, %v2209_v52  ;;  %v813_v7 = vrot.slane %v806_v57, %v2209_v52 }
 0x399   : > { %v728_v50 = vpop.permute.xlu1 %727  ;;  %v731_v51 = vpop.permute.xlu0 %730 }
 0x39a   : > { %v814_v55 = vcombine.low %v716_v39, %v728_v50  ;;  %v761_v61 = vrot.slane %v731_v51, %v2209_v52  ;;  %v770_v3 = vcombine.low %v745_v60, %v753_v56  ;;  %v771_v4 = vcombine.high %v745_v60, %v753_v56 }
 0x39c   : > { %v821_v2 = vrot.slane %v814_v55, %v2209_v52  ;;  %v778_v15 = vrot.slane %v770_v3, %v2215_v63  ;;  %v785_v16 = vrot.slane %v771_v4, %v2215_v63 }
 0x39d   : > { %v733_v58 = vpop.permute.xlu1 %732  ;;  %v735_v59 = vpop.permute.xlu0 %734 }
 0x39e   : > { %v769_v62 = vrot.slane %v735_v59, %v2209_v52  ;;  %v838_v12 = vcombine.low %v813_v7, %v821_v2  ;;  %v839_v13 = vcombine.high %v813_v7, %v821_v2  ;;  %v829_v14 = vrot.slane %v733_v58, %v2209_v52 }
 0x3a0   : > { %v786_v5 = vcombine.low %v761_v61, %v769_v62  ;;  %v787_v6 = vcombine.high %v761_v61, %v769_v62  ;;  %v846_v23 = vrot.slane %v838_v12, %v2215_v63  ;;  %v853_v24 = vrot.slane %v839_v13, %v2215_v63 }
 0x3a1   : > { %v737_v8 = vpop.permute.xlu1 %736 }
 0x3a2   : > { %v794_v9 = vrot.slane %v786_v5, %v2215_v63  ;;  %v801_v10 = vrot.slane %v787_v6, %v2215_v63  ;;  %v837_v11 = vrot.slane %v737_v8, %v2209_v52 }
 0x3a4   : > { %v854_v17 = vcombine.low %v829_v14, %v837_v11  ;;  %v855_v18 = vcombine.high %v829_v14, %v837_v11  ;;  %v802_v19 = vcombine.low %v778_v15, %v794_v9  ;;  %v803_v20 = vcombine.high %v778_v15, %v794_v9 }
 0x3a5   : > { %v804_v21 = vcombine.low %v785_v16, %v801_v10  ;;  %v805_v22 = vcombine.high %v785_v16, %v801_v10 }
 0x3a6   : > { %v862_v25 = vrot.slane %v854_v17, %v2215_v63  ;;  %v869_v26 = vrot.slane %v855_v18, %v2215_v63  ;;  %v878_v31 = vshrl.u32 %v802_v19, 16  ;;  %v886_v32 = vshrl.u32 %v803_v20, 16 }
 0x3a7   : > { %v894_v33 = vshrl.u32 %v804_v21, 16  ;;  %v902_v34 = vshrl.u32 %v805_v22, 16 }
 0x3a8   : > { %v870_v27 = vcombine.low %v846_v23, %v862_v25  ;;  %v871_v28 = vcombine.high %v846_v23, %v862_v25  ;;  %v872_v29 = vcombine.low %v853_v24, %v869_v26  ;;  %v873_v30 = vcombine.high %v853_v24, %v869_v26 }
 0x3aa   : > { %v876_v35 = vpack.i.b16 %v870_v27, %v802_v19  ;;  %v879_v36 = vshrl.u32 %v870_v27, 16  ;;  %v884_v37 = vpack.i.b16 %v871_v28, %v803_v20  ;;  %v887_v38 = vshrl.u32 %v871_v28, 16 }
 0x3ab   : > { %v892_v39 = vpack.i.b16 %v872_v29, %v804_v21  ;;  %v895_v40 = vshrl.u32 %v872_v29, 16  ;;  %v900_v41 = vpack.i.b16 %v873_v30, %v805_v22  ;;  %v903_v42 = vshrl.u32 %v873_v30, 16 }
 0x3ac   : > { %v880_v43 = vpack.i.b16 %v879_v36, %v878_v31  ;;  %v888_v44 = vpack.i.b16 %v887_v38, %v886_v32 }
 0x3ad   : > { %v896_v45 = vpack.i.b16 %v895_v40, %v894_v33  ;;  %v904_v46 = vpack.i.b16 %v903_v42, %v902_v34  ;;  %v906_v47 = vcombine.low %v876_v35, %v892_v39  ;;  %v907_v48 = vcombine.high %v876_v35, %v892_v39 }
 0x3ae   : > { %v922_v49 = vcombine.low %v884_v37, %v900_v41  ;;  %v923_v50 = vcombine.high %v884_v37, %v900_v41 }
 0x3af   : > { %v914_v51 = vrot.slane %v906_v47, %v2209_v52  ;;  %v965_v53 = vcombine.low %v880_v43, %v896_v45  ;;  %v966_v54 = vcombine.high %v880_v43, %v896_v45  ;;  %v981_v56 = vcombine.low %v888_v44, %v904_v46 }
 0x3b0   : > { %v930_v55 = vrot.slane %v922_v49, %v2209_v52  ;;  %v982_v57 = vcombine.high %v888_v44, %v904_v46  ;;  %v921_v58 = vrot.slane %v907_v48, %v2209_v52  ;;  %v937_v59 = vrot.slane %v923_v50, %v2209_v52 }
 0x3b1   : > { %v973_v60 = vrot.slane %v965_v53, %v2209_v52  ;;  %v980_v61 = vrot.slane %v966_v54, %v2209_v52  ;;  %v989_v2 = vrot.slane %v981_v56, %v2209_v52 }
 0x3b2   : > { %v939_v62 = vcombine.high %v914_v51, %v930_v55  ;;  %v996_v3 = vrot.slane %v982_v57, %v2209_v52  ;;  %v954_v6 = vcombine.low %v921_v58, %v937_v59  ;;  %v938_v10 = vcombine.low %v914_v51, %v930_v55  ;;  %v1867_v55 = vld [vmem:[%s415_s26] ss:$0 sm:$0xff] }
 0x3b3   : > { %v998_v5 = vcombine.high %v973_v60, %v989_v2  ;;  %v997_v8 = vcombine.low %v973_v60, %v989_v2 }
 0x3b4   : > { %v953_v4 = vrot.slane %v939_v62, %v2215_v63  ;;  %v1013_v7 = vcombine.low %v980_v61, %v996_v3  ;;  %v961_v15 = vrot.slane %v954_v6, %v2215_v63  ;;  %v946_v22 = vrot.slane %v938_v10, %v2215_v63 }
 0x3b5   : > { %v1012_v9 = vrot.slane %v998_v5, %v2215_v63  ;;  %v1005_v19 = vrot.slane %v997_v8, %v2215_v63 }
 0x3b6   : > { %v1039_v12 = vshrl.u32 %v953_v4, 16  ;;  %v1020_v16 = vrot.slane %v1013_v7, %v2215_v63  ;;  %v963_v20 = vcombine.high %v953_v4, %v2053_v0  ;;  %v964_v24 = vcombine.high %v961_v15, %v2053_v0 }
 0x3b7   : > { %v1038_v11 = vpack.i.b16 %v1012_v9, %v953_v4  ;;  %v1040_v13 = vshrl.u32 %v1012_v9, 16  ;;  %v1022_v14 = vcombine.high %v1012_v9, %v2053_v0  ;;  %v1028_v27 = vshrl.u32 %v1005_v19, 16 }
 0x3b8   : > { %v1023_v25 = vcombine.high %v1020_v16, %v2053_v0  ;;  %v1045_v28 = vshrl.u32 %v963_v20, 16  ;;  %v1057_v30 = vshrl.u32 %v964_v24, 16  ;;  %v1026_v32 = vpack.i.b16 %v1005_v19, %v946_v22 }
 0x3b9   : > { %v1064_v17 = vsel %vm435_vm1, %v1038_v11, 0  ;;  %v1041_v18 = vpack.i.b16 %v1040_v13, %v1039_v12  ;;  %v1046_v23 = vshrl.u32 %v1022_v14, 16  ;;  %v1044_v26 = vpack.i.b16 %v1022_v14, %v963_v20 }
 0x3ba   : > { %1938 = vmatpush3.bf16.xpose.msra.mxu0 %v1064_v17  ;;  %v1056_v29 = vpack.i.b16 %v1023_v25, %v964_v24  ;;  %v1058_v31 = vshrl.u32 %v1023_v25, 16  ;;  %v1027_v33 = vshrl.u32 %v946_v22, 16  ;;  %v1021_v39 = vcombine.high %v1005_v19, %v2053_v0 }
 0x3bb   : > { %v1110_v21 = vsel %vm435_vm1, %v1041_v18, 0  ;;  %1949 = vmatprep.subr.bf16.mxu0 %v2054_v1  ;;  %v1047_v34 = vpack.i.b16 %v1046_v23, %v1045_v28  ;;  %v1156_v37 = vsel %vm435_vm1, %v1044_v26, 0  ;;  %v962_v42 = vcombine.high %v946_v22, %v2053_v0 }
 0x3bc   : > { %1944 = vmatpush3.bf16.xpose.msra.mxu1 %v1110_v21  ;;  %v2252_v35 = vsel %vm1310_vm5, %v1056_v29, 0  ;;  %v1059_v36 = vpack.i.b16 %v1058_v31, %v1057_v30  ;;  %v1029_v38 = vpack.i.b16 %v1028_v27, %v1027_v33  ;;  %v1052_v43 = vshrl.u32 %v1020_v16, 16 }
 0x3bd   : > { %1955 = vmatprep.subr.bf16.mxu1 %v2054_v1  ;;  %v1202_v41 = vsel %vm435_vm1, %v1047_v34, 0  ;;  %v1050_v44 = vpack.i.b16 %v1020_v16, %v961_v15  ;;  %v1034_v45 = vshrl.u32 %v1021_v39, 16  ;;  %v1051_v46 = vshrl.u32 %v961_v15, 16 }
 0x3be   : > { %v2260_v40 = vsel %vm1310_vm5, %v1059_v36, 0  ;;  %v1032_v47 = vpack.i.b16 %v1021_v39, %v962_v42  ;;  %v1033_v48 = vshrl.u32 %v962_v42, 16 }
 0x3bf   : > { %v1053_v49 = vpack.i.b16 %v1052_v43, %v1051_v46  ;;  %v1312_v50 = vsel %vm1310_vm5, %v1050_v44, 0 }
 0x3c0   : > { %v1035_v51 = vpack.i.b16 %v1034_v45, %v1033_v48 }
 0x3c1   : > { %1940 = vmatmul.mubr.msk.bf16.vlgmr.msra.gmra.mrb[8].mxu0 %vm435_vm1, %v1026_v32  ;;  %v1358_v53 = vsel %vm1310_vm5, %v1053_v49, 0 }
 0x3c2   : > { %1950 = vmatpush3.bf16.xpose.msra.mxu0 %v1156_v37  ;;  %1951 = vmatprep.mubr.msk.bf16.mxu0 %vm2055_vm0, %v2054_v1 }
 0x3c3   : > { %1946 = vmatmul.mubr.msk.bf16.vlgmr.msra.gmra.mrb[8].mxu1 %vm435_vm1, %v1029_v38  ;;  %1961 = vmatprep.subr.bf16.mxu0 %v2054_v1 }
 0x3c4   : > { %1956 = vmatpush3.bf16.xpose.msra.mxu1 %v1202_v41  ;;  %1957 = vmatprep.mubr.msk.bf16.mxu1 %vm2055_vm0, %v2054_v1 }
 0x3c5   : > { %1967 = vmatprep.subr.bf16.mxu1 %v2054_v1 }
 0x3c9   : > { %1952 = vmatmul.mubr.msk.bf16.vlgmr.msra.gmra.mrb[12].mxu0 %vm435_vm1, %v1032_v47 }
 0x3ca   : > { %1962 = vmatpush3.bf16.msra.mxu0 %v1312_v50  ;;  %1963 = vmatprep.mubr.msk.bf16.mxu0 %vm2055_vm0, %v2054_v1 }
 0x3cb   : > { %1958 = vmatmul.mubr.msk.bf16.vlgmr.msra.gmra.mrb[12].mxu1 %vm435_vm1, %v1035_v51  ;;  %1973 = vmatprep.subr.bf16.mxu0 %v2054_v1 }
 0x3cc   : > { %1968 = vmatpush3.bf16.msra.mxu1 %v1358_v53  ;;  %1969 = vmatprep.mubr.msk.bf16.mxu1 %vm2055_vm0, %v2054_v1 }
 0x3cd   : > { %1979 = vmatprep.subr.bf16.mxu1 %v2054_v1 }
 0x494   : > { %v1100_v54 = vpop.f32.mrb[8].mxu0 }
 0x495   : > { %v1244_v56 = vmul.f32 0.35355338, %v1100_v54  ;;  %v1941_v57 = vpop.f32.mrb[9].mxu0 }
 0x496   : > { %v1103_v58 = vpop.f32.mrb[10].mxu0  ;;  %v1146_v59 = vpop.f32.mrb[8].mxu1 }
 0x497   : > { %v1245_v60 = vmul.f32 0.35355338, %v1146_v59  ;;  %v1942_v61 = vpop.f32.mrb[11].mxu0  ;;  %v1947_v62 = vpop.f32.mrb[9].mxu1  ;;  %v1255_v2 = vadd.f32 %v1867_v55, %v1244_v56 }
 0x498   : > { %v1149_v3 = vpop.f32.mrb[10].mxu1 }
 0x499   : > { %v1948_v4 = vpop.f32.mrb[11].mxu1  ;;  %v1259_v5 = vsel %vm435_vm1, %v1255_v2, -inf  ;;  %v1256_v6 = vadd.f32 %v1867_v55, %v1245_v60  ;;  %v2027_v60 = vld [vmem:[%s2352_s7] sm:$0xff]  }
 0x49a   : > { %1260 = vmax.xlane.f32.xlu0 %v1259_v5 }
 0x49b   : > { %v1262_v7 = vsel %vm435_vm1, %v1256_v6, -inf }
 0x49c   : > { %1263 = vmax.xlane.f32.xlu1 %v1262_v7  ;;  %v1192_v8 = vpop.f32.mrb[12].mxu0 }
 0x49d   : > { %v1246_v9 = vmul.f32 0.35355338, %v1192_v8  ;;  %v1953_v10 = vpop.f32.mrb[13].mxu0 }
 0x49e   : > { %v1195_v11 = vpop.f32.mrb[14].mxu0  ;;  %v1238_v12 = vpop.f32.mrb[12].mxu1 }
 0x49f   : > { %v1247_v13 = vmul.f32 0.35355338, %v1238_v12  ;;  %v1954_v14 = vpop.f32.mrb[15].mxu0  ;;  %v1959_v15 = vpop.f32.mrb[13].mxu1  ;;  %v1257_v16 = vadd.f32 %v1867_v55, %v1246_v9 }
 0x4a0   : > { %v1241_v17 = vpop.f32.mrb[14].mxu1 }
 0x4a1   : > { %v1960_v18 = vpop.f32.mrb[15].mxu1  ;;  %v1265_v19 = vsel %vm435_vm1, %v1257_v16, -inf  ;;  %v1258_v20 = vadd.f32 %v1867_v55, %v1247_v13 }
 0x4a2   : > { %1266 = vmax.xlane.f32.xlu0 %v1265_v19 }
 0x4a3   : > { %v1268_v21 = vsel %vm435_vm1, %v1258_v20, -inf }
 0x4a6   : > { %1269 = vmax.xlane.f32.xlu0 %v1268_v21 }
 0x527   : > { %v1261_v22 = vpop.xlane.xlu0 %1260 }
 0x528   : > { %v1271_v23 = vsub.f32 %v1255_v2, %v1261_v22 }
 0x529   : > { %v1264_v24 = vpop.xlane.xlu1 %1263 }
 0x52a   : > { %v1275_v25 = vmul.f32 1.442695, %v1271_v23  ;;  %v1272_v26 = vsub.f32 %v1256_v6, %v1264_v24 }
 0x52c   : > { %2029 = vpow2.f32 %v1275_v25  ;;  %v1277_v27 = vmul.f32 1.442695, %v1272_v26 }
 0x52e   : > { %2031 = vpow2.f32 %v1277_v27 }
 0x52f   : > { %v1267_v28 = vpop.xlane.xlu0 %1266 }
 0x530   : > { %v1273_v29 = vsub.f32 %v1257_v16, %v1267_v28 }
 0x532   : > { %v1279_v30 = vmul.f32 1.442695, %v1273_v29 }
 0x533   : > { %v1270_v31 = vpop.xlane.xlu0 %1269 }
 0x534   : > { %2033 = vpow2.f32 %v1279_v30  ;;  %v1274_v32 = vsub.f32 %v1258_v20, %v1270_v31 }
 0x536   : > { %v2030_v33 = vpop.eup %2029  ;;  %v1281_v34 = vmul.f32 1.442695, %v1274_v32 }
 0x537   : > { %v1283_v36 = vsel %vm435_vm1, %v2030_v33, 0.0 }
 0x538   : > { %v2032_v37 = vpop.eup %2031  ;;  %2035 = vpow2.f32 %v1281_v34  ;;  %1284 = vadd.xlane.f32.xlu1 %v1283_v36 }
 0x539   : > { %v1286_v38 = vsel %vm435_vm1, %v2032_v37, 0.0 }
 0x53a   : > { %1287 = vadd.xlane.f32.xlu0 %v1286_v38 }
 0x53e   : > { %v2034_v39 = vpop.eup %2033 }
 0x53f   : > { %v1289_v41 = vsel %vm435_vm1, %v2034_v39, 0.0 }
 0x540   : > { %1290 = vadd.xlane.f32.xlu1 %v1289_v41 }
 0x542   : > { %v2036_v42 = vpop.eup %2035 }
 0x543   : > { %v1292_v43 = vsel %vm435_vm1, %v2036_v42, 0.0 }
 0x544   : > { %1293 = vadd.xlane.f32.xlu0 %v1292_v43 }
 0x5c5   : > { %v1285_v44 = vpop.xlane.xlu1 %1284 }
 0x5c6   : > { %2037 = vrcp.f32 %v1285_v44 }
 0x5c7   : > { %v1288_v45 = vpop.xlane.xlu0 %1287 }
 0x5c8   : > { %2039 = vrcp.f32 %v1288_v45 }
 0x5cd   : > { %v1291_v46 = vpop.xlane.xlu1 %1290 }
 0x5ce   : > { %2041 = vrcp.f32 %v1291_v46 }
 0x5d0   : > { %v2038_v47 = vpop.eup %2037 }
 0x5d1   : > { %v1299_v48 = vmul.f32 %v2038_v47, %v2030_v33  ;;  %v1294_v49 = vpop.xlane.xlu0 %1293 }
 0x5d2   : > { %v2040_v50 = vpop.eup %2039  ;;  %2043 = vrcp.f32 %v1294_v49 }
 0x5d3   : > { %v1300_v51 = vmul.f32 %v2040_v50, %v2032_v37  ;;  %v1303_v53 = vpack.c.bf16 %v1299_v48, %v1299_v48 }
 0x5d5   : > { %1964 = vmatmul.mubr.msk.bf16.vlgmr.msra.gmra.mrb[16].mxu0 %vm435_vm1, %v1303_v53  ;;  %v1304_v54 = vpack.c.bf16 %v1300_v51, %v1300_v51 }
 0x5d6   : > { %1974 = vmatpush3.bf16.msra.mxu0 %v2252_v35  ;;  %1975 = vmatprep.mubr.msk.bf16.mxu0 %vm2055_vm0, %v2054_v1 }
 0x5d7   : > { %1970 = vmatmul.mubr.msk.bf16.vlgmr.msra.gmra.mrb[16].mxu1 %vm435_vm1, %v1304_v54  ;;  %1985 = vmatprep.subr.bf16.mxu0 %v2054_v1 }
 0x5d8   : > { %v2042_v55 = vpop.eup %2041  ;;  %1980 = vmatpush3.bf16.msra.mxu1 %v2260_v40  ;;  %1981 = vmatprep.mubr.msk.bf16.mxu1 %vm2055_vm0, %v2054_v1 }
 0x5d9   : > { %v1301_v56 = vmul.f32 %v2042_v55, %v2034_v39 }
 0x5db   : > { %v1305_v57 = vpack.c.bf16 %v1301_v56, %v1301_v56 }
 0x5dc   : > { %v2044_v58 = vpop.eup %2043 }
 0x5dd   : > { %v1302_v59 = vmul.f32 %v2044_v58, %v2036_v42  ;;  %1976 = vmatmul.mubr.msk.bf16.vlgmr.msra.gmra.mrb[20].mxu0 %vm435_vm1, %v1305_v57 }
 0x5de   : > { %1989 = vmatprep.mubr.msk.bf16.mxu0 %vm2055_vm0, %v2054_v1  ;;  %1986 = vmatpush3.bf16.msra.mxu0 %v2027_v60 }
 0x5df   : > { %v1306_v35 = vpack.c.bf16 %v1302_v59, %v1302_v59  ;;  %1987 = vmatprep.subr.bf16.mxu0 %v2054_v1  ;;  %v2028_v59 = vld [vmem:[%s2352_s7 + $0x8] sm:$0xff]  }
 0x5e1   : > { %1982 = vmatmul.mubr.msk.bf16.vlgmr.msra.gmra.mrb[20].mxu1 %vm435_vm1, %v1306_v35 }
 0x5e2   : > { %1988 = vmatpush3.bf16.msra.mxu0 %v2028_v59 }
 0x6a8   : > { %v1348_v40 = vpop.f32.mrb[16].mxu0 }
 0x6a9   : > { %v1965_v61 = vpop.f32.mrb[17].mxu0  ;;  %v1492_v7 = vpack.c.bf16 %v1348_v40, %v1348_v40 }
 0x6aa   : > { %v1351_v62 = vpop.f32.mrb[18].mxu0  ;;  %v1394_v2 = vpop.f32.mrb[16].mxu1 }
 0x6ab   : > { %v1966_v3 = vpop.f32.mrb[19].mxu0  ;;  %v1971_v4 = vpop.f32.mrb[17].mxu1  ;;  %v1499_v12 = vrot.slane %v1492_v7, %v2209_v52  ;;  %v1526_v15 = vpack.c.bf16 %v1394_v2, %v1394_v2 }
 0x6ac   : > { %v1397_v5 = vpop.f32.mrb[18].mxu1 }
 0x6ad   : > { %v1972_v6 = vpop.f32.mrb[19].mxu1  ;;  %v1533_v24 = vrot.slane %v1526_v15, %v2209_v52 }
 0x6b0   : > { %v1440_v8 = vpop.f32.mrb[20].mxu0 }
 0x6b1   : > { %v1500_v9 = vpack.c.bf16 %v1440_v8, %v1440_v8  ;;  %v1977_v10 = vpop.f32.mrb[21].mxu0 }
 0x6b2   : > { %v1443_v11 = vpop.f32.mrb[22].mxu0 }
 0x6b3   : > { %v1507_v13 = vrot.slane %v1500_v9, %v2209_v52  ;;  %v1978_v14 = vpop.f32.mrb[23].mxu0 }
 0x6b4   : > { %v1486_v1 = vpop.f32.mrb[20].mxu1 }
 0x6b5   : > { %v1508_v16 = vcombine.low %v1499_v12, %v1507_v13  ;;  %v1509_v17 = vcombine.high %v1499_v12, %v1507_v13  ;;  %v1534_v18 = vpack.c.bf16 %v1486_v1, %v1486_v1  ;;  %v1983_v19 = vpop.f32.mrb[21].mxu1  ;;  %v1872_v1 = vld [vmem:[%s2353_s8] ss:$0 sm:$0xff] }
 0x6b6   : > { %v1489_v20 = vpop.f32.mrb[22].mxu1 }
 0x6b7   : > { %v1516_v21 = vrot.slane %v1508_v16, %v2215_v63  ;;  %v1541_v22 = vrot.slane %v1534_v18, %v2209_v52  ;;  %v1984_v23 = vpop.f32.mrb[23].mxu1  ;;  %v1523_v25 = vrot.slane %v1509_v17, %v2215_v63 }
 0x6b9   : > { %v1542_v26 = vcombine.low %v1533_v24, %v1541_v22  ;;  %v1543_v27 = vcombine.high %v1533_v24, %v1541_v22  ;;  %v1524_v28 = vcombine.high %v1516_v21, %v2053_v0  ;;  %v1525_v31 = vcombine.high %v1523_v25, %v2053_v0 }
 0x6ba   : > { %v1564_v32 = vshrl.u32 %v1516_v21, 16  ;;  %v1580_v39 = vshrl.u32 %v1523_v25, 16 }
 0x6bb   : > { %v1550_v29 = vrot.slane %v1542_v26, %v2215_v63  ;;  %v1557_v30 = vrot.slane %v1543_v27, %v2215_v63  ;;  %v1572_v38 = vshrl.u32 %v1524_v28, 16  ;;  %v1588_v47 = vshrl.u32 %v1525_v31, 16 }
 0x6bd   : > { %v1558_v33 = vcombine.high %v1550_v29, %v2053_v0  ;;  %v1559_v34 = vcombine.high %v1557_v30, %v2053_v0  ;;  %v1562_v36 = vpack.i.b16 %v1550_v29, %v1516_v21  ;;  %v1565_v37 = vshrl.u32 %v1550_v29, 16 }
 0x6be   : > { %v1578_v41 = vpack.i.b16 %v1557_v30, %v1523_v25  ;;  %v1581_v42 = vshrl.u32 %v1557_v30, 16 }
 0x6bf   : > { %v1566_v43 = vpack.i.b16 %v1565_v37, %v1564_v32  ;;  %v1570_v44 = vpack.i.b16 %v1558_v33, %v1524_v28  ;;  %v1573_v45 = vshrl.u32 %v1558_v33, 16  ;;  %v1586_v46 = vpack.i.b16 %v1559_v34, %v1525_v31 }
 0x6c0   : > { %v1582_v48 = vpack.i.b16 %v1581_v42, %v1580_v39  ;;  %v1589_v49 = vshrl.u32 %v1559_v34, 16  ;;  %v1592_v50 = vcombine.low %v1562_v36, %v1578_v41 }
 0x6c1   : > { %v1574_v51 = vpack.i.b16 %v1573_v45, %v1572_v38  ;;  %v1600_v53 = vcombine.low %v1570_v44, %v1586_v46 }
 0x6c2   : > { %v1590_v54 = vpack.i.b16 %v1589_v49, %v1588_v47  ;;  %v1617_v55 = vcombine.low %v1566_v43, %v1582_v48  ;;  %v1599_v56 = vrot.slane %v1592_v50, %v2209_v52 }
 0x6c3   : > { %v1607_v57 = vrot.slane %v1600_v53, %v2209_v52 }
 0x6c4   : > { %v1625_v58 = vcombine.low %v1574_v51, %v1590_v54  ;;  %v1624_v60 = vrot.slane %v1617_v55, %v2209_v52 }
 0x6c5   : > { %v1608_v35 = vcombine.low %v1599_v56, %v1607_v57 }
 0x6c6   : > { %v1632_v40 = vrot.slane %v1625_v58, %v2209_v52 }
 0x6c7   : > { %v1615_v61 = vrot.slane %v1608_v35, %v2215_v63 }
 0x6c8   : > { %v1633_v62 = vcombine.low %v1624_v60, %v1632_v40 }
 0x6c9   : > { %v1616_v3 = vcombine.high %v1615_v61, %v2053_v0  ;;  %v1645_v4 = vshrl.u32 %v1615_v61, 16 }
 0x6ca   : > { %v1640_v2 = vrot.slane %v1633_v62, %v2215_v63 }
 0x6cb   : > { %v1651_v10 = vshrl.u32 %v1616_v3, 16 }
 0x6cc   : > { %v1646_v5 = vshrl.u32 %v1640_v2, 16  ;;  %v1641_v6 = vcombine.high %v1640_v2, %v2053_v0  ;;  %v1644_v7 = vpack.i.b16 %v1640_v2, %v1615_v61 }
 0x6ce   : > { %v1647_v8 = vpack.i.b16 %v1646_v5, %v1645_v4  ;;  %v1650_v9 = vpack.i.b16 %v1641_v6, %v1616_v3  ;;  %v1652_v11 = vshrl.u32 %v1641_v6, 16 }
 0x6d0   : > { %1654 = vrot.lane.b32.xlu1 %v1647_v8, %s2069_s12  ;;  %1656 = vrot.lane.b32.xlu0 %v1650_v9, %s2070_s13  ;;  %v1653_v52 = vpack.i.b16 %v1652_v11, %v1651_v10 }
 0x6d4   : > { %1658 = vrot.lane.b32.xlu1 %v1653_v52, %s2071_s14 }
 0x742   : > { %v1655_v63 = vpop.permute.xlu1 %1654  ;;  %v1657_v13 = vpop.permute.xlu0 %1656 }
 0x743   : > { %v1662_v12 = vsel %vm435_vm1, %v1644_v7, %v1655_v63 }
 0x744   : > { %v1665_v0 = vsel %vm1663_vm6, %v1662_v12, %v1657_v13 }
 0x746   : > { %v1659_v14 = vpop.permute.xlu1 %1658 }
 0x747   : > { %v1668_v15 = vsel %vm1666_vm7, %v1665_v0, %v1659_v14 }
 0x748   : > { %1990 = vmatmul.mubr.msk.bf16.vlgmr.msra.gmra.mrb[24].mxu0 %vm531_vm3, %v1668_v15 }
 0x81b   : > { %v1728_v16 = vpop.f32.mrb[24].mxu0 }
 0x81c   : > { %v1729_v17 = vadd.f32 %v1872_v1, %v1728_v16  ;;  %v1991_v18 = vpop.f32.mrb[25].mxu0 }
 0x81d   : > { %v1731_v19 = vpop.f32.mrb[26].mxu0 }
 0x81e   : > { %v1734_v20 = vpack.c.bf16 %v1729_v17, %v1729_v17  ;;  %v1992_v21 = vpop.f32.mrb[27].mxu0 }
 0x820   : > { %1735 = vst.msk [vmem:[%s423_s21] sm:$0xf] %vm639_vm4, %v1734_v20 }
 0x821 PF: > { %s22_s17 = sadd.s32 1, %s2051_s17  }
 0x822   : > { %p19_p4 = scmp.ge.s32.totalorder %s22_s17, 4  }
 0x824   :  { %21 = sbr.rel (!%p19_p4) target bundleno = 1 (0x1), region = 108 }

// kernel: edge_decoder_block.6
= control target key start
LH: loop header
LB: loop body
LE: loop exit
PB: predicated region body
PF: predicated region fallthrough
CT: control target
= control target key end

     0   :  { %s2956_s21 = smov 0   ;;  %s3357_s0 = inlined_call_operand.vmem [shape: bf16[2,8,32], index: 0, kind: input, shape index: {}]   ;;  %s3358_s1 = inlined_call_operand.vmem [shape: f32[2,8,32], index: 1, kind: input, shape index: {}]   ;;  %s3359_s2 = inlined_call_operand.vmem [shape: bf16[32,64], index: 2, kind: input, shape index: {}]   ;;  %s3360_s3 = inlined_call_operand.vmem [shape: f32[1,64], index: 3, kind: input, shape index: {}]   ;;  %s3361_s4 = inlined_call_operand.vmem [shape: bf16[32,64], index: 4, kind: input, shape index: {}]   ;;  %s3362_s5 = inlined_call_operand.vmem [shape: f32[1,64], index: 5, kind: input, shape index: {}]   ;;  %s3363_s6 = inlined_call_operand.vmem [shape: bf16[32,64], index: 6, kind: input, shape index: {}]   ;;  %s3364_s7 = inlined_call_operand.vmem [shape: f32[1,64], index: 7, kind: input, shape index: {}]   ;;  %s3365_s8 = inlined_call_operand.vmem [shape: bf16[64,32], index: 8, kind: input, shape index: {}]   ;;  %s3366_s9 = inlined_call_operand.vmem [shape: f32[1,32], index: 9, kind: input, shape index: {}]   ;;  %s3367_s10 = inlined_call_operand.vmem [shape: f32[2,1,8], index: 10, kind: input, shape index: {}]   ;;  %s3368_s11 = inlined_call_operand.vmem [shape: f32[2,1,8], index: 11, kind: input, shape index: {}]   ;;  %s3369_s12 = inlined_call_operand.vmem [shape: bf16[2,8,32], index: 12, kind: output, shape index: {}]  }
   0x1 LB: > { %s2567_s22 = sadd.s32 4294967295, %s2870_s21   ;;  %p2571_p0 = scmp.ge.s32.totalorder %s2870_s21, 1  ;;  %s2870_s21 = sphi %s2956_s21, %s22_s21  }
   0x2   : > { %p386_p1 = scmp.lt.s32.totalorder %s2870_s21, 3 }
   0x4   : > { %p387_p2 = pnand %p2571_p0, %p386_p1 }
   0x5   : > { %v2822_v0 = vld [vmem:[%s3361_s4] sm:$0xff] (!%p387_p2)   ;;  %v2872_v1 = vmov (!%p387_p2), 0.0   ;;  %v2823_v2 = vld [vmem:[%s3361_s4 + $0x8] sm:$0xff] (!%p387_p2)   ;;  %vm2873_vm0 = vmmov (!%p387_p2), 0   ;;  %p436_p3 = scmp.lt.s32.totalorder (!%p387_p2), %s2567_s22, 1  ;;  %vm481_vm1 = vcmask (!%p387_p2), 261120   ;;  %v681_v26 = vlaneseq (!%p387_p2) }
   0x6   : > { %390 = sbr.rel (%p387_p2) target bundleno = 1544 (0x608), region = 68  ;;  %2671 = vmatprep.subr.bf16.mxu1 (!%p387_p2), %v2872_v1  ;;  %2663 = vmatprep.subr.bf16.mxu0 (!%p387_p2), %v2872_v1  ;;  %v2824_v3 = vld [vmem:[%s3359_s2] sm:$0xff] (!%p387_p2)   ;;  %v2825_v4 = vld [vmem:[%s3359_s2 + $0x8] sm:$0xff] (!%p387_p2)   ;;  %s2874_s25 = smov (!%p387_p2), 104   ;;  %v2881_v24 = vmov (!%p387_p2), 1983009808  }
   0x7   : > { %2672 = vmatpush3.bf16.msra.mxu1 (!%p387_p2), %v2822_v0  ;;  %2675 = vmatprep.mubr.msk.bf16.mxu1 (!%p387_p2), %vm2873_vm0, %v2872_v1  ;;  %v2579_v8 = vld [vmem:[%s3362_s5] ss:$0 sm:$0xff] (!%p387_p2)  ;;  %s2875_s26 = smov (!%p387_p2), 120   ;;  %s2876_s29 = smov (!%p387_p2), 96   ;;  %v2827_v23 = vld [vmem:[%s3363_s6 + $0x8] sm:$0xff] (!%p387_p2)   ;;  %v679_v25 = vunpack.c.l.s4 (!%p387_p2), %v2881_v24  ;;  %v682_v30 = vshrl.u32 (!%p387_p2), %v681_v26, 7 }
   0x8   : > { %2673 = vmatprep.subr.bf16.mxu1 (!%p387_p2), %v2872_v1  ;;  %2667 = vmatprep.mubr.msk.bf16.mxu0 (!%p387_p2), %vm2873_vm0, %v2872_v1  ;;  %v2575_v19 = vld [vmem:[%s3360_s3] ss:$0 sm:$0xff] (!%p387_p2)  ;;  %s2877_s30 = smov (!%p387_p2), 112   ;;  %s2879_s15 = smov (!%p387_p2), 88   ;;  %v2882_v31 = vmov (!%p387_p2), 1934713408  }
   0x9   : > { %2664 = vmatpush3.bf16.msra.mxu0 (!%p387_p2), %v2824_v3  ;;  %s2880_s16 = smov (!%p387_p2), 72   ;;  %v2826_v22 = vld [vmem:[%s3363_s6] sm:$0xff] (!%p387_p2)   ;;  %v680_v29 = vunpack.c.0.s8 (!%p387_p2), %v679_v25  ;;  %v696_v32 = vunpack.c.l.s4 (!%p387_p2), %v2882_v31  ;;  %v2883_v56 = vmov (!%p387_p2), 0   ;;  %vm1303_vm2 = vcmask (!%p387_p2), 64512   ;;  %s2884_s24 = smov (!%p387_p2), 8  }
   0xa   : > { %2665 = vmatprep.subr.bf16.mxu0 (!%p387_p2), %v2872_v1  ;;  %vm1799_vm3 = vcmask (!%p387_p2), 1043456   ;;  %s2886_s28 = smov (!%p387_p2), 32   ;;  %s2889_s19 = smov (!%p387_p2), 24   ;;  %vm2382_vm4 = vcmask (!%p387_p2), 130048   ;;  %vm2385_vm5 = vcmask (!%p387_p2), 195584   ;;  %vm2390_vm6 = vcmask (!%p387_p2), 326656  }
   0xb   : > { %2674 = vmatpush3.bf16.msra.mxu1 (!%p387_p2), %v2823_v2  ;;  %v3044_v35 = vsub.s32 (!%p387_p2), %v680_v29, %v682_v30  ;;  %v697_v37 = vunpack.c.0.s8 (!%p387_p2), %v696_v32  ;;  %vm2393_vm7 = vcmask (!%p387_p2), 392192   ;;  %vm2396_vm8 = vcmask (!%p387_p2), 457728  }
   0xc   : > { %2687 = vmatprep.subr.bf16.mxu1 (!%p387_p2), %v2872_v1  ;;  %vm2438_vm9 = vcmask (!%p387_p2), 523264   ;;  %vm2482_vm10 = vcmask (!%p387_p2), 257024  }
   0xd   : > { %s3371_s22 = smov (!%p436_p3, %s2567_s22), 1  ;;  %2666 = vmatpush3.bf16.msra.mxu0 %v2825_v4  ;;  %v3047_v42 = vsub.s32 %v697_v37, %v682_v30 }
   0xe   : > { %s2573_s13 = sshll.u32 %s3371_s22, 3  ;;  %s2572_s14 = sshll.u32 %s3371_s22, 2  ;;  %2679 = vmatprep.subr.bf16.mxu0 %v2872_v1 }
   0xf   : > { %s443_s17 = scalar_lea.vmem %s3358_s1, %s2573_s13  ;;  %s439_s20 = scalar_lea.vmem %s3357_s0, %s2572_s14 }
  0x10   : > { %v456_v5 = vld [vmem:[%s443_s17] sm:$0xff]  ;;  %s2878_s13 = smov 80   ;;  %s446_s27 = scalar_lea.vmem %s3367_s10, %s3371_s22 }
  0x11   : > { %v457_v6 = vpack.c.bf16 %v456_v5, %v456_v5  ;;  %v455_v7 = vld [vmem:[%s439_s20] sm:$0xf]  ;;  %s449_s18 = scalar_lea.vmem %s3368_s11, %s3371_s22  ;;  %s2887_s17 = smov 40  }
  0x12   : > { %2668 = vmatmul.mubr.msk.bf16.vlgmr.msra.gmra.mrb[0].mxu0 %vm481_vm1, %v455_v7  ;;  %s2890_s20 = smov 56  }
  0x13   : > { %2676 = vmatmul.mubr.msk.bf16.vlgmr.msra.gmra.mrb[0].mxu1 %vm481_vm1, %v457_v6  ;;  %2683 = vmatprep.mubr.msk.bf16.mxu0 %vm2873_vm0, %v2872_v1 }
  0x14   : > { %2689 = vmatprep.mubr.msk.bf16.mxu1 %vm2873_vm0, %v2872_v1  ;;  %2680 = vmatpush3.bf16.msra.mxu0 %v2826_v22 }
  0x15   : > { %2681 = vmatprep.subr.bf16.mxu0 %v2872_v1 }
  0x18   : > { %2682 = vmatpush3.bf16.msra.mxu0 %v2827_v23 }
  0x19   : > { %2693 = vmatprep.subr.bf16.mxu0 %v2872_v1 }
  0x1b   : > { %2684 = vmatmul.mubr.msk.bf16.vlgmr.msra.gmra.mrb[4].mxu0 %vm481_vm1, %v457_v6 }
  0x1c   : > { %2695 = vmatprep.mubr.msk.bf16.mxu0 %vm2873_vm0, %v2872_v1 }
  0xe5   : > { %v519_v12 = vpop.f32.mrb[0].mxu0 }
  0xe6   : > { %v585_v9 = vpop.f32.mrb[0].mxu1  ;;  %v2669_v14 = vpop.f32.mrb[1].mxu0  ;;  %v520_v20 = vadd.f32 %v2575_v19, %v519_v12 }
  0xe7   : > { %v586_v10 = vadd.f32 %v2579_v8, %v585_v9  ;;  %v2677_v11 = vpop.f32.mrb[1].mxu1  ;;  %v522_v17 = vpop.f32.mrb[2].mxu0 }
  0xe8   : > { %v588_v13 = vpop.f32.mrb[2].mxu1  ;;  %v2670_v18 = vpop.f32.mrb[3].mxu0  ;;  %v3014_v21 = vpack.c.bf16 %v520_v20, %v520_v20 }
  0xe9   : > { %v869_v15 = vpack.c.bf16 %v586_v10, %v586_v10  ;;  %v2678_v16 = vpop.f32.mrb[3].mxu1 }
  0xeb   : > { %877 = vrot.lane.b32.xlu1 %v869_v15, %s2874_s25  ;;  %871 = vrot.lane.b32.xlu0 %v869_v15, %s2875_s26 }
  0xef   : > { %880 = vrot.lane.b32.xlu1 %v869_v15, %s2876_s29  ;;  %874 = vrot.lane.b32.xlu0 %v869_v15, %s2877_s30 }
  0xf3   : > { %886 = vrot.lane.b32.xlu1 %v869_v15, %s2878_s13  ;;  %883 = vrot.lane.b32.xlu0 %v869_v15, %s2879_s15 }
  0xf7   : > { %889 = vrot.lane.b32.xlu0 %v869_v15, %s2880_s16  ;;  %656 = vrot.lane.b32.xlu1 %v3014_v21, %s2875_s26 }
  0xfb   : > { %659 = vrot.lane.b32.xlu0 %v3014_v21, %s2877_s30  ;;  %662 = vrot.lane.b32.xlu1 %v3014_v21, %s2874_s25 }
  0xff   : > { %665 = vrot.lane.b32.xlu0 %v3014_v21, %s2876_s29  ;;  %668 = vrot.lane.b32.xlu1 %v3014_v21, %s2879_s15 }
 0x103   : > { %671 = vrot.lane.b32.xlu0 %v3014_v21, %s2878_s13  ;;  %674 = vrot.lane.b32.xlu1 %v3014_v21, %s2880_s16 }
 0x15d   : > { %v878_v27 = vpop.permute.xlu1 %877  ;;  %v872_v28 = vpop.permute.xlu0 %871 }
 0x161   : > { %v881_v33 = vpop.permute.xlu1 %880  ;;  %v875_v34 = vpop.permute.xlu0 %874 }
 0x162   : > { %v892_v36 = vcombine.low %v869_v15, %v881_v33 }
 0x164   : > { %v899_v41 = vrot.slane %v892_v36, %v3044_v35 }
 0x165   : > { %v887_v38 = vpop.permute.xlu1 %886  ;;  %v884_v39 = vpop.permute.xlu0 %883 }
 0x166   : > { %v900_v40 = vcombine.low %v875_v34, %v887_v38  ;;  %v926_v44 = vcombine.low %v872_v28, %v884_v39 }
 0x168   : > { %v907_v43 = vrot.slane %v900_v40, %v3044_v35  ;;  %v933_v53 = vrot.slane %v926_v44, %v3044_v35 }
 0x169   : > { %v890_v45 = vpop.permute.xlu0 %889  ;;  %v657_v46 = vpop.permute.xlu1 %656 }
 0x16a   : > { %v908_v47 = vcombine.low %v899_v41, %v907_v43  ;;  %v909_v48 = vcombine.high %v899_v41, %v907_v43  ;;  %v934_v49 = vcombine.low %v878_v27, %v890_v45 }
 0x16c   : > { %v916_v50 = vrot.slane %v908_v47, %v3047_v42  ;;  %v923_v51 = vrot.slane %v909_v48, %v3047_v42  ;;  %v941_v52 = vrot.slane %v934_v49, %v3044_v35 }
 0x16d   : > { %v660_v54 = vpop.permute.xlu0 %659  ;;  %v663_v55 = vpop.permute.xlu1 %662 }
 0x16e   : > { %v924_v57 = vcombine.high %v916_v50, %v2883_v56  ;;  %v925_v58 = vcombine.high %v923_v51, %v2883_v56  ;;  %v942_v59 = vcombine.low %v933_v53, %v941_v52  ;;  %v943_v60 = vcombine.high %v933_v53, %v941_v52 }
 0x16f   : > { %v964_v2 = vshrl.u32 %v916_v50, 16  ;;  %v980_v4 = vshrl.u32 %v923_v51, 16 }
 0x170   : > { %v950_v61 = vrot.slane %v942_v59, %v3047_v42  ;;  %v957_v62 = vrot.slane %v943_v60, %v3047_v42  ;;  %v972_v3 = vshrl.u32 %v924_v57, 16  ;;  %v988_v5 = vshrl.u32 %v925_v58, 16 }
 0x171   : > { %v666_v63 = vpop.permute.xlu0 %665  ;;  %v669_v0 = vpop.permute.xlu1 %668 }
 0x172   : > { %v958_v6 = vcombine.high %v950_v61, %v2883_v56  ;;  %v959_v7 = vcombine.high %v957_v62, %v2883_v56  ;;  %v962_v8 = vpack.i.b16 %v950_v61, %v916_v50  ;;  %v965_v9 = vshrl.u32 %v950_v61, 16 }
 0x173   : > { %v978_v10 = vpack.i.b16 %v957_v62, %v923_v51  ;;  %v981_v11 = vshrl.u32 %v957_v62, 16  ;;  %v677_v12 = vcombine.low %v3014_v21, %v666_v63  ;;  %v711_v13 = vcombine.low %v657_v46, %v669_v0 }
 0x174   : > { %v966_v14 = vpack.i.b16 %v965_v9, %v964_v2  ;;  %v970_v15 = vpack.i.b16 %v958_v6, %v924_v57  ;;  %v973_v16 = vshrl.u32 %v958_v6, 16  ;;  %v986_v17 = vpack.i.b16 %v959_v7, %v925_v58 }
 0x175   : > { %v672_v18 = vpop.permute.xlu0 %671  ;;  %v675_v19 = vpop.permute.xlu1 %674  ;;  %v982_v20 = vpack.i.b16 %v981_v11, %v980_v4  ;;  %v989_v22 = vshrl.u32 %v959_v7, 16  ;;  %v992_v23 = vcombine.low %v962_v8, %v978_v10  ;;  %v684_v30 = vrot.slane %v677_v12, %v3044_v35 }
 0x176   : > { %v685_v24 = vcombine.low %v660_v54, %v672_v18  ;;  %v974_v25 = vpack.i.b16 %v973_v16, %v972_v3  ;;  %v1000_v26 = vcombine.low %v970_v15, %v986_v17  ;;  %v719_v27 = vcombine.low %v663_v55, %v675_v19 }
 0x177   : > { %v990_v28 = vpack.i.b16 %v989_v22, %v988_v5  ;;  %v1026_v29 = vcombine.low %v966_v14, %v982_v20  ;;  %v718_v31 = vrot.slane %v711_v13, %v3044_v35  ;;  %v3066_v33 = vrot.slane %v992_v23, %v3044_v35 }
 0x178   : > { %v692_v21 = vrot.slane %v685_v24, %v3044_v35  ;;  %v726_v32 = vrot.slane %v719_v27, %v3044_v35  ;;  %v3069_v34 = vrot.slane %v1000_v26, %v3044_v35 }
 0x179   : > { %v1034_v38 = vcombine.low %v974_v25, %v990_v28  ;;  %v1033_v45 = vrot.slane %v1026_v29, %v3044_v35 }
 0x17a   : > { %v693_v36 = vcombine.low %v684_v30, %v692_v21  ;;  %v694_v37 = vcombine.high %v684_v30, %v692_v21  ;;  %v727_v39 = vcombine.low %v718_v31, %v726_v32  ;;  %v728_v40 = vcombine.high %v718_v31, %v726_v32 }
 0x17b   : > { %v1008_v41 = vcombine.low %v3066_v33, %v3069_v34  ;;  %v1041_v49 = vrot.slane %v1034_v38, %v3044_v35 }
 0x17c   : > { %v701_v43 = vrot.slane %v693_v36, %v3047_v42  ;;  %v708_v44 = vrot.slane %v694_v37, %v3047_v42  ;;  %v735_v46 = vrot.slane %v727_v39, %v3047_v42  ;;  %v742_v47 = vrot.slane %v728_v40, %v3047_v42 }
 0x17d   : > { %v1016_v48 = vrot.slane %v1008_v41, %v3047_v42  ;;  %v1042_v7 = vcombine.low %v1033_v45, %v1041_v49  ;;  %v1043_v27 = vcombine.high %v1033_v45, %v1041_v49  ;;  %v1009_v37 = vcombine.high %v3066_v33, %v3069_v34 }
 0x17e   : > { %v709_v50 = vcombine.high %v701_v43, %v2883_v56  ;;  %v710_v51 = vcombine.high %v708_v44, %v2883_v56  ;;  %v749_v52 = vshrl.u32 %v701_v43, 16  ;;  %v765_v53 = vshrl.u32 %v708_v44, 16 }
 0x17f   : > { %v743_v54 = vcombine.high %v735_v46, %v2883_v56  ;;  %v744_v55 = vcombine.high %v742_v47, %v2883_v56  ;;  %v747_v57 = vpack.i.b16 %v735_v46, %v701_v43  ;;  %v750_v58 = vshrl.u32 %v735_v46, 16 }
 0x180   : > { %v757_v59 = vshrl.u32 %v709_v50, 16  ;;  %v773_v60 = vshrl.u32 %v710_v51, 16  ;;  %v763_v61 = vpack.i.b16 %v742_v47, %v708_v44  ;;  %v766_v62 = vshrl.u32 %v742_v47, 16 }
 0x181   : > { %v751_v63 = vpack.i.b16 %v750_v58, %v749_v52  ;;  %v755_v0 = vpack.i.b16 %v743_v54, %v709_v50  ;;  %v758_v2 = vshrl.u32 %v743_v54, 16  ;;  %v771_v3 = vpack.i.b16 %v744_v55, %v710_v51 }
 0x182   : > { %v767_v4 = vpack.i.b16 %v766_v62, %v765_v53  ;;  %v774_v5 = vshrl.u32 %v744_v55, 16  ;;  %v777_v6 = vcombine.low %v747_v57, %v763_v61  ;;  %v1050_v12 = vrot.slane %v1042_v7, %v3047_v42 }
 0x183   : > { %v759_v8 = vpack.i.b16 %v758_v2, %v757_v59  ;;  %v785_v9 = vcombine.low %v755_v0, %v771_v3  ;;  %v1063_v17 = vshrl.u32 %v1016_v48, 16  ;;  %v1024_v20 = vcombine.high %v1016_v48, %v2883_v56 }
 0x184   : > { %v775_v10 = vpack.i.b16 %v774_v5, %v773_v60  ;;  %v811_v11 = vcombine.low %v751_v63, %v767_v4  ;;  %v3086_v13 = vrot.slane %v777_v6, %v3044_v35  ;;  %v1062_v16 = vpack.i.b16 %v1050_v12, %v1016_v48 }
 0x185   : > { %v3089_v14 = vrot.slane %v785_v9, %v3044_v35  ;;  %v1064_v18 = vshrl.u32 %v1050_v12, 16  ;;  %v1058_v22 = vcombine.high %v1050_v12, %v2883_v56  ;;  %v1069_v36 = vshrl.u32 %v1024_v20, 16 }
 0x186   : > { %v819_v15 = vcombine.low %v759_v8, %v775_v10  ;;  %v818_v23 = vrot.slane %v811_v11, %v3044_v35  ;;  %v1308_v25 = vsel %vm1303_vm2, %v1062_v16, 0  ;;  %v1057_v38 = vrot.slane %v1043_v27, %v3047_v42 }
 0x187   : > { %v793_v19 = vcombine.low %v3086_v13, %v3089_v14  ;;  %v1065_v26 = vpack.i.b16 %v1064_v18, %v1063_v17  ;;  %2688 = vmatpush3.bf16.xpose.msra.mxu1 %v1308_v25  ;;  %v1070_v21 = vshrl.u32 %v1058_v22, 16  ;;  %v1068_v32 = vpack.i.b16 %v1058_v22, %v1024_v20  ;;  %v3153_v18 = vpop.f32.mrb[4].mxu0 }
 0x188   : > { %v826_v24 = vrot.slane %v819_v15, %v3044_v35  ;;  %2699 = vmatprep.subr.bf16.mxu1 %v2872_v1  ;;  %v1023_v47 = vrot.slane %v1009_v37, %v3047_v42  ;;  %v1076_v48 = vshrl.u32 %v1057_v38, 16  ;;  %v794_v53 = vcombine.high %v3086_v13, %v3089_v14 }
 0x189   : > { %v1354_v28 = vsel %vm1303_vm2, %v1065_v26, 0  ;;  %v801_v29 = vrot.slane %v793_v19, %v3047_v42  ;;  %v1071_v43 = vpack.i.b16 %v1070_v21, %v1069_v36  ;;  %v1400_v44 = vsel %vm1303_vm2, %v1068_v32, 0  ;;  %v2685_v19 = vpop.f32.mrb[5].mxu0 }
 0x18a   : > { %v827_v30 = vcombine.low %v818_v23, %v826_v24  ;;  %2694 = vmatpush3.bf16.xpose.msra.mxu0 %v1354_v28  ;;  %v1074_v49 = vpack.i.b16 %v1057_v38, %v1023_v47  ;;  %v1075_v51 = vshrl.u32 %v1023_v47, 16  ;;  %v828_v52 = vcombine.high %v818_v23, %v826_v24  ;;  %v651_v20 = vpop.f32.mrb[6].mxu0  ;;  %v2595_v24 = vld [vmem:[%s446_s27] ss:$0 sm:$0xff]  ;;  %s2885_s27 = smov 16  }
 0x18b   : > { %2705 = vmatprep.subr.bf16.mxu0 %v2872_v1  ;;  %v848_v40 = vshrl.u32 %v801_v29, 16  ;;  %v1446_v33 = vsel %vm1303_vm2, %v1071_v43, 0  ;;  %v809_v34 = vcombine.high %v801_v29, %v2883_v56  ;;  %v1059_v58 = vcombine.high %v1057_v38, %v2883_v56  ;;  %v2686_v22 = vpop.f32.mrb[7].mxu0 }
 0x18c   : > { %v835_v31 = vrot.slane %v827_v30, %v3047_v42  ;;  %v1077_v57 = vpack.i.b16 %v1076_v48, %v1075_v51  ;;  %v1492_v59 = vsel %vm1303_vm2, %v1074_v49, 0  ;;  %v842_v61 = vrot.slane %v828_v52, %v3047_v42  ;;  %v2583_v22 = vld [vmem:[%s3364_s7] ss:$0 sm:$0xff] }
 0x18d   : > { %v854_v55 = vshrl.u32 %v809_v34, 16  ;;  %v1025_v62 = vcombine.high %v1023_v47, %v2883_v56  ;;  %v808_v0 = vrot.slane %v794_v53, %v3047_v42  ;;  %v1082_v2 = vshrl.u32 %v1059_v58, 16  ;;  %v2596_v53 = vld [vmem:[%s449_s18] ss:$0 sm:$0xff]  ;;  %s2888_s18 = smov 48  }
 0x18e   : > { %v847_v39 = vpack.i.b16 %v835_v31, %v801_v29  ;;  %v849_v41 = vshrl.u32 %v835_v31, 16  ;;  %v843_v46 = vcombine.high %v835_v31, %v2883_v56  ;;  %v1538_v63 = vsel %vm1303_vm2, %v1077_v57, 0 }
 0x18f   : > { %v1080_v3 = vpack.i.b16 %v1059_v58, %v1025_v62  ;;  %v861_v4 = vshrl.u32 %v842_v61, 16  ;;  %v1081_v5 = vshrl.u32 %v1025_v62, 16  ;;  %v859_v6 = vpack.i.b16 %v842_v61, %v808_v0 }
 0x190   : > { %2690 = vmatmul.mubr.msk.bf16.vlgmr.msra.gmra.mrb[4].mxu1 %vm1303_vm2, %v847_v39  ;;  %v850_v45 = vpack.i.b16 %v849_v41, %v848_v40  ;;  %v855_v50 = vshrl.u32 %v843_v46, 16  ;;  %v853_v54 = vpack.i.b16 %v843_v46, %v809_v34  ;;  %v860_v7 = vshrl.u32 %v808_v0, 16 }
 0x191   : > { %2700 = vmatpush3.bf16.xpose.msra.mxu1 %v1400_v44  ;;  %2701 = vmatprep.mubr.msk.bf16.mxu1 %vm2873_vm0, %v2872_v1  ;;  %v1083_v8 = vpack.i.b16 %v1082_v2, %v1081_v5  ;;  %v1584_v9 = vsel %vm1303_vm2, %v1080_v3, 0  ;;  %v844_v11 = vcombine.high %v842_v61, %v2883_v56  ;;  %v810_v13 = vcombine.high %v808_v0, %v2883_v56 }
 0x192   : > { %2696 = vmatmul.mubr.msk.bf16.vlgmr.msra.gmra.mrb[8].mxu0 %vm1303_vm2, %v850_v45  ;;  %2711 = vmatprep.subr.bf16.mxu1 %v2872_v1  ;;  %v856_v60 = vpack.i.b16 %v855_v50, %v854_v55  ;;  %v862_v10 = vpack.i.b16 %v861_v4, %v860_v7 }
 0x193   : > { %2706 = vmatpush3.bf16.xpose.msra.mxu0 %v1446_v33  ;;  %2707 = vmatprep.mubr.msk.bf16.mxu0 %vm2873_vm0, %v2872_v1  ;;  %v1630_v12 = vsel %vm1303_vm2, %v1083_v8, 0  ;;  %v867_v14 = vshrl.u32 %v844_v11, 16  ;;  %v865_v15 = vpack.i.b16 %v844_v11, %v810_v13  ;;  %v866_v16 = vshrl.u32 %v810_v13, 16 }
 0x194   : > { %2717 = vmatprep.subr.bf16.mxu0 %v2872_v1 }
 0x195   : > { %v868_v17 = vpack.i.b16 %v867_v14, %v866_v16 }
 0x198   : > { %2702 = vmatmul.mubr.msk.bf16.vlgmr.msra.gmra.mrb[8].mxu1 %vm1303_vm2, %v853_v54 }
 0x199   : > { %2712 = vmatpush3.bf16.xpose.msra.mxu1 %v1492_v59  ;;  %2713 = vmatprep.mubr.msk.bf16.mxu1 %vm2873_vm0, %v2872_v1 }
 0x19a   : > { %2708 = vmatmul.mubr.msk.bf16.vlgmr.msra.gmra.mrb[12].mxu0 %vm1303_vm2, %v856_v60  ;;  %2723 = vmatprep.subr.bf16.mxu1 %v2872_v1 }
 0x19b   : > { %2718 = vmatpush3.bf16.xpose.msra.mxu0 %v1538_v63  ;;  %2719 = vmatprep.mubr.msk.bf16.mxu0 %vm2873_vm0, %v2872_v1 }
 0x19c   : > { %2729 = vmatprep.subr.bf16.mxu0 %v2872_v1 }
 0x1a0   : > { %2714 = vmatmul.mubr.msk.bf16.vlgmr.msra.gmra.mrb[12].mxu1 %vm1303_vm2, %v859_v6 }
 0x1a1   : > { %2724 = vmatpush3.bf16.xpose.msra.mxu1 %v1584_v9  ;;  %2725 = vmatprep.mubr.msk.bf16.mxu1 %vm2873_vm0, %v2872_v1 }
 0x1a2   : > { %2720 = vmatmul.mubr.msk.bf16.vlgmr.msra.gmra.mrb[16].mxu0 %vm1303_vm2, %v862_v10  ;;  %2735 = vmatprep.subr.bf16.mxu1 %v2872_v1 }
 0x1a3   : > { %2730 = vmatpush3.bf16.xpose.msra.mxu0 %v1630_v12  ;;  %2731 = vmatprep.mubr.msk.bf16.mxu0 %vm2873_vm0, %v2872_v1 }
 0x1a4   : > { %2741 = vmatprep.subr.bf16.mxu0 %v2872_v1 }
 0x1a8   : > { %2726 = vmatmul.mubr.msk.bf16.vlgmr.msra.gmra.mrb[16].mxu1 %vm1303_vm2, %v865_v15 }
 0x1a9   : > { %2737 = vmatprep.mubr.msk.bf16.mxu1 %vm2873_vm0, %v2872_v1 }
 0x1aa   : > { %2732 = vmatmul.mubr.msk.bf16.vlgmr.msra.gmra.mrb[20].mxu0 %vm1303_vm2, %v868_v17 }
 0x1ab   : > { %2743 = vmatprep.mubr.msk.bf16.mxu0 %vm2873_vm0, %v2872_v1 }
 0x263   : > { %v1344_v23 = vpop.f32.mrb[4].mxu1 }
 0x264   : > { %v1672_v25 = vmul.f32 0.35355338, %v1344_v23  ;;  %v2691_v26 = vpop.f32.mrb[5].mxu1  ;;  %v649_v23 = vadd.f32 %v2583_v22, %v3153_v18 }
 0x265   : > { %v1347_v27 = vpop.f32.mrb[6].mxu1  ;;  %v1390_v28 = vpop.f32.mrb[8].mxu0 }
 0x266   : > { %v1673_v29 = vmul.f32 0.35355338, %v1390_v28  ;;  %v2692_v30 = vpop.f32.mrb[7].mxu1  ;;  %v2697_v21 = vpop.f32.mrb[9].mxu0  ;;  %v3159_v31 = vadd.f32 %v2595_v24, %v1672_v25 }
 0x267   : > { %v1393_v32 = vpop.f32.mrb[10].mxu0 }
 0x268   : > { %v2698_v36 = vpop.f32.mrb[11].mxu0  ;;  %v1700_v37 = vsel %vm1303_vm2, %v3159_v31, -inf  ;;  %v3163_v38 = vadd.f32 %v2595_v24, %v1673_v29 }
 0x269   : > { %1701 = vmax.xlane.f32.xlu0 %v1700_v37 }
 0x26a   : > { %v1703_v39 = vsel %vm1303_vm2, %v3163_v38, -inf }
 0x26b   : > { %v1436_v40 = vpop.f32.mrb[8].mxu1  ;;  %1704 = vmax.xlane.f32.xlu1 %v1703_v39 }
 0x26c   : > { %v1674_v41 = vmul.f32 0.35355338, %v1436_v40  ;;  %v2703_v43 = vpop.f32.mrb[9].mxu1 }
 0x26d   : > { %v1439_v44 = vpop.f32.mrb[10].mxu1  ;;  %v1482_v45 = vpop.f32.mrb[12].mxu0 }
 0x26e   : > { %v1675_v46 = vmul.f32 0.35355338, %v1482_v45  ;;  %v2704_v47 = vpop.f32.mrb[11].mxu1  ;;  %v2709_v33 = vpop.f32.mrb[13].mxu0  ;;  %v1694_v34 = vadd.f32 %v2595_v24, %v1674_v41 }
 0x26f   : > { %v1485_v48 = vpop.f32.mrb[14].mxu0 }
 0x270   : > { %v2710_v49 = vpop.f32.mrb[15].mxu0  ;;  %v1706_v50 = vsel %vm1303_vm2, %v1694_v34, -inf  ;;  %v3168_v51 = vadd.f32 %v2595_v24, %v1675_v46  ;;  %v3184_v24 = vpack.c.bf16 %v649_v23, %v649_v23 }
 0x271   : > { %1707 = vmax.xlane.f32.xlu0 %v1706_v50 }
 0x272   : > { %v1709_v57 = vsel %vm1303_vm2, %v3168_v51, -inf }
 0x273   : > { %v1528_v52 = vpop.f32.mrb[12].mxu1 }
 0x274   : > { %v1676_v54 = vmul.f32 0.35355338, %v1528_v52  ;;  %v2715_v55 = vpop.f32.mrb[13].mxu1 }
 0x275   : > { %v1531_v58 = vpop.f32.mrb[14].mxu1  ;;  %1710 = vmax.xlane.f32.xlu0 %v1709_v57  ;;  %v1574_v59 = vpop.f32.mrb[16].mxu0 }
 0x276   : > { %v1677_v60 = vmul.f32 0.35355338, %v1574_v59  ;;  %v2716_v61 = vpop.f32.mrb[15].mxu1  ;;  %v2721_v62 = vpop.f32.mrb[17].mxu0  ;;  %v1696_v63 = vadd.f32 %v2596_v53, %v1676_v54 }
 0x277   : > { %v1577_v0 = vpop.f32.mrb[18].mxu0 }
 0x278   : > { %v2722_v2 = vpop.f32.mrb[19].mxu0  ;;  %v1712_v3 = vsel %vm1303_vm2, %v1696_v63, -inf  ;;  %v1697_v4 = vadd.f32 %v2596_v53, %v1677_v60 }
 0x279   : > { %1713 = vmax.xlane.f32.xlu1 %v1712_v3 }
 0x27a   : > { %v1715_v5 = vsel %vm1303_vm2, %v1697_v4, -inf }
 0x27b   : > { %v1620_v6 = vpop.f32.mrb[16].mxu1  ;;  %1716 = vmax.xlane.f32.xlu0 %v1715_v5 }
 0x27c   : > { %v1678_v7 = vmul.f32 0.35355338, %v1620_v6  ;;  %v2727_v8 = vpop.f32.mrb[17].mxu1 }
 0x27d   : > { %v1623_v9 = vpop.f32.mrb[18].mxu1  ;;  %v1666_v10 = vpop.f32.mrb[20].mxu0 }
 0x27e   : > { %v1679_v11 = vmul.f32 0.35355338, %v1666_v10  ;;  %v2728_v12 = vpop.f32.mrb[19].mxu1  ;;  %v2733_v13 = vpop.f32.mrb[21].mxu0  ;;  %v1698_v14 = vadd.f32 %v2596_v53, %v1678_v7 }
 0x27f   : > { %v1669_v15 = vpop.f32.mrb[22].mxu0 }
 0x280   : > { %v2734_v16 = vpop.f32.mrb[23].mxu0  ;;  %v1718_v17 = vsel %vm1303_vm2, %v1698_v14, -inf  ;;  %v1699_v19 = vadd.f32 %v2596_v53, %v1679_v11 }
 0x281   : > { %1719 = vmax.xlane.f32.xlu1 %v1718_v17 }
 0x282   : > { %v1721_v20 = vsel %vm1303_vm2, %v1699_v19, -inf }
 0x283   : > { %1722 = vmax.xlane.f32.xlu0 %v1721_v20 }
 0x292   : > { %1086 = vrot.lane.b32.xlu1 %v3184_v24, %s2875_s26 }
 0x296   : > { %1092 = vrot.lane.b32.xlu1 %v3184_v24, %s2874_s25 }
 0x299   : > { %1089 = vrot.lane.b32.xlu0 %v3184_v24, %s2877_s30 }
 0x29a   : > { %1095 = vrot.lane.b32.xlu1 %v3184_v24, %s2876_s29 }
 0x29d   : > { %1098 = vrot.lane.b32.xlu0 %v3184_v24, %s2879_s15 }
 0x29e   : > { %1101 = vrot.lane.b32.xlu1 %v3184_v24, %s2878_s13  ;;  %s453_s13 = scalar_lea.vmem %s3369_s12, %s2572_s14 }
 0x2a1   : > { %1104 = vrot.lane.b32.xlu0 %v3184_v24, %s2880_s16 }
 0x2f6   : > { %v1702_v18 = vpop.xlane.xlu0 %1701 }
 0x2f7   : > { %v1724_v25 = vsub.f32 %v3159_v31, %v1702_v18 }
 0x2f8   : > { %v1705_v26 = vpop.xlane.xlu1 %1704 }
 0x2f9   : > { %v1732_v27 = vmul.f32 1.442695, %v1724_v25  ;;  %v1725_v28 = vsub.f32 %v3163_v38, %v1705_v26 }
 0x2fb   : > { %2832 = vpow2.f32 %v1732_v27  ;;  %v1734_v29 = vmul.f32 1.442695, %v1725_v28 }
 0x2fd   : > { %2834 = vpow2.f32 %v1734_v29 }
 0x2fe   : > { %v1708_v30 = vpop.xlane.xlu0 %1707 }
 0x2ff   : > { %v1726_v21 = vsub.f32 %v1694_v34, %v1708_v30 }
 0x301   : > { %v1736_v32 = vmul.f32 1.442695, %v1726_v21 }
 0x302   : > { %v1711_v36 = vpop.xlane.xlu0 %1710 }
 0x303   : > { %2836 = vpow2.f32 %v1736_v32  ;;  %v1727_v37 = vsub.f32 %v3168_v51, %v1711_v36 }
 0x305   : > { %v3203_v39 = vpop.eup %2832  ;;  %v1738_v40 = vmul.f32 1.442695, %v1727_v37 }
 0x306   : > { %v1714_v41 = vpop.xlane.xlu1 %1713  ;;  %v1748_v31 = vsel %vm1303_vm2, %v3203_v39, 0.0 }
 0x307   : > { %v3207_v43 = vpop.eup %2834  ;;  %2838 = vpow2.f32 %v1738_v40  ;;  %v1728_v38 = vsub.f32 %v1696_v63, %v1714_v41  ;;  %1749 = vadd.xlane.f32.xlu1 %v1748_v31 }
 0x308   : > { %v1717_v44 = vpop.xlane.xlu0 %1716  ;;  %v1751_v45 = vsel %vm1303_vm2, %v3207_v43, 0.0 }
 0x309   : > { %v1740_v46 = vmul.f32 1.442695, %v1728_v38  ;;  %v1729_v47 = vsub.f32 %v1697_v4, %v1717_v44  ;;  %1752 = vadd.xlane.f32.xlu0 %v1751_v45 }
 0x30b   : > { %2840 = vpow2.f32 %v1740_v46  ;;  %v1742_v33 = vmul.f32 1.442695, %v1729_v47 }
 0x30d   : > { %v3211_v34 = vpop.eup %2836  ;;  %2842 = vpow2.f32 %v1742_v33 }
 0x30e   : > { %v1720_v48 = vpop.xlane.xlu1 %1719  ;;  %v1754_v49 = vsel %vm1303_vm2, %v3211_v34, 0.0 }
 0x30f   : > { %v1730_v50 = vsub.f32 %v1698_v14, %v1720_v48  ;;  %1755 = vadd.xlane.f32.xlu0 %v1754_v49 }
 0x310   : > { %v1723_v51 = vpop.xlane.xlu0 %1722 }
 0x311   : > { %v3215_v52 = vpop.eup %2838  ;;  %v1744_v53 = vmul.f32 1.442695, %v1730_v50  ;;  %v1731_v54 = vsub.f32 %v1699_v19, %v1723_v51 }
 0x312   : > { %v1087_v55 = vpop.permute.xlu1 %1086  ;;  %v1757_v57 = vsel %vm1303_vm2, %v3215_v52, 0.0 }
 0x313   : > { %2844 = vpow2.f32 %v1744_v53  ;;  %v1746_v58 = vmul.f32 1.442695, %v1731_v54  ;;  %1758 = vadd.xlane.f32.xlu1 %v1757_v57 }
 0x314   : > { %v1090_v59 = vpop.permute.xlu0 %1089 }
 0x315   : > { %v3219_v60 = vpop.eup %2840  ;;  %2846 = vpow2.f32 %v1746_v58 }
 0x316   : > { %v1093_v61 = vpop.permute.xlu1 %1092  ;;  %v1760_v62 = vsel %vm1303_vm2, %v3219_v60, 0.0 }
 0x317   : > { %v3223_v63 = vpop.eup %2842  ;;  %1761 = vadd.xlane.f32.xlu0 %v1760_v62 }
 0x318   : > { %v1099_v0 = vpop.permute.xlu0 %1098  ;;  %v1763_v2 = vsel %vm1303_vm2, %v3223_v63, 0.0 }
 0x319   : > { %1764 = vadd.xlane.f32.xlu1 %v1763_v2  ;;  %v1141_v4 = vcombine.low %v1087_v55, %v1099_v0 }
 0x31a   : > { %v1096_v3 = vpop.permute.xlu1 %1095 }
 0x31b   : > { %v1107_v7 = vcombine.low %v3184_v24, %v1096_v3  ;;  %v1148_v12 = vrot.slane %v1141_v4, %v3044_v35 }
 0x31c   : > { %v1105_v5 = vpop.permute.xlu0 %1104 }
 0x31d   : > { %v3227_v6 = vpop.eup %2844  ;;  %v1149_v8 = vcombine.low %v1093_v61, %v1105_v5  ;;  %v1114_v16 = vrot.slane %v1107_v7, %v3044_v35 }
 0x31e   : > { %v1102_v9 = vpop.permute.xlu1 %1101  ;;  %v1766_v10 = vsel %vm1303_vm2, %v3227_v6, 0.0 }
 0x31f   : > { %v3232_v11 = vpop.eup %2846  ;;  %v1156_v13 = vrot.slane %v1149_v8, %v3044_v35  ;;  %v1115_v14 = vcombine.low %v1090_v59, %v1102_v9  ;;  %1767 = vadd.xlane.f32.xlu0 %v1766_v10 }
 0x320   : > { %v1769_v15 = vsel %vm1303_vm2, %v3232_v11, 0.0 }
 0x321   : > { %v1157_v17 = vcombine.low %v1148_v12, %v1156_v13  ;;  %v1158_v19 = vcombine.high %v1148_v12, %v1156_v13  ;;  %v1122_v20 = vrot.slane %v1115_v14, %v3044_v35  ;;  %1770 = vadd.xlane.f32.xlu1 %v1769_v15 }
 0x323   : > { %v1165_v22 = vrot.slane %v1157_v17, %v3047_v42  ;;  %v1172_v23 = vrot.slane %v1158_v19, %v3047_v42  ;;  %v1123_v24 = vcombine.low %v1114_v16, %v1122_v20  ;;  %v1124_v18 = vcombine.high %v1114_v16, %v1122_v20 }
 0x325   : > { %v1173_v25 = vcombine.high %v1165_v22, %v2883_v56  ;;  %v1131_v26 = vrot.slane %v1123_v24, %v3047_v42  ;;  %v1138_v27 = vrot.slane %v1124_v18, %v3047_v42  ;;  %v1174_v28 = vcombine.high %v1172_v23, %v2883_v56 }
 0x326   : > { %v1180_v29 = vshrl.u32 %v1165_v22, 16  ;;  %v1196_v40 = vshrl.u32 %v1172_v23, 16 }
 0x327   : > { %v1139_v30 = vcombine.high %v1131_v26, %v2883_v56  ;;  %v1140_v21 = vcombine.high %v1138_v27, %v2883_v56  ;;  %v1177_v32 = vpack.i.b16 %v1165_v22, %v1131_v26  ;;  %v1179_v36 = vshrl.u32 %v1131_v26, 16 }
 0x328   : > { %v1188_v37 = vshrl.u32 %v1173_v25, 16  ;;  %v1193_v41 = vpack.i.b16 %v1172_v23, %v1138_v27  ;;  %v1195_v31 = vshrl.u32 %v1138_v27, 16  ;;  %v1204_v47 = vshrl.u32 %v1174_v28, 16 }
 0x329   : > { %v1181_v38 = vpack.i.b16 %v1180_v29, %v1179_v36  ;;  %v1185_v44 = vpack.i.b16 %v1173_v25, %v1139_v30  ;;  %v1187_v45 = vshrl.u32 %v1139_v30, 16  ;;  %v1201_v46 = vpack.i.b16 %v1174_v28, %v1140_v21 }
 0x32a   : > { %v1197_v33 = vpack.i.b16 %v1196_v40, %v1195_v31  ;;  %v1203_v48 = vshrl.u32 %v1140_v21, 16  ;;  %v1207_v49 = vcombine.low %v1177_v32, %v1193_v41 }
 0x32b   : > { %v1189_v50 = vpack.i.b16 %v1188_v37, %v1187_v45  ;;  %v1215_v51 = vcombine.low %v1185_v44, %v1201_v46 }
 0x32c   : > { %v1205_v53 = vpack.i.b16 %v1204_v47, %v1203_v48  ;;  %v1241_v54 = vcombine.low %v1181_v38, %v1197_v33  ;;  %v1214_v55 = vrot.slane %v1207_v49, %v3044_v35 }
 0x32d   : > { %v1222_v57 = vrot.slane %v1215_v51, %v3044_v35 }
 0x32e   : > { %v1249_v58 = vcombine.low %v1189_v50, %v1205_v53  ;;  %v1248_v62 = vrot.slane %v1241_v54, %v3044_v35 }
 0x32f   : > { %v1223_v59 = vcombine.low %v1214_v55, %v1222_v57  ;;  %v1224_v61 = vcombine.high %v1214_v55, %v1222_v57 }
 0x330   : > { %v1256_v0 = vrot.slane %v1249_v58, %v3044_v35 }
 0x331   : > { %v1231_v2 = vrot.slane %v1223_v59, %v3047_v42  ;;  %v1238_v3 = vrot.slane %v1224_v61, %v3047_v42 }
 0x332   : > { %v1257_v4 = vcombine.low %v1248_v62, %v1256_v0  ;;  %v1258_v5 = vcombine.high %v1248_v62, %v1256_v0 }
 0x333   : > { %v1239_v7 = vcombine.high %v1231_v2, %v2883_v56  ;;  %v1240_v8 = vcombine.high %v1238_v3, %v2883_v56  ;;  %v1278_v12 = vshrl.u32 %v1231_v2, 16  ;;  %v1290_v13 = vshrl.u32 %v1238_v3, 16 }
 0x334   : > { %v1265_v9 = vrot.slane %v1257_v4, %v3047_v42  ;;  %v1272_v10 = vrot.slane %v1258_v5, %v3047_v42 }
 0x335   : > { %v1284_v19 = vshrl.u32 %v1239_v7, 16  ;;  %v1296_v23 = vshrl.u32 %v1240_v8, 16 }
 0x336   : > { %v1277_v14 = vpack.i.b16 %v1265_v9, %v1231_v2  ;;  %v1279_v15 = vshrl.u32 %v1265_v9, 16  ;;  %v1273_v16 = vcombine.high %v1265_v9, %v2883_v56  ;;  %v1289_v17 = vpack.i.b16 %v1272_v10, %v1238_v3 }
 0x337   : > { %v1291_v20 = vshrl.u32 %v1272_v10, 16  ;;  %v1274_v22 = vcombine.high %v1272_v10, %v2883_v56 }
 0x338   : > { %v1801_v24 = vsel %vm1799_vm3, %v1277_v14, 0  ;;  %v1280_v18 = vpack.i.b16 %v1279_v15, %v1278_v12  ;;  %v1283_v25 = vpack.i.b16 %v1273_v16, %v1239_v7  ;;  %v1285_v26 = vshrl.u32 %v1273_v16, 16 }
 0x339   : > { %2736 = vmatpush3.bf16.msra.mxu1 %v1801_v24  ;;  %v1985_v27 = vsel %vm1799_vm3, %v1289_v17, 0  ;;  %v1292_v28 = vpack.i.b16 %v1291_v20, %v1290_v13  ;;  %v1295_v29 = vpack.i.b16 %v1274_v22, %v1240_v8  ;;  %v1297_v30 = vshrl.u32 %v1274_v22, 16 }
 0x33a   : > { %v1847_v21 = vsel %vm1799_vm3, %v1280_v18, 0  ;;  %2747 = vmatprep.subr.bf16.mxu1 %v2872_v1  ;;  %v1893_v32 = vsel %vm1799_vm3, %v1283_v25, 0  ;;  %v1286_v36 = vpack.i.b16 %v1285_v26, %v1284_v19 }
 0x33b   : > { %2742 = vmatpush3.bf16.msra.mxu0 %v1847_v21  ;;  %v2031_v37 = vsel %vm1799_vm3, %v1292_v28, 0  ;;  %v2077_v40 = vsel %vm1799_vm3, %v1295_v29, 0  ;;  %v1298_v41 = vpack.i.b16 %v1297_v30, %v1296_v23 }
 0x33c   : > { %2753 = vmatprep.subr.bf16.mxu0 %v2872_v1  ;;  %v1939_v31 = vsel %vm1799_vm3, %v1286_v36, 0 }
 0x33d   : > { %v2123_v38 = vsel %vm1799_vm3, %v1298_v41, 0 }
 0x394   : > { %v1750_v44 = vpop.xlane.xlu1 %1749 }
 0x395   : > { %2848 = vrcp.f32 %v1750_v44 }
 0x396   : > { %v1753_v45 = vpop.xlane.xlu0 %1752 }
 0x397   : > { %2850 = vrcp.f32 %v1753_v45 }
 0x39c   : > { %v1756_v46 = vpop.xlane.xlu0 %1755 }
 0x39d   : > { %2852 = vrcp.f32 %v1756_v46 }
 0x39f   : > { %v2849_v47 = vpop.eup %2848 }
 0x3a0   : > { %v1780_v33 = vmul.f32 %v2849_v47, %v3203_v39  ;;  %v1759_v48 = vpop.xlane.xlu1 %1758 }
 0x3a1   : > { %v2851_v49 = vpop.eup %2850  ;;  %2854 = vrcp.f32 %v1759_v48 }
 0x3a2   : > { %v1781_v50 = vmul.f32 %v2851_v49, %v3207_v43  ;;  %v1788_v51 = vpack.c.bf16 %v1780_v33, %v1780_v33 }
 0x3a4   : > { %2738 = vmatmul.mubr.msk.bf16.vlgmr.msra.gmra.mrb[20].mxu1 %vm1303_vm2, %v1788_v51  ;;  %v1762_v53 = vpop.xlane.xlu0 %1761  ;;  %v1789_v54 = vpack.c.bf16 %v1781_v50, %v1781_v50 }
 0x3a5   : > { %2748 = vmatpush3.bf16.msra.mxu1 %v1893_v32  ;;  %2856 = vrcp.f32 %v1762_v53  ;;  %2749 = vmatprep.mubr.msk.bf16.mxu1 %vm2873_vm0, %v2872_v1 }
 0x3a6   : > { %v1765_v55 = vpop.xlane.xlu1 %1764  ;;  %2744 = vmatmul.mubr.msk.bf16.vlgmr.msra.gmra.mrb[24].mxu0 %vm1303_vm2, %v1789_v54  ;;  %2759 = vmatprep.subr.bf16.mxu1 %v2872_v1 }
 0x3a7   : > { %v2853_v39 = vpop.eup %2852  ;;  %2858 = vrcp.f32 %v1765_v55  ;;  %2754 = vmatpush3.bf16.msra.mxu0 %v1939_v31  ;;  %2755 = vmatprep.mubr.msk.bf16.mxu0 %vm2873_vm0, %v2872_v1 }
 0x3a8   : > { %v1782_v43 = vmul.f32 %v2853_v39, %v3211_v34  ;;  %2765 = vmatprep.subr.bf16.mxu0 %v2872_v1 }
 0x3aa   : > { %v1790_v57 = vpack.c.bf16 %v1782_v43, %v1782_v43 }
 0x3ab   : > { %v2855_v58 = vpop.eup %2854 }
 0x3ac   : > { %v1783_v59 = vmul.f32 %v2855_v58, %v3215_v52  ;;  %2750 = vmatmul.mubr.msk.bf16.vlgmr.msra.gmra.mrb[24].mxu1 %vm1303_vm2, %v1790_v57  ;;  %v1768_v61 = vpop.xlane.xlu0 %1767 }
 0x3ad   : > { %2760 = vmatpush3.bf16.msra.mxu1 %v1985_v27  ;;  %2860 = vrcp.f32 %v1768_v61  ;;  %2761 = vmatprep.mubr.msk.bf16.mxu1 %vm2873_vm0, %v2872_v1 }
 0x3ae   : > { %v1771_v62 = vpop.xlane.xlu1 %1770  ;;  %v1791_v0 = vpack.c.bf16 %v1783_v59, %v1783_v59  ;;  %2771 = vmatprep.subr.bf16.mxu1 %v2872_v1 }
 0x3af   : > { %v2857_v2 = vpop.eup %2856  ;;  %2862 = vrcp.f32 %v1771_v62 }
 0x3b0   : > { %v1784_v34 = vmul.f32 %v2857_v2, %v3219_v60  ;;  %2756 = vmatmul.mubr.msk.bf16.vlgmr.msra.gmra.mrb[28].mxu0 %vm1303_vm2, %v1791_v0 }
 0x3b1   : > { %v2859_v3 = vpop.eup %2858  ;;  %2766 = vmatpush3.bf16.msra.mxu0 %v2031_v37  ;;  %2767 = vmatprep.mubr.msk.bf16.mxu0 %vm2873_vm0, %v2872_v1 }
 0x3b2   : > { %v1785_v52 = vmul.f32 %v2859_v3, %v3223_v63  ;;  %v1792_v4 = vpack.c.bf16 %v1784_v34, %v1784_v34  ;;  %2777 = vmatprep.subr.bf16.mxu0 %v2872_v1 }
 0x3b4   : > { %2762 = vmatmul.mubr.msk.bf16.vlgmr.msra.gmra.mrb[28].mxu1 %vm1303_vm2, %v1792_v4  ;;  %v1793_v5 = vpack.c.bf16 %v1785_v52, %v1785_v52 }
 0x3b5   : > { %2772 = vmatpush3.bf16.msra.mxu1 %v2077_v40  ;;  %2773 = vmatprep.mubr.msk.bf16.mxu1 %vm2873_vm0, %v2872_v1 }
 0x3b6   : > { %2783 = vmatprep.subr.bf16.mxu1 %v2872_v1 }
 0x3b7   : > { %v2861_v60 = vpop.eup %2860 }
 0x3b8   : > { %v1786_v7 = vmul.f32 %v2861_v60, %v3227_v6  ;;  %2768 = vmatmul.mubr.msk.bf16.vlgmr.msra.gmra.mrb[32].mxu0 %vm1303_vm2, %v1793_v5  ;;  %v2828_v6 = vld [vmem:[%s3365_s8] sm:$0xff]  }
 0x3b9   : > { %v2863_v8 = vpop.eup %2862  ;;  %2778 = vmatpush3.bf16.msra.mxu0 %v2123_v38  ;;  %2779 = vmatprep.mubr.msk.bf16.mxu0 %vm2873_vm0, %v2872_v1 }
 0x3ba   : > { %v1787_v63 = vmul.f32 %v2863_v8, %v3232_v11  ;;  %v1794_v9 = vpack.c.bf16 %v1786_v7, %v1786_v7 }
 0x3bc   : > { %2774 = vmatmul.mubr.msk.bf16.vlgmr.msra.gmra.mrb[32].mxu1 %vm1303_vm2, %v1794_v9  ;;  %v1795_v10 = vpack.c.bf16 %v1787_v63, %v1787_v63 }
 0x3bd   : > { %2791 = vmatprep.mubr.msk.bf16.mxu1 %vm2873_vm0, %v2872_v1  ;;  %2784 = vmatpush3.bf16.msra.mxu1 %v2828_v6 }
 0x3be   : > { %2785 = vmatprep.subr.bf16.mxu1 %v2872_v1 }
 0x3c0   : > { %2780 = vmatmul.mubr.msk.bf16.vlgmr.msra.gmra.mrb[36].mxu0 %vm1303_vm2, %v1795_v10 }
 0x477   : > { %v1837_v12 = vpop.f32.mrb[20].mxu1 }
 0x478   : > { %v2739_v13 = vpop.f32.mrb[21].mxu1 }
 0x479   : > { %v1840_v14 = vpop.f32.mrb[22].mxu1  ;;  %v1883_v11 = vpop.f32.mrb[24].mxu0 }
 0x47a   : > { %v2740_v15 = vpop.f32.mrb[23].mxu1  ;;  %v2745_v16 = vpop.f32.mrb[25].mxu0 }
 0x47b   : > { %v1886_v17 = vpop.f32.mrb[26].mxu0 }
 0x47c   : > { %v2746_v19 = vpop.f32.mrb[27].mxu0 }
 0x47f   : > { %v1929_v20 = vpop.f32.mrb[24].mxu1 }
 0x480   : > { %v2751_v22 = vpop.f32.mrb[25].mxu1 }
 0x481   : > { %v1932_v23 = vpop.f32.mrb[26].mxu1 }
 0x482   : > { %v2752_v24 = vpop.f32.mrb[27].mxu1 }
 0x483   : > { %v1975_v18 = vpop.f32.mrb[28].mxu0 }
 0x484   : > { %v2757_v25 = vpop.f32.mrb[29].mxu0 }
 0x485   : > { %v1978_v26 = vpop.f32.mrb[30].mxu0 }
 0x486   : > { %v2758_v27 = vpop.f32.mrb[31].mxu0  ;;  %v2829_v26 = vld [vmem:[%s3365_s8 + $0x8] sm:$0xff]  }
 0x487   : > { %v2021_v28 = vpop.f32.mrb[28].mxu1  ;;  %2786 = vmatpush3.bf16.msra.mxu1 %v2829_v26 }
 0x488   : > { %v2605_v29 = vpack.c.bf16 %v2021_v28, %v1837_v12  ;;  %v2763_v30 = vpop.f32.mrb[29].mxu1  ;;  %2787 = vmatprep.subr.bf16.mxu1 %v2872_v1 }
 0x489   : > { %v2024_v21 = vpop.f32.mrb[30].mxu1 }
 0x48a   : > { %v2764_v32 = vpop.f32.mrb[31].mxu1  ;;  %v2180_v47 = vrot.slane %v2605_v29, %v3044_v35  ;;  %v2830_v21 = vld [vmem:[%s3365_s8 + $0x10] sm:$0xff]  }
 0x48b   : > { %v2067_v36 = vpop.f32.mrb[32].mxu0  ;;  %2788 = vmatpush3.bf16.msra.mxu1 %v2830_v21 }
 0x48c   : > { %v2607_v37 = vpack.c.bf16 %v2067_v36, %v1883_v11  ;;  %v2769_v40 = vpop.f32.mrb[33].mxu0  ;;  %2789 = vmatprep.subr.bf16.mxu1 %v2872_v1 }
 0x48d   : > { %v2070_v41 = vpop.f32.mrb[34].mxu0 }
 0x48e   : > { %v2770_v31 = vpop.f32.mrb[35].mxu0  ;;  %v2214_v58 = vrot.slane %v2607_v37, %v3044_v35 }
 0x48f   : > { %v2113_v38 = vpop.f32.mrb[32].mxu1 }
 0x490   : > { %v2606_v44 = vpack.c.bf16 %v2113_v38, %v1929_v20  ;;  %v2775_v45 = vpop.f32.mrb[33].mxu1 }
 0x491   : > { %v2116_v46 = vpop.f32.mrb[34].mxu1 }
 0x492   : > { %v2188_v33 = vrot.slane %v2606_v44, %v3044_v35  ;;  %v2776_v48 = vpop.f32.mrb[35].mxu1 }
 0x493   : > { %v2159_v49 = vpop.f32.mrb[36].mxu0 }
 0x494   : > { %v2189_v50 = vcombine.low %v2180_v47, %v2188_v33  ;;  %v2190_v51 = vcombine.high %v2180_v47, %v2188_v33  ;;  %v2608_v53 = vpack.c.bf16 %v2159_v49, %v1975_v18  ;;  %v2781_v54 = vpop.f32.mrb[37].mxu0  ;;  %v2831_v49 = vld [vmem:[%s3365_s8 + $0x18] sm:$0xff]  }
 0x495   : > { %v2162_v55 = vpop.f32.mrb[38].mxu0  ;;  %2790 = vmatpush3.bf16.msra.mxu1 %v2831_v49 }
 0x496   : > { %v2197_v39 = vrot.slane %v2189_v50, %v3047_v42  ;;  %v2222_v43 = vrot.slane %v2608_v53, %v3044_v35  ;;  %v2782_v57 = vpop.f32.mrb[39].mxu0  ;;  %v2204_v59 = vrot.slane %v2190_v51, %v3047_v42 }
 0x498   : > { %v2223_v61 = vcombine.low %v2214_v58, %v2222_v43  ;;  %v2224_v62 = vcombine.high %v2214_v58, %v2222_v43  ;;  %v2205_v0 = vcombine.high %v2197_v39, %v2883_v56  ;;  %v2206_v3 = vcombine.high %v2204_v59, %v2883_v56 }
 0x499   : > { %v2245_v52 = vshrl.u32 %v2197_v39, 16  ;;  %v2261_v63 = vshrl.u32 %v2204_v59, 16 }
 0x49a   : > { %v2231_v2 = vrot.slane %v2223_v61, %v3047_v42  ;;  %v2238_v34 = vrot.slane %v2224_v62, %v3047_v42  ;;  %v2253_v8 = vshrl.u32 %v2205_v0, 16  ;;  %v2269_v11 = vshrl.u32 %v2206_v3, 16 }
 0x49c   : > { %v2239_v4 = vcombine.high %v2231_v2, %v2883_v56  ;;  %v2240_v5 = vcombine.high %v2238_v34, %v2883_v56  ;;  %v2243_v60 = vpack.i.b16 %v2231_v2, %v2197_v39  ;;  %v2246_v7 = vshrl.u32 %v2231_v2, 16 }
 0x49d   : > { %v2259_v9 = vpack.i.b16 %v2238_v34, %v2204_v59  ;;  %v2262_v10 = vshrl.u32 %v2238_v34, 16 }
 0x49e   : > { %v2247_v6 = vpack.i.b16 %v2246_v7, %v2245_v52  ;;  %v2251_v12 = vpack.i.b16 %v2239_v4, %v2205_v0  ;;  %v2254_v13 = vshrl.u32 %v2239_v4, 16  ;;  %v2267_v14 = vpack.i.b16 %v2240_v5, %v2206_v3 }
 0x49f   : > { %v2263_v15 = vpack.i.b16 %v2262_v10, %v2261_v63  ;;  %v2270_v16 = vshrl.u32 %v2240_v5, 16  ;;  %v2273_v17 = vcombine.low %v2243_v60, %v2259_v9  ;;  %v2609_v9 = vld [vmem:[%s3366_s9] ss:$0 sm:$0xff] }
 0x4a0   : > { %v2255_v19 = vpack.i.b16 %v2254_v13, %v2253_v8  ;;  %v2281_v20 = vcombine.low %v2251_v12, %v2267_v14 }
 0x4a1   : > { %v2271_v22 = vpack.i.b16 %v2270_v16, %v2269_v11  ;;  %v2307_v23 = vcombine.low %v2247_v6, %v2263_v15  ;;  %v2280_v24 = vrot.slane %v2273_v17, %v3044_v35 }
 0x4a2   : > { %v2288_v18 = vrot.slane %v2281_v20, %v3044_v35 }
 0x4a3   : > { %v2315_v25 = vcombine.low %v2255_v19, %v2271_v22  ;;  %v2314_v29 = vrot.slane %v2307_v23, %v3044_v35 }
 0x4a4   : > { %v2289_v27 = vcombine.low %v2280_v24, %v2288_v18  ;;  %v2290_v28 = vcombine.high %v2280_v24, %v2288_v18 }
 0x4a5   : > { %v2322_v30 = vrot.slane %v2315_v25, %v3044_v35 }
 0x4a6   : > { %v2297_v32 = vrot.slane %v2289_v27, %v3047_v42  ;;  %v2304_v36 = vrot.slane %v2290_v28, %v3047_v42 }
 0x4a7   : > { %v2323_v37 = vcombine.low %v2314_v29, %v2322_v30  ;;  %v2324_v40 = vcombine.high %v2314_v29, %v2322_v30 }
 0x4a8   : > { %v2305_v41 = vcombine.high %v2297_v32, %v2883_v56  ;;  %v2344_v35 = vshrl.u32 %v2297_v32, 16  ;;  %v2356_v44 = vshrl.u32 %v2304_v36, 16  ;;  %v2306_v45 = vcombine.high %v2304_v36, %v2883_v56 }
 0x4a9   : > { %v2331_v31 = vrot.slane %v2323_v37, %v3047_v42  ;;  %v2338_v38 = vrot.slane %v2324_v40, %v3047_v42 }
 0x4aa   : > { %v2350_v51 = vshrl.u32 %v2305_v41, 16  ;;  %v2362_v1 = vshrl.u32 %v2306_v45, 16 }
 0x4ab   : > { %v2345_v46 = vshrl.u32 %v2331_v31, 16  ;;  %v2339_v47 = vcombine.high %v2331_v31, %v2883_v56  ;;  %v2355_v33 = vpack.i.b16 %v2338_v38, %v2304_v36  ;;  %v2357_v48 = vshrl.u32 %v2338_v38, 16 }
 0x4ac   : > { %v2340_v50 = vcombine.high %v2338_v38, %v2883_v56  ;;  %v2343_v42 = vpack.i.b16 %v2331_v31, %v2297_v32 }
 0x4ad   : > { %v2346_v53 = vpack.i.b16 %v2345_v46, %v2344_v35  ;;  %v2349_v54 = vpack.i.b16 %v2339_v47, %v2305_v41  ;;  %v2358_v55 = vpack.i.b16 %v2357_v48, %v2356_v44  ;;  %v2351_v39 = vshrl.u32 %v2339_v47, 16 }
 0x4ae   : > { %v2361_v43 = vpack.i.b16 %v2340_v50, %v2306_v45  ;;  %v2363_v57 = vshrl.u32 %v2340_v50, 16 }
 0x4af   : > { %2365 = vrot.lane.b32.xlu0 %v2346_v53, %s2884_s24  ;;  %2367 = vrot.lane.b32.xlu1 %v2349_v54, %s2885_s27  ;;  %v2352_v58 = vpack.i.b16 %v2351_v39, %v2350_v51 }
 0x4b0   : > { %v2364_v59 = vpack.i.b16 %v2363_v57, %v2362_v1 }
 0x4b3   : > { %2371 = vrot.lane.b32.xlu0 %v2355_v33, %s2886_s28  ;;  %2373 = vrot.lane.b32.xlu1 %v2358_v55, %s2887_s17 }
 0x4b7   : > { %2375 = vrot.lane.b32.xlu0 %v2361_v43, %s2888_s18  ;;  %2369 = vrot.lane.b32.xlu1 %v2352_v58, %s2889_s19 }
 0x4bb   : > { %2377 = vrot.lane.b32.xlu1 %v2364_v59, %s2890_s20 }
 0x521   : > { %v2366_v56 = vpop.permute.xlu0 %2365  ;;  %v2368_v61 = vpop.permute.xlu1 %2367 }
 0x522   : > { %v2381_v0 = vsel %vm1303_vm2, %v2343_v42, %v2366_v56 }
 0x523   : > { %v2384_v34 = vsel %vm2382_vm4, %v2381_v0, %v2368_v61 }
 0x525   : > { %v2374_v62 = vpop.permute.xlu1 %2373  ;;  %v2372_v2 = vpop.permute.xlu0 %2371 }
 0x529   : > { %v2370_v3 = vpop.permute.xlu1 %2369  ;;  %v2376_v5 = vpop.permute.xlu0 %2375 }
 0x52a   : > { %v2387_v52 = vsel %vm2385_vm5, %v2384_v34, %v2370_v3 }
 0x52b   : > { %v2389_v4 = vsel %vm481_vm1, %v2387_v52, %v2372_v2 }
 0x52c   : > { %v2392_v60 = vsel %vm2390_vm6, %v2389_v4, %v2374_v62 }
 0x52d   : > { %v2395_v7 = vsel %vm2393_vm7, %v2392_v60, %v2376_v5  ;;  %v2378_v8 = vpop.permute.xlu1 %2377 }
 0x52e   : > { %v2398_v63 = vsel %vm2396_vm8, %v2395_v7, %v2378_v8 }
 0x52f   : > { %2792 = vmatmul.mubr.msk.bf16.vlgmr.msra.gmra.mrb[36].mxu1 %vm2438_vm9, %v2398_v63 }
 0x602   : > { %v2475_v10 = vpop.f32.mrb[36].mxu1 }
 0x603   : > { %v2476_v6 = vadd.f32 %v2609_v9, %v2475_v10  ;;  %v2793_v12 = vpop.f32.mrb[37].mxu1 }
 0x604   : > { %v2478_v13 = vpop.f32.mrb[38].mxu1 }
 0x605   : > { %v2481_v14 = vpack.c.bf16 %v2476_v6, %v2476_v6  ;;  %v2794_v11 = vpop.f32.mrb[39].mxu1 }
 0x607   : > { %2483 = vst.msk [vmem:[%s453_s13] sm:$0xf] %vm2482_vm10, %v2481_v14 }
 0x608 PF: > { %s22_s21 = sadd.s32 1, %s2870_s21  }
 0x609   : > { %p19_p4 = scmp.ge.s32.totalorder %s22_s21, 4  }
 0x60b   :  { %21 = sbr.rel (!%p19_p4) target bundleno = 1 (0x1), region = 107 }

// kernel: edge_decoder_block.5
= control target key start
LH: loop header
LB: loop body
LE: loop exit
PB: predicated region body
PF: predicated region fallthrough
CT: control target
= control target key end

     0   :  { %s3436_s21 = smov 0   ;;  %s3438_s22 = smov 0   ;;  %s3941_s0 = inlined_call_operand.vmem [shape: bf16[2,8,32], index: 0, kind: input, shape index: {}]   ;;  %s3942_s1 = inlined_call_operand.vmem [shape: bf16[2,8,32], index: 1, kind: input, shape index: {}]   ;;  %s3943_s2 = inlined_call_operand.vmem [shape: bf16[2,8,8,8], index: 2, kind: input, shape index: {}]   ;;  %s3944_s3 = inlined_call_operand.vmem [shape: bf16[2,8,8], index: 3, kind: input, shape index: {}]   ;;  %s3945_s4 = inlined_call_operand.vmem [shape: bf16[32,32], index: 4, kind: input, shape index: {}]   ;;  %s3946_s5 = inlined_call_operand.vmem [shape: f32[1,32], index: 5, kind: input, shape index: {}]   ;;  %s3947_s6 = inlined_call_operand.vmem [shape: bf16[32,64], index: 6, kind: input, shape index: {}]   ;;  %s3948_s7 = inlined_call_operand.vmem [shape: f32[1,64], index: 7, kind: input, shape index: {}]   ;;  %s3949_s8 = inlined_call_operand.vmem [shape: bf16[32,32], index: 8, kind: input, shape index: {}]   ;;  %s3950_s9 = inlined_call_operand.vmem [shape: f32[1,32], index: 9, kind: input, shape index: {}]   ;;  %s3951_s10 = inlined_call_operand.vmem [shape: f32[1,32], index: 10, kind: input, shape index: {}]   ;;  %s3952_s11 = inlined_call_operand.vmem [shape: f32[1,32], index: 11, kind: input, shape index: {}]   ;;  %s3953_s12 = inlined_call_operand.vmem [shape: bf16[2,8,32], index: 12, kind: output, shape index: {}]  }
   0x1   :  { %s3440_s23 = smov 0  }
   0x2 LB: > { %s34_s24 = sadd.s32 1, %s3349_s22  ;;  %p2984_p0 = scmp.ge.s32.totalorder %s3353_s23, 1  ;;  %s3353_s23 = sphi %s3440_s23, %s22_s23   ;;  %s3349_s22 = sphi %s3438_s22, %s3955_s22   ;;  %s3345_s21 = sphi %s3436_s21, %s3954_s21  }
   0x3   : > { %p36_p1 = scmp.ge.s32.totalorder %s34_s24, 2  ;;  %p411_p2 = scmp.lt.s32.totalorder %s3353_s23, 3 }
   0x5   : > { %s3957_s24 = smov (%p36_p1, %s34_s24), 0  ;;  %p412_p3 = pnand %p2984_p0, %p411_p2 }
   0x6   : > { %v3299_v0 = vld [vmem:[%s3945_s4] sm:$0xff] (!%p412_p3)   ;;  %v3355_v1 = vmov (!%p412_p3), 0.0   ;;  %v3300_v2 = vld [vmem:[%s3945_s4 + $0x8] sm:$0xff] (!%p412_p3)   ;;  %vm3356_vm0 = vmmov (!%p412_p3), 0   ;;  %p470_p4 = scmp.lt.s32.totalorder (!%p412_p3), %s3345_s21, 1  ;;  %vm526_vm1 = vcmask (!%p412_p3), 261120   ;;  %v581_v28 = vlaneseq (!%p412_p3) }
   0x7   : > { %415 = sbr.rel (%p412_p3) target bundleno = 1892 (0x764), region = 68  ;;  %3089 = vmatprep.subr.bf16.mxu0 (!%p412_p3), %v3355_v1  ;;  %3097 = vmatprep.subr.bf16.mxu1 (!%p412_p3), %v3355_v1  ;;  %v3301_v3 = vld [vmem:[%s3947_s6] sm:$0xff] (!%p412_p3)   ;;  %v3302_v4 = vld [vmem:[%s3947_s6 + $0x8] sm:$0xff] (!%p412_p3)   ;;  %v3357_v7 = vmov (!%p412_p3), 0   ;;  %vm766_vm2 = vcmask (!%p412_p3), 64512   ;;  %s3359_s13 = smov (!%p412_p3), 120  }
   0x8   : > { %3090 = vmatpush3.bf16.msra.mxu0 (!%p412_p3), %v3299_v0  ;;  %3093 = vmatprep.mubr.msk.bf16.mxu0 (!%p412_p3), %vm3356_vm0, %v3355_v1  ;;  %v2991_v8 = vld [vmem:[%s3946_s5] ss:$0 sm:$0xff] (!%p412_p3)  ;;  %767 = vst.msk [vmem:[#allocation6] sm:$0xff] (!%p412_p3), %vm766_vm2, %v3355_v1  ;;  %768 = vst.msk [vmem:[#allocation6 + $0x8] sm:$0xff] (!%p412_p3), %vm766_vm2, %v3355_v1  ;;  %s3360_s14 = smov (!%p412_p3), 112   ;;  %s3361_s16 = smov (!%p412_p3), 88  }
   0x9   : > { %3091 = vmatprep.subr.bf16.mxu0 (!%p412_p3), %v3355_v1  ;;  %3101 = vmatprep.mubr.msk.bf16.mxu1 (!%p412_p3), %vm3356_vm0, %v3355_v1  ;;  %v2995_v10 = vld [vmem:[%s3948_s7] ss:$0 sm:$0xff] (!%p412_p3)  ;;  %769 = vst.msk [vmem:[#allocation6 + $0x10] sm:$0xff] (!%p412_p3), %vm766_vm2, %v3355_v1  ;;  %770 = vst.msk [vmem:[#allocation6 + $0x18] sm:$0xff] (!%p412_p3), %vm766_vm2, %v3355_v1  ;;  %s3362_s17 = smov (!%p412_p3), 96   ;;  %s3364_s20 = smov (!%p412_p3), 80  }
   0xa   : > { %3098 = vmatpush3.bf16.msra.mxu1 (!%p412_p3), %v3301_v3  ;;  %3298 = vset.pattern.permute.xlu0 (!%p412_p3), %v3357_v7  ;;  %v3365_v26 = vmov (!%p412_p3), 1983009808   ;;  %v3366_v29 = vmov (!%p412_p3), 1934713408   ;;  %v582_v32 = vshrl.u32 (!%p412_p3), %v581_v28, 7  ;;  %vm748_vm3 = vcmask (!%p412_p3), 58368  }
   0xb   : > { %3099 = vmatprep.subr.bf16.mxu1 (!%p412_p3), %v3355_v1  ;;  %3297 = vset.pattern.permute.xlu1 (!%p412_p3), %v3357_v7  ;;  %v579_v27 = vunpack.c.l.s4 (!%p412_p3), %v3365_v26  ;;  %v596_v30 = vunpack.c.l.s4 (!%p412_p3), %v3366_v29  ;;  %vm743_vm4 = vcmask (!%p412_p3), 60416   ;;  %vm1810_vm5 = vcmask (!%p412_p3), 1043456  }
   0xc   : > { %3092 = vmatpush3.bf16.msra.mxu0 (!%p412_p3), %v3300_v2  ;;  %vm757_vm6 = vcmask (!%p412_p3), 7168   ;;  %vm2762_vm7 = vcmask (!%p412_p3), 130048   ;;  %vm2765_vm8 = vcmask (!%p412_p3), 195584   ;;  %vm2870_vm9 = vcmask (!%p412_p3), 257024  }
   0xd   : > { %3105 = vmatprep.subr.bf16.mxu0 (!%p412_p3), %v3355_v1  ;;  %v580_v31 = vunpack.c.0.s8 (!%p412_p3), %v579_v27  ;;  %v597_v33 = vunpack.c.0.s8 (!%p412_p3), %v596_v30  ;;  %762 = vst.msk [vmem:[#allocation5] sm:$0xff] (!%p412_p3), %vm757_vm6, %v3355_v1  ;;  %763 = vst.msk [vmem:[#allocation5 + $0x8] sm:$0xff] (!%p412_p3), %vm757_vm6, %v3355_v1 }
   0xe   : > { %s3959_s21 = smov (!%p470_p4, %s3345_s21), 1  ;;  %3100 = vmatpush3.bf16.msra.mxu1 %v3302_v4  ;;  %764 = vst.msk [vmem:[#allocation5 + $0x10] sm:$0xff] %vm757_vm6, %v3355_v1  ;;  %765 = vst.msk [vmem:[#allocation5 + $0x18] sm:$0xff] %vm757_vm6, %v3355_v1 }
   0xf   : > { %s3474_s15 = sshll.u32 %s3959_s21, 2  ;;  %3111 = vmatprep.subr.bf16.mxu1 %v3355_v1  ;;  %s3031_s19 = sshll.u32 %s3959_s21, 5  ;;  %v3534_v34 = vsub.s32 %v580_v31, %v582_v32  ;;  %v3537_v38 = vsub.s32 %v597_v33, %v582_v32 }
  0x10   : > { %s3480_s18 = scalar_lea.vmem %s3942_s1, %s3474_s15  ;;  %s3503_s30 = scalar_lea.vmem %s3943_s2, %s3031_s19 }
  0x11   : > { %v502_v5 = vld [vmem:[%s3480_s18] sm:$0xf]  ;;  %s3358_s21 = smov 104   ;;  %v3521_v24 = vld [vmem:[%s3503_s30 + $0x4] sm:$0xf]  ;;  %s3363_s19 = smov 72  }
  0x12   : > { %v776_v6 = vld [vmem:[%s3480_s18] sm:$0xf]  ;;  %3094 = vmatmul.mubr.msk.bf16.vlgmr.msra.gmra.mrb[0].mxu0 %vm526_vm1, %v502_v5  ;;  %v1130_v25 = vsel %vm766_vm2, %v3521_v24, 0  ;;  %v3561_v26 = vld [vmem:[%s3503_s30 + $0xc] sm:$0xf]  ;;  %s492_s27 = scalar_lea.vmem %s3944_s3, %s3474_s15 }
  0x13   : > { %3107 = vmatprep.mubr.msk.bf16.mxu0 %vm3356_vm0, %v3355_v1  ;;  %3102 = vmatmul.mubr.msk.bf16.vlgmr.msra.gmra.mrb[0].mxu1 %vm526_vm1, %v776_v6  ;;  %v3506_v20 = vld [vmem:[%s3503_s30] sm:$0xf]  ;;  %v3572_v33 = vld [vmem:[%s3503_s30 + $0x10] sm:$0xf] }
  0x14   : > { %3113 = vmatprep.mubr.msk.bf16.mxu1 %vm3356_vm0, %v3355_v1  ;;  %v1084_v23 = vsel %vm766_vm2, %v3506_v20, 0 }
  0x15   : > { %3106 = vmatpush3.bf16.xpose.msra.mxu0 %v1084_v23 }
  0x16   : > { %3117 = vmatprep.subr.bf16.mxu0 %v3355_v1 }
  0x17   : > { %3112 = vmatpush3.bf16.xpose.msra.mxu1 %v1130_v25 }
  0x18   : > { %3123 = vmatprep.subr.bf16.mxu1 %v3355_v1 }
  0xe5   : > { %v564_v9 = vpop.f32.mrb[0].mxu0 }
  0xe6   : > { %v565_v11 = vadd.f32 %v2991_v8, %v564_v9  ;;  %v3095_v12 = vpop.f32.mrb[1].mxu0  ;;  %v838_v14 = vpop.f32.mrb[0].mxu1 }
  0xe7   : > { %v567_v13 = vpop.f32.mrb[2].mxu0  ;;  %v839_v17 = vadd.f32 %v2995_v10, %v838_v14  ;;  %v3103_v18 = vpop.f32.mrb[1].mxu1 }
  0xe8   : > { %v570_v15 = vpack.c.bf16 %v565_v11, %v565_v11  ;;  %v3096_v16 = vpop.f32.mrb[3].mxu0  ;;  %v841_v19 = vpop.f32.mrb[2].mxu1 }
  0xe9   : > { %v3508_v21 = vpack.c.bf16 %v839_v17, %v839_v17  ;;  %v3104_v22 = vpop.f32.mrb[3].mxu1  ;;  %v3557_v19 = vld [vmem:[%s3503_s30 + $0x8] sm:$0xf] }
  0xea   : > { %576 = vrot.lane.b32.xlu1 %v570_v15, %s3358_s21  ;;  %572 = vrot.lane.b32.xlu0 %v570_v15, %s3359_s13  ;;  %v584_v47 = vrot.slane %v570_v15, %v3534_v34  ;;  %v1176_v32 = vsel %vm766_vm2, %v3557_v19, 0 }
  0xee   : > { %846 = vrot.lane.b32.xlu1 %v3508_v21, %s3359_s13  ;;  %574 = vrot.lane.b32.xlu0 %v570_v15, %s3360_s14  ;;  %s3368_s13 = smov 8  }
  0xf2   : > { %852 = vrot.lane.b32.xlu1 %v3508_v21, %s3358_s21  ;;  %849 = vrot.lane.b32.xlu0 %v3508_v21, %s3360_s14  ;;  %s3369_s14 = smov 16  }
  0xf6   : > { %858 = vrot.lane.b32.xlu1 %v3508_v21, %s3361_s16  ;;  %855 = vrot.lane.b32.xlu0 %v3508_v21, %s3362_s17  ;;  %s3370_s16 = smov 24  }
  0xfa   : > { %864 = vrot.lane.b32.xlu1 %v3508_v21, %s3363_s19  ;;  %861 = vrot.lane.b32.xlu0 %v3508_v21, %s3364_s20  ;;  %s473_s20 = scalar_lea.vmem %s3941_s0, %s3474_s15 }
 0x15c   : > { %v577_v35 = vpop.permute.xlu1 %576  ;;  %v573_v36 = vpop.permute.xlu0 %572 }
 0x15d   : > { %v626_v37 = vrot.slane %v577_v35, %v3534_v34  ;;  %v618_v39 = vrot.slane %v573_v36, %v3534_v34 }
 0x15f   : > { %v627_v40 = vcombine.low %v618_v39, %v626_v37  ;;  %v628_v41 = vcombine.high %v618_v39, %v626_v37  ;;  %v1222_v39 = vsel %vm766_vm2, %v3561_v26, 0 }
 0x160   : > { %v847_v42 = vpop.permute.xlu1 %846  ;;  %v575_v43 = vpop.permute.xlu0 %574 }
 0x161   : > { %v635_v44 = vrot.slane %v627_v40, %v3537_v38  ;;  %v642_v45 = vrot.slane %v628_v41, %v3537_v38  ;;  %v592_v46 = vrot.slane %v575_v43, %v3534_v34  ;;  %v3579_v40 = vld [vmem:[%s3503_s30 + $0x14] sm:$0xf] }
 0x163   : > { %v593_v48 = vcombine.low %v584_v47, %v592_v46  ;;  %v594_v49 = vcombine.high %v584_v47, %v592_v46  ;;  %v643_v52 = vcombine.high %v635_v44, %v3357_v7  ;;  %v644_v53 = vcombine.high %v642_v45, %v3357_v7 }
 0x164   : > { %v853_v50 = vpop.permute.xlu1 %852  ;;  %v850_v51 = vpop.permute.xlu0 %849  ;;  %v650_v56 = vshrl.u32 %v635_v44, 16  ;;  %v666_v57 = vshrl.u32 %v642_v45, 16 }
 0x165   : > { %v601_v54 = vrot.slane %v593_v48, %v3537_v38  ;;  %v608_v55 = vrot.slane %v594_v49, %v3537_v38  ;;  %v658_v0 = vshrl.u32 %v643_v52, 16  ;;  %v674_v2 = vshrl.u32 %v644_v53, 16 }
 0x166   : > { %v1268_v49 = vsel %vm766_vm2, %v3572_v33, 0 }
 0x167   : > { %v609_v58 = vcombine.high %v601_v54, %v3357_v7  ;;  %v610_v59 = vcombine.high %v608_v55, %v3357_v7  ;;  %v647_v60 = vpack.i.b16 %v635_v44, %v601_v54  ;;  %v649_v61 = vshrl.u32 %v601_v54, 16 }
 0x168   : > { %v859_v62 = vpop.permute.xlu1 %858  ;;  %v856_v63 = vpop.permute.xlu0 %855  ;;  %v663_v3 = vpack.i.b16 %v642_v45, %v608_v55  ;;  %v665_v4 = vshrl.u32 %v608_v55, 16  ;;  %v1314_v54 = vsel %vm766_vm2, %v3579_v40, 0 }
 0x169   : > { %v651_v5 = vpack.i.b16 %v650_v56, %v649_v61  ;;  %v655_v6 = vpack.i.b16 %v643_v52, %v609_v58  ;;  %v657_v8 = vshrl.u32 %v609_v58, 16  ;;  %v671_v9 = vpack.i.b16 %v644_v53, %v610_v59  ;;  %749 = vst.msk [vmem:[#allocation3] sm:$0x3] %vm748_vm3, %v647_v60 }
 0x16a   : > { %v667_v10 = vpack.i.b16 %v666_v57, %v665_v4  ;;  %v673_v11 = vshrl.u32 %v610_v59, 16  ;;  %v677_v12 = vcombine.low %v647_v60, %v663_v3  ;;  %753 = vst.msk [vmem:[#allocation3 + $0x8] sm:$0x3] %vm748_vm3, %v663_v3  ;;  %v901_v13 = vcombine.low %v847_v42, %v859_v62 }
 0x16b   : > { %v659_v14 = vpack.i.b16 %v658_v0, %v657_v8  ;;  %v685_v15 = vcombine.low %v655_v6, %v671_v9  ;;  %750 = vst.msk [vmem:[#allocation3 + $0x2] sm:$0x3] %vm748_vm3, %v651_v5  ;;  %751 = vst.msk [vmem:[#allocation3 + $0x4] sm:$0x3] %vm748_vm3, %v655_v6  ;;  %v867_v16 = vcombine.low %v3508_v21, %v856_v63 }
 0x16c   : > { %755 = vst.msk [vmem:[#allocation3 + $0xc] sm:$0x3] %vm748_vm3, %v671_v9  ;;  %v865_v17 = vpop.permute.xlu1 %864  ;;  %v862_v18 = vpop.permute.xlu0 %861  ;;  %v675_v22 = vpack.i.b16 %v674_v2, %v673_v11  ;;  %v702_v23 = vcombine.low %v651_v5, %v667_v10  ;;  %754 = vst.msk [vmem:[#allocation3 + $0xa] sm:$0x3] %vm748_vm3, %v667_v10  ;;  %v684_v27 = vrot.slane %v677_v12, %v3534_v34 }
 0x16d   : > { %v909_v25 = vcombine.low %v853_v50, %v865_v17  ;;  %v692_v28 = vrot.slane %v685_v15, %v3534_v34  ;;  %752 = vst.msk [vmem:[#allocation3 + $0x6] sm:$0x3] %vm748_vm3, %v659_v14  ;;  %v875_v21 = vcombine.low %v850_v51, %v862_v18  ;;  %v908_v30 = vrot.slane %v901_v13, %v3534_v34 }
 0x16e   : > { %v710_v29 = vcombine.low %v659_v14, %v675_v22  ;;  %756 = vst.msk [vmem:[#allocation3 + $0xe] sm:$0x3] %vm748_vm3, %v675_v22  ;;  %v874_v36 = vrot.slane %v867_v16, %v3534_v34  ;;  %v709_v41 = vrot.slane %v702_v23, %v3534_v34 }
 0x16f   : > { %v916_v31 = vrot.slane %v909_v25, %v3534_v34  ;;  %v693_v35 = vcombine.low %v684_v27, %v692_v28  ;;  %v882_v37 = vrot.slane %v875_v21, %v3534_v34 }
 0x170   : > { %v717_v42 = vrot.slane %v710_v29, %v3534_v34  ;;  %v1063_v45 = vld [vmem:[#allocation3] sm:$0x3] }
 0x171   : > { %v917_v43 = vcombine.low %v908_v30, %v916_v31  ;;  %v918_v44 = vcombine.high %v908_v30, %v916_v31  ;;  %v700_v46 = vrot.slane %v693_v35, %v3537_v38  ;;  %v883_v47 = vcombine.low %v874_v36, %v882_v37  ;;  %3108 = vmatmul.mubr.msk.bf16.vlgmr.msra.gmra.mrb[4].mxu0 %vm766_vm2, %v1063_v45 }
 0x172   : > { %v884_v48 = vcombine.high %v874_v36, %v882_v37  ;;  %v718_v50 = vcombine.low %v709_v41, %v717_v42  ;;  %3118 = vmatpush3.bf16.xpose.msra.mxu0 %v1176_v32  ;;  %v1064_v53 = vld [vmem:[#allocation3 + $0x2] sm:$0x3]  ;;  %3119 = vmatprep.mubr.msk.bf16.mxu0 %vm3356_vm0, %v3355_v1  ;;  %v1065_v17 = vld [vmem:[#allocation3 + $0x4] sm:$0x3]  ;;  %v3617_v36 = vld [vmem:[%s3503_s30 + $0x18] sm:$0xf] }
 0x173   : > { %v925_v51 = vrot.slane %v917_v43, %v3537_v38  ;;  %v932_v52 = vrot.slane %v918_v44, %v3537_v38  ;;  %v701_v55 = vcombine.high %v700_v46, %v3357_v7  ;;  %v731_v56 = vshrl.u32 %v700_v46, 16  ;;  %3114 = vmatmul.mubr.msk.bf16.vlgmr.msra.gmra.mrb[4].mxu1 %vm766_vm2, %v1064_v53  ;;  %3129 = vmatprep.subr.bf16.mxu0 %v3355_v1  ;;  %v3625_v42 = vld [vmem:[%s3503_s30 + $0x1c] sm:$0xf] }
 0x174   : > { %v891_v57 = vrot.slane %v883_v47, %v3537_v38  ;;  %v898_v58 = vrot.slane %v884_v48, %v3537_v38  ;;  %v725_v59 = vrot.slane %v718_v50, %v3537_v38  ;;  %3124 = vmatpush3.bf16.xpose.msra.mxu1 %v1222_v39  ;;  %3125 = vmatprep.mubr.msk.bf16.mxu1 %vm3356_vm0, %v3355_v1  ;;  %v1066_v29 = vld [vmem:[#allocation3 + $0x6] sm:$0x3]  ;;  %v1360_v44 = vsel %vm766_vm2, %v3617_v36, 0  ;;  %v1067_v47 = vld [vmem:[#allocation3 + $0x8] sm:$0x3] }
 0x175   : > { %v933_v60 = vcombine.high %v925_v51, %v3357_v7  ;;  %v934_v61 = vcombine.high %v932_v52, %v3357_v7  ;;  %v940_v62 = vshrl.u32 %v925_v51, 16  ;;  %v739_v63 = vshrl.u32 %v701_v55, 16  ;;  %3135 = vmatprep.subr.bf16.mxu1 %v3355_v1 }
 0x176   : > { %v956_v0 = vshrl.u32 %v932_v52, 16  ;;  %v899_v2 = vcombine.high %v891_v57, %v3357_v7  ;;  %v900_v3 = vcombine.high %v898_v58, %v3357_v7  ;;  %v726_v4 = vcombine.high %v725_v59, %v3357_v7 }
 0x177   : > { %v729_v5 = vpack.i.b16 %v725_v59, %v700_v46  ;;  %v732_v6 = vshrl.u32 %v725_v59, 16  ;;  %v948_v8 = vshrl.u32 %v933_v60, 16  ;;  %v964_v9 = vshrl.u32 %v934_v61, 16 }
 0x178   : > { %v937_v10 = vpack.i.b16 %v925_v51, %v891_v57  ;;  %v939_v11 = vshrl.u32 %v891_v57, 16  ;;  %v945_v12 = vpack.i.b16 %v933_v60, %v899_v2  ;;  %v737_v14 = vpack.i.b16 %v726_v4, %v701_v55 }
 0x179   : > { %v733_v13 = vpack.i.b16 %v732_v6, %v731_v56  ;;  %v740_v15 = vshrl.u32 %v726_v4, 16  ;;  %744 = vst.msk [vmem:[#allocation2] sm:$0xf] %vm743_vm4, %v729_v5  ;;  %v947_v16 = vshrl.u32 %v899_v2, 16  ;;  %v953_v22 = vpack.i.b16 %v932_v52, %v898_v58  ;;  %3120 = vmatmul.mubr.msk.bf16.vlgmr.msra.gmra.mrb[8].mxu0 %vm766_vm2, %v1065_v17  ;;  %v1068_v52 = vld [vmem:[#allocation3 + $0xa] sm:$0x3] }
 0x17a   : > { %v941_v18 = vpack.i.b16 %v940_v62, %v939_v11  ;;  %v955_v23 = vshrl.u32 %v898_v58, 16  ;;  %v961_v25 = vpack.i.b16 %v934_v61, %v900_v3  ;;  %746 = vst.msk [vmem:[#allocation2 + $0x8] sm:$0xf] %vm743_vm4, %v737_v14  ;;  %v963_v21 = vshrl.u32 %v900_v3, 16  ;;  %3130 = vmatpush3.bf16.xpose.msra.mxu0 %v1268_v49  ;;  %3131 = vmatprep.mubr.msk.bf16.mxu0 %vm3356_vm0, %v3355_v1 }
 0x17b   : > { %v741_v27 = vpack.i.b16 %v740_v15, %v739_v63  ;;  %745 = vst.msk [vmem:[#allocation2 + $0x4] sm:$0xf] %vm743_vm4, %v733_v13  ;;  %v949_v28 = vpack.i.b16 %v948_v8, %v947_v16  ;;  %v967_v31 = vcombine.low %v937_v10, %v953_v22  ;;  %3126 = vmatmul.mubr.msk.bf16.vlgmr.msra.gmra.mrb[8].mxu1 %vm766_vm2, %v1066_v29  ;;  %v1406_v50 = vsel %vm766_vm2, %v3625_v42, 0 }
 0x17c   : > { %v957_v30 = vpack.i.b16 %v956_v0, %v955_v23  ;;  %v975_v32 = vcombine.low %v945_v12, %v961_v25  ;;  %3141 = vmatprep.subr.bf16.mxu0 %v3355_v1  ;;  %v965_v35 = vpack.i.b16 %v964_v9, %v963_v21  ;;  %3136 = vmatpush3.bf16.xpose.msra.mxu1 %v1314_v54  ;;  %v1069_v0 = vld [vmem:[#allocation3 + $0xc] sm:$0x3]  ;;  %v1070_v9 = vld [vmem:[#allocation3 + $0xe] sm:$0x3] }
 0x17d   : > { %747 = vst.msk [vmem:[#allocation2 + $0xc] sm:$0xf] %vm743_vm4, %v741_v27  ;;  %3137 = vmatprep.mubr.msk.bf16.mxu1 %vm3356_vm0, %v3355_v1  ;;  %3147 = vmatprep.subr.bf16.mxu1 %v3355_v1  ;;  %v974_v39 = vrot.slane %v967_v31, %v3534_v34 }
 0x17e   : > { %v1001_v37 = vcombine.low %v941_v18, %v957_v30  ;;  %v982_v41 = vrot.slane %v975_v32, %v3534_v34  ;;  %v1009_v43 = vcombine.low %v949_v28, %v965_v35  ;;  %v3367_v32 = vmov -inf  }
 0x17f   : > { %759 = vst.msk [vmem:[#allocation4 + $0x8] sm:$0xff] %vm757_vm6, %v3367_v32  ;;  %758 = vst.msk [vmem:[#allocation4] sm:$0xff] %vm757_vm6, %v3367_v32 }
 0x180   : > { %v983_v45 = vcombine.low %v974_v39, %v982_v41  ;;  %v984_v46 = vcombine.high %v974_v39, %v982_v41  ;;  %v1008_v48 = vrot.slane %v1001_v37, %v3534_v34  ;;  %v1016_v49 = vrot.slane %v1009_v43, %v3534_v34  ;;  %v1059_v16 = vld [vmem:[#allocation2] sm:$0xf]  ;;  %760 = vst.msk [vmem:[#allocation4 + $0x10] sm:$0xff] %vm757_vm6, %v3367_v32 }
 0x181   : > { %3132 = vmatmul.mubr.msk.bf16.vlgmr.msra.gmra.mrb[12].mxu0 %vm766_vm2, %v1067_v47  ;;  %v1061_v21 = vld [vmem:[#allocation2 + $0x8] sm:$0xf]  ;;  %761 = vst.msk [vmem:[#allocation4 + $0x18] sm:$0xff] %vm757_vm6, %v3367_v32 }
 0x182   : > { %v998_v51 = vrot.slane %v984_v46, %v3537_v38  ;;  %3142 = vmatpush3.bf16.xpose.msra.mxu0 %v1360_v44  ;;  %3143 = vmatprep.mubr.msk.bf16.mxu0 %vm3356_vm0, %v3355_v1  ;;  %v991_v53 = vrot.slane %v983_v45, %v3537_v38  ;;  %v1017_v54 = vcombine.low %v1008_v48, %v1016_v49  ;;  %v1060_v18 = vld [vmem:[#allocation2 + $0x4] sm:$0xf] }
 0x183   : > { %v1018_v55 = vcombine.high %v1008_v48, %v1016_v49  ;;  %3138 = vmatmul.mubr.msk.bf16.vlgmr.msra.gmra.mrb[12].mxu1 %vm766_vm2, %v1068_v52  ;;  %3153 = vmatprep.subr.bf16.mxu0 %v3355_v1 }
 0x184   : > { %3148 = vmatpush3.bf16.xpose.msra.mxu1 %v1406_v50  ;;  %v1025_v56 = vrot.slane %v1017_v54, %v3537_v38  ;;  %3149 = vmatprep.mubr.msk.bf16.mxu1 %vm3356_vm0, %v3355_v1  ;;  %v3646_v58 = vcombine.high %v998_v51, %v3357_v7  ;;  %v1038_v60 = vshrl.u32 %v991_v53, 16  ;;  %v999_v3 = vcombine.high %v991_v53, %v3357_v7  ;;  %v1062_v30 = vld [vmem:[#allocation2 + $0xc] sm:$0xf] }
 0x185   : > { %v1032_v57 = vrot.slane %v1018_v55, %v3537_v38  ;;  %3159 = vmatprep.subr.bf16.mxu1 %v3355_v1  ;;  %v1050_v27 = vshrl.u32 %v998_v51, 16 }
 0x186   : > { %v1037_v59 = vpack.i.b16 %v1025_v56, %v991_v53  ;;  %v1039_v61 = vshrl.u32 %v1025_v56, 16  ;;  %v1033_v62 = vcombine.high %v1025_v56, %v3357_v7  ;;  %v1056_v6 = vshrl.u32 %v3646_v58, 16 }
 0x187   : > { %v3650_v63 = vcombine.high %v1032_v57, %v3357_v7  ;;  %v1044_v14 = vshrl.u32 %v999_v3, 16  ;;  %v1051_v23 = vshrl.u32 %v1032_v57, 16  ;;  %v1049_v25 = vpack.i.b16 %v1032_v57, %v998_v51 }
 0x188   : > { %v1040_v2 = vpack.i.b16 %v1039_v61, %v1038_v60  ;;  %v1520_v4 = vsel %vm766_vm2, %v1037_v59, 0  ;;  %v1045_v11 = vshrl.u32 %v1033_v62, 16  ;;  %v1043_v13 = vpack.i.b16 %v1033_v62, %v999_v3 }
 0x189   : > { %3144 = vmatmul.mubr.msk.bf16.vlgmr.msra.gmra.mrb[16].mxu0 %vm766_vm2, %v1069_v0  ;;  %v1055_v5 = vpack.i.b16 %v3650_v63, %v3646_v58  ;;  %v1057_v8 = vshrl.u32 %v3650_v63, 16  ;;  %v1052_v28 = vpack.i.b16 %v1051_v23, %v1050_v27  ;;  %v1812_v29 = vsel %vm1810_vm5, %v1049_v25, 0 }
 0x18a   : > { %3154 = vmatpush3.bf16.xpose.msra.mxu0 %v1520_v4  ;;  %3155 = vmatprep.mubr.msk.bf16.mxu0 %vm3356_vm0, %v3355_v1  ;;  %v1566_v10 = vsel %vm766_vm2, %v1040_v2, 0  ;;  %v1046_v15 = vpack.i.b16 %v1045_v11, %v1044_v14  ;;  %v1612_v17 = vsel %vm766_vm2, %v1043_v13, 0 }
 0x18b   : > { %3150 = vmatmul.mubr.msk.bf16.vlgmr.msra.gmra.mrb[16].mxu1 %vm766_vm2, %v1070_v9  ;;  %3165 = vmatprep.subr.bf16.mxu0 %v3355_v1  ;;  %v3664_v12 = vpack.i.b16 %v1057_v8, %v1056_v6  ;;  %v1858_v31 = vsel %vm1810_vm5, %v1052_v28, 0 }
 0x18c   : > { %3160 = vmatpush3.bf16.xpose.msra.mxu1 %v1566_v10  ;;  %3161 = vmatprep.mubr.msk.bf16.mxu1 %vm3356_vm0, %v3355_v1  ;;  %v1658_v22 = vsel %vm766_vm2, %v1046_v15, 0 }
 0x18d   : > { %3171 = vmatprep.subr.bf16.mxu1 %v3355_v1 }
 0x191   : > { %3156 = vmatmul.mubr.msk.bf16.vlgmr.msra.gmra.mrb[20].mxu0 %vm766_vm2, %v1059_v16 }
 0x192   : > { %3166 = vmatpush3.bf16.xpose.msra.mxu0 %v1612_v17  ;;  %3167 = vmatprep.mubr.msk.bf16.mxu0 %vm3356_vm0, %v3355_v1 }
 0x193   : > { %3162 = vmatmul.mubr.msk.bf16.vlgmr.msra.gmra.mrb[20].mxu1 %vm766_vm2, %v1060_v18  ;;  %3177 = vmatprep.subr.bf16.mxu0 %v3355_v1 }
 0x194   : > { %3172 = vmatpush3.bf16.xpose.msra.mxu1 %v1658_v22  ;;  %3173 = vmatprep.mubr.msk.bf16.mxu1 %vm3356_vm0, %v3355_v1 }
 0x195   : > { %3183 = vmatprep.subr.bf16.mxu1 %v3355_v1 }
 0x199   : > { %3168 = vmatmul.mubr.msk.bf16.vlgmr.msra.gmra.mrb[24].mxu0 %vm766_vm2, %v1061_v21 }
 0x19a   : > { %3178 = vmatpush3.bf16.msra.mxu0 %v1812_v29  ;;  %3179 = vmatprep.mubr.msk.bf16.mxu0 %vm3356_vm0, %v3355_v1 }
 0x19b   : > { %3174 = vmatmul.mubr.msk.bf16.vlgmr.msra.gmra.mrb[24].mxu1 %vm766_vm2, %v1062_v30  ;;  %3189 = vmatprep.subr.bf16.mxu0 %v3355_v1 }
 0x19c   : > { %3184 = vmatpush3.bf16.msra.mxu1 %v1858_v31  ;;  %3185 = vmatprep.mubr.msk.bf16.mxu1 %vm3356_vm0, %v3355_v1 }
 0x19d   : > { %3195 = vmatprep.subr.bf16.mxu1 %v3355_v1 }
 0x244   : > { %v1120_v35 = vpop.f32.mrb[4].mxu0 }
 0x245   : > { %v3109_v37 = vpop.f32.mrb[5].mxu0 }
 0x246   : > { %v1123_v39 = vpop.f32.mrb[6].mxu0  ;;  %v1166_v41 = vpop.f32.mrb[4].mxu1 }
 0x247   : > { %v3110_v43 = vpop.f32.mrb[7].mxu0  ;;  %v3115_v44 = vpop.f32.mrb[5].mxu1 }
 0x248   : > { %v1169_v45 = vpop.f32.mrb[6].mxu1  ;;  %v1704_v43 = vld [vmem:[%s492_s27] sm:$0xf] }
 0x249   : > { %v3116_v46 = vpop.f32.mrb[7].mxu1 }
 0x24c   : > { %v1212_v47 = vpop.f32.mrb[8].mxu0 }
 0x24d   : > { %v1448_v48 = vcombine.low %v1120_v35, %v1212_v47  ;;  %v3121_v49 = vpop.f32.mrb[9].mxu0 }
 0x24e   : > { %v1215_v50 = vpop.f32.mrb[10].mxu0  ;;  %v1258_v51 = vpop.f32.mrb[8].mxu1 }
 0x24f   : > { %v1456_v52 = vcombine.low %v1166_v41, %v1258_v51  ;;  %v3122_v53 = vpop.f32.mrb[11].mxu0  ;;  %v3127_v54 = vpop.f32.mrb[9].mxu1  ;;  %v1455_v56 = vrot.slane %v1448_v48, %v3534_v34 }
 0x250   : > { %v1261_v55 = vpop.f32.mrb[10].mxu1  ;;  %v1705_v54 = vunpack.c.l.bf16 %v1704_v43 }
 0x251   : > { %v1463_v57 = vrot.slane %v1456_v52, %v3534_v34  ;;  %v3128_v59 = vpop.f32.mrb[11].mxu1 }
 0x253   : > { %v1480_v60 = vcombine.low %v1455_v56, %v1463_v57  ;;  %v1481_v61 = vcombine.high %v1455_v56, %v1463_v57 }
 0x254   : > { %v1304_v62 = vpop.f32.mrb[12].mxu0 }
 0x255   : > { %v3133_v0 = vpop.f32.mrb[13].mxu0  ;;  %v1488_v30 = vrot.slane %v1480_v60, %v3537_v38  ;;  %v1495_v35 = vrot.slane %v1481_v61, %v3537_v38 }
 0x256   : > { %v1307_v2 = vpop.f32.mrb[14].mxu0  ;;  %v1350_v3 = vpop.f32.mrb[12].mxu1 }
 0x257   : > { %v3134_v4 = vpop.f32.mrb[15].mxu0  ;;  %v3139_v6 = vpop.f32.mrb[13].mxu1 }
 0x258   : > { %v1353_v8 = vpop.f32.mrb[14].mxu1 }
 0x259   : > { %v3140_v9 = vpop.f32.mrb[15].mxu1 }
 0x25c   : > { %v1396_v10 = vpop.f32.mrb[16].mxu0 }
 0x25d   : > { %v1464_v11 = vcombine.low %v1304_v62, %v1396_v10  ;;  %v3145_v13 = vpop.f32.mrb[17].mxu0 }
 0x25e   : > { %v1399_v14 = vpop.f32.mrb[18].mxu0  ;;  %v1442_v15 = vpop.f32.mrb[16].mxu1 }
 0x25f   : > { %v1472_v16 = vcombine.low %v1350_v3, %v1442_v15  ;;  %v3146_v17 = vpop.f32.mrb[19].mxu0  ;;  %v3151_v18 = vpop.f32.mrb[17].mxu1  ;;  %v1471_v23 = vrot.slane %v1464_v11, %v3534_v34 }
 0x260   : > { %v1445_v22 = vpop.f32.mrb[18].mxu1 }
 0x261   : > { %v1479_v25 = vrot.slane %v1472_v16, %v3534_v34  ;;  %v3152_v27 = vpop.f32.mrb[19].mxu1  ;;  %v3717_v22 = vld [vmem:[#allocation4 + $0x8] sm:$0xff] }
 0x263   : > { %v1496_v28 = vcombine.low %v1471_v23, %v1479_v25  ;;  %v1497_v21 = vcombine.high %v1471_v23, %v1479_v25  ;;  %v3719_v23 = vld [vmem:[#allocation4] sm:$0xff] }
 0x264   : > { %v1556_v29 = vpop.f32.mrb[20].mxu0 }
 0x265   : > { %v1504_v31 = vrot.slane %v1496_v28, %v3537_v38  ;;  %v3157_v32 = vpop.f32.mrb[21].mxu0  ;;  %v1511_v37 = vrot.slane %v1497_v21, %v3537_v38 }
 0x266   : > { %v1559_v39 = vpop.f32.mrb[22].mxu0  ;;  %v1602_v41 = vpop.f32.mrb[20].mxu1 }
 0x267   : > { %v1512_v44 = vcombine.low %v1488_v30, %v1504_v31  ;;  %v1513_v45 = vcombine.high %v1488_v30, %v1504_v31  ;;  %v3158_v46 = vpop.f32.mrb[23].mxu0  ;;  %v3163_v47 = vpop.f32.mrb[21].mxu1  ;;  %v1514_v48 = vcombine.low %v1495_v35, %v1511_v37  ;;  %v1515_v49 = vcombine.high %v1495_v35, %v1511_v37  ;;  %v3742_v37 = vld [vmem:[#allocation4 + $0x18] sm:$0xff] }
 0x268   : > { %v1605_v50 = vpop.f32.mrb[22].mxu1 }
 0x269   : > { %v1557_v51 = vadd.f32 %v1556_v29, %v1512_v44  ;;  %v1603_v52 = vadd.f32 %v1602_v41, %v1513_v45  ;;  %v3164_v53 = vpop.f32.mrb[23].mxu1  ;;  %v3727_v29 = vld [vmem:[#allocation4 + $0x10] sm:$0xff] }
 0x26b   : > { %v1700_v55 = vmul.f32 0.35355338, %v1557_v51  ;;  %v1701_v56 = vmul.f32 0.35355338, %v1603_v52 }
 0x26c   : > { %v1648_v57 = vpop.f32.mrb[24].mxu0 }
 0x26d   : > { %v1649_v59 = vadd.f32 %v1648_v57, %v1514_v48  ;;  %v3169_v60 = vpop.f32.mrb[25].mxu0  ;;  %v1707_v61 = vadd.f32 %v1705_v54, %v1701_v56  ;;  %v1706_v62 = vadd.f32 %v1705_v54, %v1700_v55 }
 0x26e   : > { %v1651_v0 = vpop.f32.mrb[26].mxu0  ;;  %v1694_v2 = vpop.f32.mrb[24].mxu1 }
 0x26f   : > { %v1702_v3 = vmul.f32 0.35355338, %v1649_v59  ;;  %v1695_v4 = vadd.f32 %v1694_v2, %v1515_v49  ;;  %v3170_v6 = vpop.f32.mrb[27].mxu0  ;;  %v3175_v8 = vpop.f32.mrb[25].mxu1  ;;  %v1717_v9 = vsel %vm766_vm2, %v1707_v61, -inf  ;;  %v1714_v10 = vsel %vm766_vm2, %v1706_v62, -inf }
 0x270   : > { %v1697_v11 = vpop.f32.mrb[26].mxu1  ;;  %1718 = vmax.xlane.f32.xlu1 %v1717_v9  ;;  %1715 = vmax.xlane.f32.xlu0 %v1714_v10  ;;  %v1904_v2 = vsel %vm1810_vm5, %v1055_v5, 0 }
 0x271   : > { %v1703_v13 = vmul.f32 0.35355338, %v1695_v4  ;;  %v3176_v14 = vpop.f32.mrb[27].mxu1  ;;  %v1708_v15 = vadd.f32 %v1705_v54, %v1702_v3  ;;  %v1950_v4 = vsel %vm1810_vm5, %v3664_v12, 0  ;;  %v2083_v11 = vsel %vm1810_vm5, %v3506_v20, 0 }
 0x272   : > { %v2128_v14 = vsel %vm1810_vm5, %v3521_v24, 0 }
 0x273   : > { %v1720_v16 = vsel %vm766_vm2, %v1708_v15, -inf  ;;  %v1709_v17 = vadd.f32 %v1705_v54, %v1703_v13 }
 0x274   : > { %1721 = vmax.xlane.f32.xlu0 %v1720_v16 }
 0x275   : > { %v1723_v18 = vsel %vm766_vm2, %v1709_v17, -inf }
 0x278   : > { %1724 = vmax.xlane.f32.xlu0 %v1723_v18 }
 0x2fd   : > { %v1719_v25 = vpop.xlane.xlu1 %1718  ;;  %v1716_v27 = vpop.xlane.xlu0 %1715 }
 0x2fe   : > { %v3722_v28 = vmax.f32 %v3717_v22, %v1719_v25  ;;  %v3725_v21 = vmax.f32 %v3719_v23, %v1716_v27 }
 0x300   : > { %v1731_v30 = vsub.f32 %v3717_v22, %v3722_v28  ;;  %2549 = vst.msk [vmem:[#allocation4 + $0x8] sm:$0xff] %vm757_vm6, %v3722_v28  ;;  %v1730_v31 = vsub.f32 %v3719_v23, %v3725_v21  ;;  %2548 = vst.msk [vmem:[#allocation4] sm:$0xff] %vm757_vm6, %v3725_v21  ;;  %1744 = vperm.xlu1 %3297, %v3725_v21   ;;  %1749 = vperm.xlu0 %3298, %v3722_v28   ;;  %v2173_v28 = vsel %vm1810_vm5, %v3557_v19, 0 }
 0x301   : > { %v1722_v32 = vpop.xlane.xlu0 %1721 }
 0x302   : > { %v3740_v35 = vmax.f32 %v3727_v29, %v1722_v32  ;;  %v1736_v13 = vmul.f32 1.442695, %v1731_v30  ;;  %v2218_v30 = vsel %vm1810_vm5, %v3561_v26, 0 }
 0x304   : > { %v1732_v39 = vsub.f32 %v3727_v29, %v3740_v35  ;;  %2550 = vst.msk [vmem:[#allocation4 + $0x10] sm:$0xff] %vm757_vm6, %v3740_v35  ;;  %1754 = vperm.xlu1 %3297, %v3740_v35  }
 0x305   : > { %v1725_v41 = vpop.xlane.xlu0 %1724 }
 0x306   : > { %v3750_v43 = vmax.f32 %v3742_v37, %v1725_v41  ;;  %v1738_v22 = vmul.f32 1.442695, %v1732_v39 }
 0x308   : > { %v1733_v44 = vsub.f32 %v3742_v37, %v3750_v43  ;;  %2551 = vst.msk [vmem:[#allocation4 + $0x18] sm:$0xff] %vm757_vm6, %v3750_v43  ;;  %1759 = vperm.xlu1 %3297, %v3750_v43   ;;  %v2263_v43 = vsel %vm1810_vm5, %v3572_v33, 0 }
 0x30a   : > { %v1740_v29 = vmul.f32 1.442695, %v1733_v44 }
 0x37f   : > { %v1745_v45 = vpop.permute.xlu1 %1744  ;;  %v1750_v46 = vpop.permute.xlu0 %1749 }
 0x380   : > { %v1762_v47 = vsub.f32 %v1706_v62, %v1745_v45  ;;  %v1763_v48 = vsub.f32 %v1707_v61, %v1750_v46  ;;  %v2308_v46 = vsel %vm1810_vm5, %v3579_v40, 0 }
 0x382   : > { %v1766_v49 = vmul.f32 1.442695, %v1762_v47  ;;  %v1768_v50 = vmul.f32 1.442695, %v1763_v48 }
 0x383   : > { %v1755_v51 = vpop.permute.xlu1 %1754 }
 0x384   : > { %3305 = vpow2.f32 %v1766_v49  ;;  %v1764_v52 = vsub.f32 %v1708_v15, %v1755_v51  ;;  %v2353_v51 = vsel %vm1810_vm5, %v3617_v36, 0 }
 0x385   : > { %3307 = vpow2.f32 %v1768_v50 }
 0x386   : > { %v1770_v53 = vmul.f32 1.442695, %v1764_v52 }
 0x387   : > { %v1760_v54 = vpop.permute.xlu1 %1759 }
 0x388   : > { %3309 = vpow2.f32 %v1770_v53  ;;  %v1765_v55 = vsub.f32 %v1709_v17, %v1760_v54  ;;  %v1734_v17 = vmul.f32 1.442695, %v1730_v31  ;;  %v2398_v54 = vsel %vm1810_vm5, %v3625_v42, 0 }
 0x38a   : > { %v1772_v56 = vmul.f32 1.442695, %v1765_v55 }
 0x38c   : > { %3311 = vpow2.f32 %v1772_v56 }
 0x38d   : > { %3313 = vpow2.f32 %v1736_v13 }
 0x38e   : > { %v3306_v57 = vpop.eup %3305  ;;  %3315 = vpow2.f32 %v1734_v17 }
 0x38f   : > { %v3308_v59 = vpop.eup %3307  ;;  %v1782_v60 = vsel %vm766_vm2, %v3306_v57, 0.0  ;;  %v1803_v0 = vpack.c.bf16 %v3306_v57, %v3306_v57  ;;  %3317 = vpow2.f32 %v1738_v22  ;;  %v3303_v22 = vld [vmem:[%s3949_s8] sm:$0xff]  }
 0x390   : > { %1783 = vadd.xlane.f32.xlu1 %v1782_v60  ;;  %v1785_v61 = vsel %vm766_vm2, %v3308_v59, 0.0  ;;  %v1804_v62 = vpack.c.bf16 %v3308_v59, %v3308_v59  ;;  %3319 = vpow2.f32 %v1740_v29  ;;  %v1774_v60 = vld [vmem:[#allocation5] sm:$0xff] }
 0x391   : > { %1786 = vadd.xlane.f32.xlu0 %v1785_v61  ;;  %3180 = vmatmul.mubr.msk.bf16.vlgmr.msra.gmra.mrb[28].mxu0 %vm766_vm2, %v1803_v0  ;;  %v3773_v58 = vrot.slane %v1803_v0, %v3534_v34  ;;  %v1775_v0 = vld [vmem:[#allocation5 + $0x8] sm:$0xff] }
 0x392   : > { %v3310_v3 = vpop.eup %3309  ;;  %3186 = vmatmul.mubr.msk.bf16.vlgmr.msra.gmra.mrb[28].mxu1 %vm766_vm2, %v1804_v62  ;;  %3190 = vmatpush3.bf16.msra.mxu0 %v1904_v2  ;;  %v2030_v15 = vrot.slane %v1804_v62, %v3534_v34 }
 0x393   : > { %3196 = vmatpush3.bf16.msra.mxu1 %v1950_v4  ;;  %v1788_v6 = vsel %vm766_vm2, %v3310_v3, 0.0  ;;  %3191 = vmatprep.mubr.msk.bf16.mxu0 %vm3356_vm0, %v3355_v1  ;;  %v1805_v8 = vpack.c.bf16 %v3310_v3, %v3310_v3  ;;  %v1776_v3 = vld [vmem:[#allocation5 + $0x10] sm:$0xff] }
 0x394   : > { %1789 = vadd.xlane.f32.xlu1 %v1788_v6  ;;  %3197 = vmatprep.mubr.msk.bf16.mxu1 %vm3356_vm0, %v3355_v1 }
 0x395   : > { %v3776_v63 = vrot.slane %v1805_v8, %v3534_v34  ;;  %3201 = vmatprep.subr.bf16.mxu0 %v3355_v1  ;;  %3207 = vmatprep.subr.bf16.mxu1 %v3355_v1 }
 0x396   : > { %v3312_v5 = vpop.eup %3311 }
 0x397   : > { %v1791_v12 = vsel %vm766_vm2, %v3312_v5, 0.0  ;;  %v2006_v9 = vcombine.low %v3773_v58, %v3776_v63  ;;  %v1806_v10 = vpack.c.bf16 %v3312_v5, %v3312_v5  ;;  %v3314_v35 = vpop.eup %3313  ;;  %v2007_v37 = vcombine.high %v3773_v58, %v3776_v63  ;;  %v1777_v5 = vld [vmem:[#allocation5 + $0x18] sm:$0xff] }
 0x398   : > { %1792 = vadd.xlane.f32.xlu1 %v1791_v12  ;;  %v3316_v44 = vpop.eup %3315  ;;  %v1779_v2 = vmul.f32 %v3314_v35, %v1775_v0 }
 0x399   : > { %3192 = vmatmul.mubr.msk.bf16.vlgmr.msra.gmra.mrb[32].mxu0 %vm766_vm2, %v1805_v8  ;;  %v2037_v16 = vrot.slane %v1806_v10, %v3534_v34  ;;  %v2014_v20 = vrot.slane %v2006_v9, %v3537_v38  ;;  %v2021_v48 = vrot.slane %v2007_v37, %v3537_v38  ;;  %v3318_v33 = vpop.eup %3317  ;;  %v1778_v61 = vmul.f32 %v3316_v44, %v1774_v60 }
 0x39a   : > { %3198 = vmatmul.mubr.msk.bf16.vlgmr.msra.gmra.mrb[32].mxu1 %vm766_vm2, %v1806_v10  ;;  %3202 = vmatpush3.bf16.msra.mxu0 %v2083_v11  ;;  %v3320_v52 = vpop.eup %3319  ;;  %v1780_v58 = vmul.f32 %v3318_v33, %v1776_v3 }
 0x39b   : > { %v2038_v18 = vcombine.low %v2030_v15, %v2037_v16  ;;  %3203 = vmatprep.mubr.msk.bf16.mxu0 %vm3356_vm0, %v3355_v1  ;;  %3208 = vmatpush3.bf16.msra.mxu1 %v2128_v14  ;;  %v2059_v25 = vshrl.u32 %v2014_v20, 16  ;;  %v2022_v19 = vcombine.high %v2014_v20, %v3357_v7  ;;  %v2039_v26 = vcombine.high %v2030_v15, %v2037_v16 }
 0x39c   : > { %3209 = vmatprep.mubr.msk.bf16.mxu1 %vm3356_vm0, %v3355_v1  ;;  %3213 = vmatprep.subr.bf16.mxu0 %v3355_v1  ;;  %v2071_v50 = vshrl.u32 %v2021_v48, 16  ;;  %v2023_v56 = vcombine.high %v2021_v48, %v3357_v7  ;;  %v1781_v9 = vmul.f32 %v3320_v52, %v1777_v5 }
 0x39d   : > { %v2046_v24 = vrot.slane %v2038_v18, %v3537_v38  ;;  %3219 = vmatprep.subr.bf16.mxu1 %v3355_v1  ;;  %v2065_v41 = vshrl.u32 %v2022_v19, 16  ;;  %v2053_v47 = vrot.slane %v2039_v26, %v3537_v38 }
 0x39e   : > { %v2077_v59 = vshrl.u32 %v2023_v56, 16 }
 0x39f   : > { %v2058_v23 = vpack.i.b16 %v2046_v24, %v2014_v20  ;;  %v2060_v27 = vshrl.u32 %v2046_v24, 16  ;;  %v2054_v31 = vcombine.high %v2046_v24, %v3357_v7  ;;  %v2072_v49 = vshrl.u32 %v2053_v47, 16 }
 0x3a0   : > { %v2070_v40 = vpack.i.b16 %v2053_v47, %v2021_v48  ;;  %v2055_v55 = vcombine.high %v2053_v47, %v3357_v7 }
 0x3a1   : > { %3204 = vmatmul.mubr.msk.bf16.vlgmr.msra.gmra.mrb[36].mxu0 %vm766_vm2, %v2058_v23  ;;  %v2061_v21 = vpack.i.b16 %v2060_v27, %v2059_v25  ;;  %v2066_v32 = vshrl.u32 %v2054_v31, 16  ;;  %v2064_v39 = vpack.i.b16 %v2054_v31, %v2022_v19  ;;  %v2073_v53 = vpack.i.b16 %v2072_v49, %v2071_v50 }
 0x3a2   : > { %3214 = vmatpush3.bf16.msra.mxu0 %v2173_v28  ;;  %3215 = vmatprep.mubr.msk.bf16.mxu0 %vm3356_vm0, %v3355_v1  ;;  %v2078_v36 = vshrl.u32 %v2055_v55, 16  ;;  %v2076_v57 = vpack.i.b16 %v2055_v55, %v2023_v56 }
 0x3a3   : > { %3210 = vmatmul.mubr.msk.bf16.vlgmr.msra.gmra.mrb[36].mxu1 %vm766_vm2, %v2061_v21  ;;  %3225 = vmatprep.subr.bf16.mxu0 %v3355_v1  ;;  %v2067_v45 = vpack.i.b16 %v2066_v32, %v2065_v41 }
 0x3a4   : > { %3220 = vmatpush3.bf16.msra.mxu1 %v2218_v30  ;;  %3221 = vmatprep.mubr.msk.bf16.mxu1 %vm3356_vm0, %v3355_v1  ;;  %v2079_v42 = vpack.i.b16 %v2078_v36, %v2077_v59 }
 0x3a5   : > { %3231 = vmatprep.subr.bf16.mxu1 %v3355_v1 }
 0x3a7   : > { %2451 = vperm.xlu0 %3298, %v3314_v35  }
 0x3a9   : > { %2446 = vperm.xlu1 %3297, %v3316_v44   ;;  %3216 = vmatmul.mubr.msk.bf16.vlgmr.msra.gmra.mrb[40].mxu0 %vm766_vm2, %v2064_v39 }
 0x3aa   : > { %3226 = vmatpush3.bf16.msra.mxu0 %v2263_v43  ;;  %3227 = vmatprep.mubr.msk.bf16.mxu0 %vm3356_vm0, %v3355_v1 }
 0x3ab   : > { %3222 = vmatmul.mubr.msk.bf16.vlgmr.msra.gmra.mrb[40].mxu1 %vm766_vm2, %v2067_v45  ;;  %3237 = vmatprep.subr.bf16.mxu0 %v3355_v1 }
 0x3ac   : > { %3232 = vmatpush3.bf16.msra.mxu1 %v2308_v46  ;;  %3233 = vmatprep.mubr.msk.bf16.mxu1 %vm3356_vm0, %v3355_v1 }
 0x3ad   : > { %2456 = vperm.xlu1 %3297, %v3318_v33   ;;  %3243 = vmatprep.subr.bf16.mxu1 %v3355_v1 }
 0x3b1   : > { %2461 = vperm.xlu1 %3297, %v3320_v52   ;;  %3228 = vmatmul.mubr.msk.bf16.vlgmr.msra.gmra.mrb[44].mxu0 %vm766_vm2, %v2070_v40 }
 0x3b2   : > { %3238 = vmatpush3.bf16.msra.mxu0 %v2353_v51  ;;  %3239 = vmatprep.mubr.msk.bf16.mxu0 %vm3356_vm0, %v3355_v1 }
 0x3b3   : > { %3234 = vmatmul.mubr.msk.bf16.vlgmr.msra.gmra.mrb[44].mxu1 %vm766_vm2, %v2073_v53  ;;  %3249 = vmatprep.subr.bf16.mxu0 %v3355_v1 }
 0x3b4   : > { %3244 = vmatpush3.bf16.msra.mxu1 %v2398_v54  ;;  %3245 = vmatprep.mubr.msk.bf16.mxu1 %vm3356_vm0, %v3355_v1 }
 0x3b9   : > { %3240 = vmatmul.mubr.msk.bf16.vlgmr.msra.gmra.mrb[48].mxu0 %vm766_vm2, %v2076_v57 }
 0x3ba   : > { %3253 = vmatprep.mubr.msk.bf16.mxu0 %vm3356_vm0, %v3355_v1  ;;  %3250 = vmatpush3.bf16.msra.mxu0 %v3303_v22  ;;  %v2442_v22 = vld [vmem:[#allocation6 + $0x10] sm:$0xff] }
 0x3bb   : > { %3246 = vmatmul.mubr.msk.bf16.vlgmr.msra.gmra.mrb[48].mxu1 %vm766_vm2, %v2079_v42  ;;  %3251 = vmatprep.subr.bf16.mxu0 %v3355_v1 }
 0x41d   : > { %v1784_v62 = vpop.xlane.xlu1 %1783 }
 0x41e   : > { %v1794_v4 = vadd.f32 %v1784_v62, %v1778_v61  ;;  %v1787_v6 = vpop.xlane.xlu0 %1786 }
 0x41f   : > { %v1795_v8 = vadd.f32 %v1787_v6, %v1779_v2 }
 0x420   : > { %1799 = vst.msk [vmem:[#allocation5] sm:$0xff] %vm757_vm6, %v1794_v4 }
 0x421   : > { %1800 = vst.msk [vmem:[#allocation5 + $0x8] sm:$0xff] %vm757_vm6, %v1795_v8  ;;  %v1790_v63 = vpop.xlane.xlu1 %1789 }
 0x422   : > { %v1796_v12 = vadd.f32 %v1790_v63, %v1780_v58 }
 0x424   : > { %1801 = vst.msk [vmem:[#allocation5 + $0x10] sm:$0xff] %vm757_vm6, %v1796_v12 }
 0x425   : > { %v1793_v10 = vpop.xlane.xlu1 %1792 }
 0x426   : > { %v1797_v11 = vadd.f32 %v1793_v10, %v1781_v9 }
 0x427   : > { %v2559_v13 = vld [vmem:[#allocation5] sm:$0xff] }
 0x428   : > { %1802 = vst.msk [vmem:[#allocation5 + $0x18] sm:$0xff] %vm757_vm6, %v1797_v11  ;;  %3321 = vrcp.f32 %v2559_v13  ;;  %v2560_v14 = vld [vmem:[#allocation5 + $0x8] sm:$0xff] }
 0x429   : > { %3323 = vrcp.f32 %v2560_v14  ;;  %v2447_v62 = vpop.permute.xlu1 %2446 }
 0x42b   : > { %v2561_v15 = vld [vmem:[#allocation5 + $0x10] sm:$0xff] }
 0x42c   : > { %3325 = vrcp.f32 %v2561_v15 }
 0x42d   : > { %v2457_v5 = vpop.permute.xlu1 %2456 }
 0x42f   : > { %v2562_v16 = vld [vmem:[#allocation5 + $0x18] sm:$0xff] }
 0x430   : > { %3327 = vrcp.f32 %v2562_v16 }
 0x432   : > { %v3322_v17 = vpop.eup %3321 }
 0x433   : > { %2569 = vperm.xlu1 %3297, %v3322_v17   ;;  %v3324_v18 = vpop.eup %3323  ;;  %v2441_v17 = vld [vmem:[#allocation6 + $0x8] sm:$0xff] }
 0x436   : > { %v3326_v20 = vpop.eup %3325 }
 0x437   : > { %2579 = vperm.xlu0 %3298, %v3326_v20   ;;  %2574 = vperm.xlu1 %3297, %v3324_v18   ;;  %v2452_v18 = vpop.permute.xlu0 %2451 }
 0x43a   : > { %v3328_v24 = vpop.eup %3327 }
 0x43b   : > { %2584 = vperm.xlu1 %3297, %v3328_v24   ;;  %v2440_v24 = vld [vmem:[#allocation6] sm:$0xff] }
 0x464   : > { %v3863_v23 = vpop.f32.mrb[28].mxu0 }
 0x465   : > { %v3865_v25 = vpop.f32.mrb[28].mxu1  ;;  %v3181_v27 = vpop.f32.mrb[29].mxu0 }
 0x466   : > { %v3187_v28 = vpop.f32.mrb[29].mxu1  ;;  %v1851_v21 = vpop.f32.mrb[30].mxu0  ;;  %v2443_v27 = vld [vmem:[#allocation6 + $0x18] sm:$0xff] }
 0x467   : > { %v1897_v30 = vpop.f32.mrb[30].mxu1  ;;  %v3182_v31 = vpop.f32.mrb[31].mxu0 }
 0x468   : > { %v3188_v29 = vpop.f32.mrb[31].mxu1  ;;  %v2462_v28 = vpop.permute.xlu1 %2461 }
 0x46c   : > { %v3867_v19 = vpop.f32.mrb[32].mxu0 }
 0x46d   : > { %v3869_v26 = vpop.f32.mrb[32].mxu1  ;;  %v3193_v32 = vpop.f32.mrb[33].mxu0 }
 0x46e   : > { %v3199_v35 = vpop.f32.mrb[33].mxu1  ;;  %v1943_v37 = vpop.f32.mrb[34].mxu0 }
 0x46f   : > { %v1989_v39 = vpop.f32.mrb[34].mxu1  ;;  %v3194_v41 = vpop.f32.mrb[35].mxu0  ;;  %v2465_v35 = vmul.f32 %v2452_v18, %v2441_v17  ;;  %v2464_v37 = vmul.f32 %v2447_v62, %v2440_v24 }
 0x470   : > { %v3200_v1 = vpop.f32.mrb[35].mxu1  ;;  %v2466_v39 = vmul.f32 %v2457_v5, %v2442_v22  ;;  %v2467_v41 = vmul.f32 %v2462_v28, %v2443_v27 }
 0x474   : > { %v2119_v43 = vpop.f32.mrb[36].mxu0 }
 0x475   : > { %v3205_v44 = vpop.f32.mrb[37].mxu0 }
 0x476   : > { %v2122_v45 = vpop.f32.mrb[38].mxu0  ;;  %v2164_v46 = vpop.f32.mrb[36].mxu1 }
 0x477   : > { %v3206_v47 = vpop.f32.mrb[39].mxu0  ;;  %v3211_v48 = vpop.f32.mrb[37].mxu1 }
 0x478   : > { %v2167_v33 = vpop.f32.mrb[38].mxu1  ;;  %v2469_v47 = vadd.f32 %v2465_v35, %v3865_v25  ;;  %v2470_v48 = vadd.f32 %v2466_v39, %v3867_v19 }
 0x479   : > { %v3212_v49 = vpop.f32.mrb[39].mxu1  ;;  %v2471_v33 = vadd.f32 %v2467_v41, %v3869_v26 }
 0x47c   : > { %v2209_v40 = vpop.f32.mrb[40].mxu0 }
 0x47d   : > { %v2472_v50 = vcombine.low %v2119_v43, %v2209_v40  ;;  %v3217_v51 = vpop.f32.mrb[41].mxu0 }
 0x47e   : > { %v2212_v52 = vpop.f32.mrb[42].mxu0  ;;  %v2254_v53 = vpop.f32.mrb[40].mxu1 }
 0x47f   : > { %v2480_v54 = vcombine.low %v2164_v46, %v2254_v53  ;;  %v3218_v55 = vpop.f32.mrb[43].mxu0  ;;  %v3223_v56 = vpop.f32.mrb[41].mxu1  ;;  %v2479_v57 = vrot.slane %v2472_v50, %v3534_v34  ;;  %v2468_v46 = vadd.f32 %v2464_v37, %v3863_v23 }
 0x480   : > { %v2257_v36 = vpop.f32.mrb[42].mxu1 }
 0x481   : > { %v2487_v59 = vrot.slane %v2480_v54, %v3534_v34  ;;  %v3224_v42 = vpop.f32.mrb[43].mxu1 }
 0x483   : > { %v2504_v60 = vcombine.low %v2479_v57, %v2487_v59  ;;  %v2505_v0 = vcombine.high %v2479_v57, %v2487_v59 }
 0x484   : > { %v2299_v61 = vpop.f32.mrb[44].mxu0 }
 0x485   : > { %v3229_v2 = vpop.f32.mrb[45].mxu0  ;;  %v2512_v1 = vrot.slane %v2504_v60, %v3537_v38  ;;  %v2519_v43 = vrot.slane %v2505_v0, %v3537_v38 }
 0x486   : > { %v2302_v3 = vpop.f32.mrb[46].mxu0  ;;  %v2344_v4 = vpop.f32.mrb[44].mxu1 }
 0x487   : > { %v3230_v6 = vpop.f32.mrb[47].mxu0  ;;  %v3235_v8 = vpop.f32.mrb[45].mxu1 }
 0x488   : > { %v2347_v58 = vpop.f32.mrb[46].mxu1 }
 0x489   : > { %v3236_v63 = vpop.f32.mrb[47].mxu1 }
 0x48c   : > { %v2389_v12 = vpop.f32.mrb[48].mxu0 }
 0x48d   : > { %v2488_v9 = vcombine.low %v2299_v61, %v2389_v12  ;;  %v3241_v10 = vpop.f32.mrb[49].mxu0 }
 0x48e   : > { %v2392_v11 = vpop.f32.mrb[50].mxu0  ;;  %v2434_v13 = vpop.f32.mrb[48].mxu1 }
 0x48f   : > { %v2496_v14 = vcombine.low %v2344_v4, %v2434_v13  ;;  %v3242_v15 = vpop.f32.mrb[51].mxu0  ;;  %v3247_v16 = vpop.f32.mrb[49].mxu1  ;;  %v2495_v21 = vrot.slane %v2488_v9, %v3534_v34 }
 0x490   : > { %v2437_v20 = vpop.f32.mrb[50].mxu1 }
 0x491   : > { %v2503_v30 = vrot.slane %v2496_v14, %v3534_v34  ;;  %v3248_v31 = vpop.f32.mrb[51].mxu1 }
 0x493   : > { %v2520_v29 = vcombine.low %v2495_v21, %v2503_v30  ;;  %v2521_v32 = vcombine.high %v2495_v21, %v2503_v30 }
 0x495   : > { %v2528_v44 = vrot.slane %v2520_v29, %v3537_v38  ;;  %v2535_v45 = vrot.slane %v2521_v32, %v3537_v38 }
 0x497   : > { %v2536_v49 = vcombine.low %v2512_v1, %v2528_v44  ;;  %v2537_v40 = vcombine.high %v2512_v1, %v2528_v44  ;;  %v2538_v50 = vcombine.low %v2519_v43, %v2535_v45  ;;  %v2539_v51 = vcombine.high %v2519_v43, %v2535_v45 }
 0x499   : > { %v2540_v52 = vadd.f32 %v2536_v49, %v2468_v46  ;;  %v2541_v53 = vadd.f32 %v2537_v40, %v2469_v47  ;;  %v2542_v54 = vadd.f32 %v2538_v50, %v2470_v48  ;;  %v2543_v55 = vadd.f32 %v2539_v51, %v2471_v33  ;;  %v3304_v40 = vld [vmem:[%s3949_s8 + $0x8] sm:$0xff]  }
 0x49a   : > { %3252 = vmatpush3.bf16.msra.mxu0 %v3304_v40 }
 0x49b   : > { %2544 = vst.msk [vmem:[#allocation6] sm:$0xff] %vm766_vm2, %v2540_v52  ;;  %2545 = vst.msk [vmem:[#allocation6 + $0x8] sm:$0xff] %vm766_vm2, %v2541_v53 }
 0x49c   : > { %2546 = vst.msk [vmem:[#allocation6 + $0x10] sm:$0xff] %vm766_vm2, %v2542_v54  ;;  %2547 = vst.msk [vmem:[#allocation6 + $0x18] sm:$0xff] %vm766_vm2, %v2543_v55 }
 0x4a2   : > { %v2555_v25 = vld [vmem:[#allocation6] sm:$0xff]  ;;  %v2556_v59 = vld [vmem:[#allocation6 + $0x8] sm:$0xff] }
 0x4a3   : > { %v2557_v36 = vld [vmem:[#allocation6 + $0x10] sm:$0xff]  ;;  %v2558_v62 = vld [vmem:[#allocation6 + $0x18] sm:$0xff] }
 0x4b2   : > { %v2570_v23 = vpop.permute.xlu1 %2569 }
 0x4b3   : > { %v2587_v19 = vmul.f32 %v2570_v23, %v2555_v25 }
 0x4b5   : > { %v2591_v57 = vpack.c.bf16 %v2587_v19, %v2587_v19 }
 0x4b6   : > { %v2575_v26 = vpop.permute.xlu1 %2574  ;;  %v2580_v56 = vpop.permute.xlu0 %2579 }
 0x4b7   : > { %v2589_v42 = vmul.f32 %v2580_v56, %v2557_v36  ;;  %v2588_v60 = vmul.f32 %v2575_v26, %v2556_v59  ;;  %v2598_v2 = vrot.slane %v2591_v57, %v3534_v34 }
 0x4b9   : > { %v2599_v0 = vpack.c.bf16 %v2589_v42, %v2589_v42  ;;  %v2625_v6 = vpack.c.bf16 %v2588_v60, %v2588_v60 }
 0x4ba   : > { %v2585_v61 = vpop.permute.xlu1 %2584 }
 0x4bb   : > { %v2606_v3 = vrot.slane %v2599_v0, %v3534_v34  ;;  %v2590_v4 = vmul.f32 %v2585_v61, %v2558_v62  ;;  %v2632_v9 = vrot.slane %v2625_v6, %v3534_v34 }
 0x4bd   : > { %v2607_v8 = vcombine.low %v2598_v2, %v2606_v3  ;;  %v2608_v58 = vcombine.high %v2598_v2, %v2606_v3  ;;  %v2633_v63 = vpack.c.bf16 %v2590_v4, %v2590_v4  ;;  %v2833_v2 = vld [vmem:[%s473_s20] sm:$0xf] }
 0x4be   : > { %v2835_v3 = vld [vmem:[%s3480_s18] sm:$0xf]  ;;  %v2834_v4 = vunpack.c.l.bf16 %v2833_v2 }
 0x4bf   : > { %v2615_v5 = vrot.slane %v2607_v8, %v3537_v38  ;;  %v2640_v12 = vrot.slane %v2633_v63, %v3534_v34  ;;  %v2622_v10 = vrot.slane %v2608_v58, %v3537_v38  ;;  %v2836_v6 = vunpack.c.l.bf16 %v2835_v3  ;;  %v3023_v8 = vld [vmem:[%s3950_s9] ss:$0 sm:$0xff] }
 0x4c1   : > { %v2641_v11 = vcombine.low %v2632_v9, %v2640_v12  ;;  %v2642_v13 = vcombine.high %v2632_v9, %v2640_v12  ;;  %v2623_v14 = vcombine.high %v2615_v5, %v3357_v7  ;;  %v2624_v17 = vcombine.high %v2622_v10, %v3357_v7 }
 0x4c2   : > { %v2663_v18 = vshrl.u32 %v2615_v5, 16  ;;  %v2679_v21 = vshrl.u32 %v2622_v10, 16  ;;  %v2837_v58 = vadd.f32 %v2836_v6, %v2834_v4 }
 0x4c3   : > { %v2649_v15 = vrot.slane %v2641_v11, %v3537_v38  ;;  %v2656_v16 = vrot.slane %v2642_v13, %v3537_v38  ;;  %v2671_v28 = vshrl.u32 %v2623_v14, 16  ;;  %v2687_v39 = vshrl.u32 %v2624_v17, 16 }
 0x4c5   : > { %v2657_v20 = vcombine.high %v2649_v15, %v3357_v7  ;;  %v2658_v24 = vcombine.high %v2656_v16, %v3357_v7  ;;  %v2661_v22 = vpack.i.b16 %v2649_v15, %v2615_v5  ;;  %v2664_v27 = vshrl.u32 %v2649_v15, 16 }
 0x4c6   : > { %v2677_v30 = vpack.i.b16 %v2656_v16, %v2622_v10  ;;  %v2680_v31 = vshrl.u32 %v2656_v16, 16 }
 0x4c7   : > { %v2665_v29 = vpack.i.b16 %v2664_v27, %v2663_v18  ;;  %v2669_v32 = vpack.i.b16 %v2657_v20, %v2623_v14  ;;  %v2672_v35 = vshrl.u32 %v2657_v20, 16  ;;  %v2685_v37 = vpack.i.b16 %v2658_v24, %v2624_v17 }
 0x4c8   : > { %v2681_v41 = vpack.i.b16 %v2680_v31, %v2679_v21  ;;  %v2688_v1 = vshrl.u32 %v2658_v24, 16  ;;  %v2691_v43 = vcombine.low %v2661_v22, %v2677_v30  ;;  %v3028_v30 = vld [vmem:[%s3952_s11] ss:$0 sm:$0xff] }
 0x4c9   : > { %v2673_v44 = vpack.i.b16 %v2672_v35, %v2671_v28  ;;  %v2699_v45 = vcombine.low %v2669_v32, %v2685_v37  ;;  %v3027_v28 = vld [vmem:[%s3951_s10] ss:$0 sm:$0xff] }
 0x4ca   : > { %v2689_v46 = vpack.i.b16 %v2688_v1, %v2687_v39  ;;  %v2716_v47 = vcombine.low %v2665_v29, %v2681_v41  ;;  %v2698_v48 = vrot.slane %v2691_v43, %v3534_v34 }
 0x4cb   : > { %v2706_v33 = vrot.slane %v2699_v45, %v3534_v34 }
 0x4cc   : > { %v2724_v49 = vcombine.low %v2673_v44, %v2689_v46  ;;  %v2723_v51 = vrot.slane %v2716_v47, %v3534_v34 }
 0x4cd   : > { %v2707_v50 = vcombine.low %v2698_v48, %v2706_v33 }
 0x4ce   : > { %v2731_v52 = vrot.slane %v2724_v49, %v3534_v34 }
 0x4cf   : > { %v2714_v53 = vrot.slane %v2707_v50, %v3537_v38 }
 0x4d0   : > { %v2732_v54 = vcombine.low %v2723_v51, %v2731_v52 }
 0x4d1   : > { %v2744_v23 = vshrl.u32 %v2714_v53, 16  ;;  %v2715_v19 = vcombine.high %v2714_v53, %v3357_v7 }
 0x4d2   : > { %v2739_v55 = vrot.slane %v2732_v54, %v3537_v38 }
 0x4d3   : > { %v2750_v34 = vshrl.u32 %v2715_v19, 16 }
 0x4d4   : > { %v2745_v25 = vshrl.u32 %v2739_v55, 16  ;;  %v2740_v26 = vcombine.high %v2739_v55, %v3357_v7  ;;  %v2743_v56 = vpack.i.b16 %v2739_v55, %v2714_v53 }
 0x4d6   : > { %v2746_v36 = vpack.i.b16 %v2745_v25, %v2744_v23  ;;  %v2749_v57 = vpack.i.b16 %v2740_v26, %v2715_v19  ;;  %v2751_v59 = vshrl.u32 %v2740_v26, 16 }
 0x4d8   : > { %2753 = vrot.lane.b32.xlu0 %v2746_v36, %s3368_s13  ;;  %2755 = vrot.lane.b32.xlu1 %v2749_v57, %s3369_s14  ;;  %v2752_v42 = vpack.i.b16 %v2751_v59, %v2750_v34  ;;  %s496_s13 = scalar_lea.vmem %s3953_s12, %s3474_s15 }
 0x4dc   : > { %2757 = vrot.lane.b32.xlu0 %v2752_v42, %s3370_s16 }
 0x54a   : > { %v2754_v38 = vpop.permute.xlu0 %2753  ;;  %v2756_v0 = vpop.permute.xlu1 %2755 }
 0x54b   : > { %v2761_v60 = vsel %vm766_vm2, %v2743_v56, %v2754_v38 }
 0x54c   : > { %v2764_v7 = vsel %vm2762_vm7, %v2761_v60, %v2756_v0 }
 0x54e   : > { %v2758_v61 = vpop.permute.xlu0 %2757 }
 0x54f   : > { %v2767_v62 = vsel %vm2765_vm8, %v2764_v7, %v2758_v61 }
 0x550   : > { %3254 = vmatmul.mubr.msk.bf16.vlgmr.msra.gmra.mrb[52].mxu0 %vm526_vm1, %v2767_v62 }
 0x623   : > { %v2827_v63 = vpop.f32.mrb[52].mxu0 }
 0x624   : > { %v2828_v5 = vadd.f32 %v3023_v8, %v2827_v63  ;;  %v3255_v12 = vpop.f32.mrb[53].mxu0 }
 0x625   : > { %v2830_v9 = vpop.f32.mrb[54].mxu0 }
 0x626   : > { %v3256_v10 = vpop.f32.mrb[55].mxu0  ;;  %v2838_v11 = vadd.f32 %v2837_v58, %v2828_v5 }
 0x628   : > { %v2839_v13 = vsel %vm526_vm1, %v2838_v11, 0.0 }
 0x629   : > { %2840 = vadd.xlane.f32.xlu1 %v2839_v13 }
 0x6b6   : > { %v2841_v14 = vpop.xlane.xlu1 %2840 }
 0x6b7   : > { %v2843_v15 = vmul.f32 0.03125, %v2841_v14 }
 0x6b9   : > { %v2844_v16 = vsub.f32 %v2838_v11, %v2843_v15 }
 0x6bb   : > { %v2845_v17 = vmul.f32 %v2844_v16, %v2844_v16 }
 0x6bd   : > { %v2846_v18 = vsel %vm526_vm1, %v2845_v17, 0.0 }
 0x6be   : > { %2847 = vadd.xlane.f32.xlu0 %v2846_v18 }
 0x74b   : > { %v2848_v20 = vpop.xlane.xlu0 %2847 }
 0x74c   : > { %v2849_v24 = vmul.f32 0.03125, %v2848_v20 }
 0x74e   : > { %v2850_v22 = vadd.f32 1e-05, %v2849_v24 }
 0x750   : > { %3329 = vrsqrt.f32 %v2850_v22 }
 0x75a   : > { %v3330_v27 = vpop.eup %3329 }
 0x75b   : > { %v2852_v21 = vmul.f32 %v3330_v27, %v2844_v16 }
 0x75d   : > { %v2860_v31 = vmul.f32 %v3027_v28, %v2852_v21 }
 0x75f   : > { %v2868_v29 = vadd.f32 %v3028_v30, %v2860_v31 }
 0x761   : > { %v2869_v32 = vpack.c.bf16 %v2868_v29, %v2868_v29 }
 0x763   : > { %2871 = vst.msk [vmem:[%s496_s13] sm:$0xf] %vm2870_vm9, %v2869_v32 }
 0x764 PF: > { %s22_s23 = sadd.s32 1, %s3353_s23   ;;  %s3954_s21 = smov %s3349_s22 }
 0x765   : > { %p19_p5 = scmp.ge.s32.totalorder %s22_s23, 4   ;;  %s3955_s22 = smov %s3957_s24 }
 0x767   :  { %21 = sbr.rel (!%p19_p5) target bundleno = 2 (0x2), region = 116 }

</bundles_post_ra>
